<compile_context>
chip_gen: v5e
topology: v5e:2x2
jax: 0.10.0
libtpu: 0.0.40
codegen_flags: <defaults>
</compile_context>

<pallas_src>
import functools
import math

import jax
import jax.numpy as jnp
from jax import lax
from jax.experimental import pallas as pl
from jax.experimental.pallas import tpu as pltpu

MXU_DTYPE = jnp.bfloat16   # bf16 MXU operands, f32 accumulation
LN_EPS = 1e-5


# ---------------------------------------------------------------------------
# helpers
# ---------------------------------------------------------------------------
def _pick_row_tile(M, cap=512):
    """Largest multiple-of-8 divisor of M that is <= cap, preferring >=2 grid
    steps so the row axis can be megacore-sharded (v7x has 2 TCs)."""
    best_full = M
    best_split = None
    t = 8
    while t <= min(M, cap):
        if M % t == 0:
            best_full = t
            if t <= M // 2:
                best_split = t
        t += 8
    return best_split if best_split is not None else best_full


def _full_spec(shape):
    return pl.BlockSpec(shape, lambda *_: (0,) * len(shape))


# ---------------------------------------------------------------------------
# Kernel 1: fused (self/cross) attention block  ->  LN(x + MHA(x, mem))
# grid = (B,), one batch element per step, all heads handled inside.
# ---------------------------------------------------------------------------
def _mha_block_kernel(*refs, num_heads, causal, has_mem):
    if has_mem:
        (x_ref, mem_ref, wqkv_ref, bqkv_ref, wo_ref, bo_ref,
         g_ref, b_ref, o_ref) = refs
    else:
        (x_ref, wqkv_ref, bqkv_ref, wo_ref, bo_ref,
         g_ref, b_ref, o_ref) = refs

    x = x_ref[0].astype(jnp.float32)                       # (Sq, D)
    Sq, D = x.shape
    Dh = D // num_heads
    scale = 1.0 / math.sqrt(Dh)

    wqkv = wqkv_ref[...].astype(MXU_DTYPE)                 # (D, 3D)
    bqkv = bqkv_ref[...].astype(jnp.float32)               # (1, 3D)

    if has_mem:
        mem = mem_ref[0].astype(jnp.float32)               # (Skv, D)
        q = jnp.dot(x.astype(MXU_DTYPE), wqkv[:, :D],
                    preferred_element_type=jnp.float32) + bqkv[:, :D]
        kv = jnp.dot(mem.astype(MXU_DTYPE), wqkv[:, D:],
                     preferred_element_type=jnp.float32) + bqkv[:, D:]
        k, v = kv[:, :D], kv[:, D:]
    else:
        # single fused QKV matmul for self-attention
        qkv = jnp.dot(x.astype(MXU_DTYPE), wqkv,
                      preferred_element_type=jnp.float32) + bqkv
        q, k, v = qkv[:, :D], qkv[:, D:2 * D], qkv[:, 2 * D:]

    Skv = k.shape[0]

    if causal:
        row = lax.broadcasted_iota(jnp.int32, (Sq, Skv), 0)
        col = lax.broadcasted_iota(jnp.int32, (Sq, Skv), 1)
        add_mask = jnp.where(col <= row, 0.0, -1e9).astype(jnp.float32)

    wo = wo_ref[...].astype(MXU_DTYPE)                     # (D, D)
    o = jnp.zeros((Sq, D), jnp.float32)
    for hd in range(num_heads):
        sl = slice(hd * Dh, (hd + 1) * Dh)
        qh = (q[:, sl] * scale).astype(MXU_DTYPE)          # (Sq, Dh)
        kh = k[:, sl].astype(MXU_DTYPE)                    # (Skv, Dh)
        vh = v[:, sl].astype(MXU_DTYPE)                    # (Skv, Dh)
        # contract last dims directly — no explicit K transpose
        s = lax.dot_general(qh, kh, (((1,), (1,)), ((), ())),
                            preferred_element_type=jnp.float32)   # (Sq, Skv)
        if causal:
            s = s + add_mask
        s = s - jnp.max(s, axis=-1, keepdims=True)
        p = jnp.exp(s)
        denom = jnp.sum(p, axis=-1, keepdims=True)
        p = p * pl.reciprocal(denom, approx=True)
        oh = jnp.dot(p.astype(MXU_DTYPE), vh,
                     preferred_element_type=jnp.float32)           # (Sq, Dh)
        # fold the head-merge into the output projection (no concat):
        o = o + jnp.dot(oh.astype(MXU_DTYPE), wo[sl, :],
                        preferred_element_type=jnp.float32)
    o = o + bo_ref[...].astype(jnp.float32)

    # residual + LayerNorm (f32 vector math)
    y = x + o
    inv_d = 1.0 / D
    mean = jnp.sum(y, axis=-1, keepdims=True) * inv_d
    c = y - mean
    var = jnp.sum(c * c, axis=-1, keepdims=True) * inv_d
    yn = c * lax.rsqrt(var + LN_EPS)
    o_ref[0] = (yn * g_ref[...].astype(jnp.float32)
                + b_ref[...].astype(jnp.float32)).astype(o_ref.dtype)


def mha_block(x, mem, p, *, num_heads, causal):
    """x: (B, Sq, D); mem: (B, Skv, D) or None (self-attention). Returns LN(x + MHA)."""
    B, Sq, D = x.shape
    has_mem = mem is not None
    kernel = functools.partial(_mha_block_kernel, num_heads=num_heads,
                               causal=causal, has_mem=has_mem)
    in_specs = [pl.BlockSpec((1, Sq, D), lambda b: (b, 0, 0))]
    args = [x]
    if has_mem:
        Skv = mem.shape[1]
        in_specs.append(pl.BlockSpec((1, Skv, D), lambda b: (b, 0, 0)))
        args.append(mem)
    in_specs += [
        _full_spec((D, 3 * D)),   # wqkv
        _full_spec((1, 3 * D)),   # bqkv
        _full_spec((D, D)),       # wo
        _full_spec((1, D)),       # bo
        _full_spec((1, D)),       # ln gamma
        _full_spec((1, D)),       # ln beta
    ]
    args += [p["wqkv"], p["bqkv"], p["wo"], p["bo"], p["ln_g"], p["ln_b"]]
    return pl.pallas_call(
        kernel,
        out_shape=jax.ShapeDtypeStruct((B, Sq, D), x.dtype),
        grid=(B,),
        in_specs=in_specs,
        out_specs=pl.BlockSpec((1, Sq, D), lambda b: (b, 0, 0)),
        compiler_params=pltpu.CompilerParams(dimension_semantics=("parallel",)),
    )(*args)


# ---------------------------------------------------------------------------
# Kernel 2: fused FFN block  ->  LN(x + relu(x@w1+b1)@w2 + b2), row-tiled.
# ---------------------------------------------------------------------------
def _ffn_block_kernel(x_ref, w1_ref, b1_ref, w2_ref, b2_ref, g_ref, b_ref, o_ref):
    x = x_ref[...].astype(jnp.float32)                     # (tm, D)
    h = jnp.dot(x.astype(MXU_DTYPE), w1_ref[...].astype(MXU_DTYPE),
                preferred_element_type=jnp.float32) + b1_ref[...].astype(jnp.float32)
    h = jnp.maximum(h, 0.0)
    y = jnp.dot(h.astype(MXU_DTYPE), w2_ref[...].astype(MXU_DTYPE),
                preferred_element_type=jnp.float32) + b2_ref[...].astype(jnp.float32)
    y = x + y
    inv_d = 1.0 / x.shape[-1]
    mean = jnp.sum(y, axis=-1, keepdims=True) * inv_d
    c = y - mean
    var = jnp.sum(c * c, axis=-1, keepdims=True) * inv_d
    yn = c * lax.rsqrt(var + LN_EPS)
    o_ref[...] = (yn * g_ref[...].astype(jnp.float32)
                  + b_ref[...].astype(jnp.float32)).astype(o_ref.dtype)


def ffn_block(x2d, p):
    M, D = x2d.shape
    F = p["w1"].shape[1]
    tm = _pick_row_tile(M)
    return pl.pallas_call(
        _ffn_block_kernel,
        out_shape=jax.ShapeDtypeStruct((M, D), x2d.dtype),
        grid=(M // tm,),
        in_specs=[
            pl.BlockSpec((tm, D), lambda i: (i, 0)),
            _full_spec((D, F)),
            _full_spec((1, F)),
            _full_spec((F, D)),
            _full_spec((1, D)),
            _full_spec((1, D)),
            _full_spec((1, D)),
        ],
        out_specs=pl.BlockSpec((tm, D), lambda i: (i, 0)),
        compiler_params=pltpu.CompilerParams(dimension_semantics=("parallel",)),
    )(x2d, p["w1"], p["b1"], p["w2"], p["b2"], p["ln_g"], p["ln_b"])


# ---------------------------------------------------------------------------
# Kernel 3: final LayerNorm (row-tiled, parallel)
# ---------------------------------------------------------------------------
def _layernorm_kernel(x_ref, g_ref, b_ref, o_ref):
    x = x_ref[...].astype(jnp.float32)
    inv_d = 1.0 / x.shape[-1]
    mean = jnp.sum(x, axis=-1, keepdims=True) * inv_d
    c = x - mean
    var = jnp.sum(c * c, axis=-1, keepdims=True) * inv_d
    yn = c * lax.rsqrt(var + LN_EPS)
    o_ref[...] = (yn * g_ref[...].astype(jnp.float32)
                  + b_ref[...].astype(jnp.float32)).astype(o_ref.dtype)


def layernorm(x2d, g, b):
    M, D = x2d.shape
    tm = _pick_row_tile(M)
    return pl.pallas_call(
        _layernorm_kernel,
        out_shape=jax.ShapeDtypeStruct((M, D), x2d.dtype),
        grid=(M // tm,),
        in_specs=[
            pl.BlockSpec((tm, D), lambda i: (i, 0)),
            _full_spec((1, D)),
            _full_spec((1, D)),
        ],
        out_specs=pl.BlockSpec((tm, D), lambda i: (i, 0)),
        compiler_params=pltpu.CompilerParams(dimension_semantics=("parallel",)),
    )(x2d, g, b)


# ---------------------------------------------------------------------------
# Model glue
# ---------------------------------------------------------------------------
def decoder_layer(x, h, p, num_heads):
    x = mha_block(x, None, p["self_attn"], num_heads=num_heads, causal=True)
    x = mha_block(x, h, p["cross_attn"], num_heads=num_heads, causal=False)
    B, S, D = x.shape
    x = ffn_block(x.reshape(B * S, D), p["ffn"]).reshape(B, S, D)
    return x


def causal_decoder(output, h, params, num_heads):
    # TODO(synk): arbitrary dense self/cross masks (beyond causal / None) would be
    # passed as an extra untiled (Sq, Skv) additive-mask input to mha_block.
    for lp in params["layers"]:
        output = decoder_layer(output, h, lp, num_heads)
    B, S, D = output.shape
    out2d = layernorm(output.reshape(B * S, D), params["norm_g"], params["norm_b"])
    return out2d.reshape(B, S, D)


# ---------------------------------------------------------------------------
# Deterministic parameter init (xavier_uniform weights, zero bias — matches
# CausalDecoder._init_weights; LayerNorm gamma=1, beta=0).  QKV weights are
# stored pre-fused as (D, 3D) so the kernel issues a single MXU matmul.
# ---------------------------------------------------------------------------
def xavier_uniform(key, shape):
    fan_in, fan_out = shape
    limit = math.sqrt(6.0 / (fan_in + fan_out))
    return jax.random.uniform(key, shape, jnp.float32, -limit, limit)


def init_attn_params(key, D):
    ks = jax.random.split(key, 4)
    wqkv = jnp.concatenate([xavier_uniform(ks[0], (D, D)),
                            xavier_uniform(ks[1], (D, D)),
                            xavier_uniform(ks[2], (D, D))], axis=1)
    return {
        "wqkv": wqkv,
        "bqkv": jnp.zeros((1, 3 * D), jnp.float32),
        "wo": xavier_uniform(ks[3], (D, D)),
        "bo": jnp.zeros((1, D), jnp.float32),
        "ln_g": jnp.ones((1, D), jnp.float32),
        "ln_b": jnp.zeros((1, D), jnp.float32),
    }


def init_params(key, D, num_layers, ff_dim):
    layers = []
    for l in range(num_layers):
        lk = jax.random.fold_in(key, l)
        k_self, k_cross, k_ff1, k_ff2 = jax.random.split(lk, 4)
        layers.append({
            "self_attn": init_attn_params(k_self, D),
            "cross_attn": init_attn_params(k_cross, D),
            "ffn": {
                "w1": xavier_uniform(k_ff1, (D, ff_dim)),
                "b1": jnp.zeros((1, ff_dim), jnp.float32),
                "w2": xavier_uniform(k_ff2, (ff_dim, D)),
                "b2": jnp.zeros((1, D), jnp.float32),
                "ln_g": jnp.ones((1, D), jnp.float32),
                "ln_b": jnp.zeros((1, D), jnp.float32),
            },
        })
    return {
        "layers": layers,
        "norm_g": jnp.ones((1, D), jnp.float32),
        "norm_b": jnp.zeros((1, D), jnp.float32),
    }


if __name__ == "__main__":
    B, S, Skv = 2, 8, 8
    D, H, F, L = 32, 4, 64, 2     # embed_dim, num_heads, ff_dim, num_layer

    key = jax.random.PRNGKey(0)
    k_x, k_h, k_p = jax.random.split(key, 3)
    output = jax.random.normal(k_x, (B, S, D), jnp.float32)   # decoder input
    h = jax.random.normal(k_h, (B, Skv, D), jnp.float32)      # encoder memory
    params = init_params(k_p, D, L, F)

    # TODO(synk): dropout is modeled as identity (inference mode).
    fwd = jax.jit(functools.partial(causal_decoder, num_heads=H))
    out = fwd(output, h, params)
    out = jax.block_until_ready(out)

    assert out.shape == (B, S, D) and out.dtype == jnp.float32
    assert bool(jnp.all(jnp.isfinite(out)))
    print("KERNEL_OK")
</pallas_src>

<mosaic_0001>
module attributes {stable_mosaic.version = 11 : i64} {
  func.func @_ffn_block_kernel(%arg0: i32, %arg1: memref<8x32xf32, #tpu.memory_space<vmem>>, %arg2: memref<32x64xf32, #tpu.memory_space<vmem>>, %arg3: memref<1x64xf32, #tpu.memory_space<vmem>>, %arg4: memref<64x32xf32, #tpu.memory_space<vmem>>, %arg5: memref<1x32xf32, #tpu.memory_space<vmem>>, %arg6: memref<1x32xf32, #tpu.memory_space<vmem>>, %arg7: memref<1x32xf32, #tpu.memory_space<vmem>>, %arg8: memref<8x32xf32, #tpu.memory_space<vmem>>) attributes {dimension_semantics = [#tpu.dimension_semantics<parallel>], iteration_bounds = array<i64: 2>, scalar_prefetch = 0 : i64, scratch_operands = 0 : i64, tpu.core_type = #tpu.core_type<tc>, window_params = [{transform_indices = @transform_0, window_bounds = array<i64: 8, 32>}, {pipeline_mode = #tpu.pipeline_mode<synchronous>, transform_indices = @transform_1, window_bounds = array<i64: 32, 64>}, {pipeline_mode = #tpu.pipeline_mode<synchronous>, transform_indices = @transform_2, window_bounds = array<i64: 1, 64>}, {pipeline_mode = #tpu.pipeline_mode<synchronous>, transform_indices = @transform_3, window_bounds = array<i64: 64, 32>}, {pipeline_mode = #tpu.pipeline_mode<synchronous>, transform_indices = @transform_4, window_bounds = array<i64: 1, 32>}, {pipeline_mode = #tpu.pipeline_mode<synchronous>, transform_indices = @transform_5, window_bounds = array<i64: 1, 32>}, {pipeline_mode = #tpu.pipeline_mode<synchronous>, transform_indices = @transform_6, window_bounds = array<i64: 1, 32>}, {transform_indices = @transform_7, window_bounds = array<i64: 8, 32>}]} {
    %c0 = arith.constant 0 : index
    %c0_0 = arith.constant 0 : index
    %0 = vector.load %arg1[%c0, %c0_0] : memref<8x32xf32, #tpu.memory_space<vmem>>, vector<8x32xf32>
    %1 = arith.truncf %0 : vector<8x32xf32> to vector<8x32xbf16>
    %c0_1 = arith.constant 0 : index
    %c0_2 = arith.constant 0 : index
    %2 = vector.load %arg2[%c0_1, %c0_2] : memref<32x64xf32, #tpu.memory_space<vmem>>, vector<32x64xf32>
    %3 = arith.truncf %2 : vector<32x64xf32> to vector<32x64xbf16>
    %cst = arith.constant dense<0.000000e+00> : vector<8x64xf32>
    %4 = tpu.matmul %1, %3, %cst {dimension_numbers = #tpu.dot_dimension_numbers<[1], [0], [0], [1], [0, 0, 1, 1], [], []>} : vector<8x32xbf16>, vector<32x64xbf16>, vector<8x64xf32> -> vector<8x64xf32>
    %c0_3 = arith.constant 0 : index
    %c0_4 = arith.constant 0 : index
    %5 = vector.load %arg3[%c0_3, %c0_4] : memref<1x64xf32, #tpu.memory_space<vmem>>, vector<1x64xf32>
    %6 = vector.broadcast %5 : vector<1x64xf32> to vector<8x64xf32>
    %7 = arith.addf %4, %6 : vector<8x64xf32>
    %cst_5 = arith.constant 0.000000e+00 : f32
    %8 = vector.broadcast %cst_5 : f32 to vector<8x64xf32>
    %9 = arith.maximumf %7, %8 : vector<8x64xf32>
    %10 = arith.truncf %9 : vector<8x64xf32> to vector<8x64xbf16>
    %c0_6 = arith.constant 0 : index
    %c0_7 = arith.constant 0 : index
    %11 = vector.load %arg4[%c0_6, %c0_7] : memref<64x32xf32, #tpu.memory_space<vmem>>, vector<64x32xf32>
    %12 = arith.truncf %11 : vector<64x32xf32> to vector<64x32xbf16>
    %cst_8 = arith.constant dense<0.000000e+00> : vector<8x32xf32>
    %13 = tpu.matmul %10, %12, %cst_8 {dimension_numbers = #tpu.dot_dimension_numbers<[1], [0], [0], [1], [0, 0, 1, 1], [], []>} : vector<8x64xbf16>, vector<64x32xbf16>, vector<8x32xf32> -> vector<8x32xf32>
    %c0_9 = arith.constant 0 : index
    %c0_10 = arith.constant 0 : index
    %14 = vector.load %arg5[%c0_9, %c0_10] : memref<1x32xf32, #tpu.memory_space<vmem>>, vector<1x32xf32>
    %15 = vector.broadcast %14 : vector<1x32xf32> to vector<8x32xf32>
    %16 = arith.addf %13, %15 : vector<8x32xf32>
    %17 = arith.addf %0, %16 : vector<8x32xf32>
    %cst_11 = arith.constant dense<0.000000e+00> : vector<8xf32>
    %18 = vector.multi_reduction <add>, %17, %cst_11 [1] : vector<8x32xf32> to vector<8xf32>
    %19 = vector.shape_cast %18 : vector<8xf32> to vector<8x1xf32>
    %cst_12 = arith.constant 3.125000e-02 : f32
    %20 = vector.broadcast %cst_12 : f32 to vector<8x1xf32>
    %21 = arith.mulf %19, %20 : vector<8x1xf32>
    %22 = vector.broadcast %21 : vector<8x1xf32> to vector<8x32xf32>
    %23 = arith.subf %17, %22 : vector<8x32xf32>
    %24 = arith.mulf %23, %23 : vector<8x32xf32>
    %cst_13 = arith.constant dense<0.000000e+00> : vector<8xf32>
    %25 = vector.multi_reduction <add>, %24, %cst_13 [1] : vector<8x32xf32> to vector<8xf32>
    %26 = vector.shape_cast %25 : vector<8xf32> to vector<8x1xf32>
    %cst_14 = arith.constant 3.125000e-02 : f32
    %27 = vector.broadcast %cst_14 : f32 to vector<8x1xf32>
    %28 = arith.mulf %26, %27 : vector<8x1xf32>
    %cst_15 = arith.constant 9.99999974E-6 : f32
    %29 = vector.broadcast %cst_15 : f32 to vector<8x1xf32>
    %30 = arith.addf %28, %29 : vector<8x1xf32>
    %31 = math.rsqrt %30 : vector<8x1xf32>
    %32 = vector.broadcast %31 : vector<8x1xf32> to vector<8x32xf32>
    %33 = arith.mulf %23, %32 : vector<8x32xf32>
    %c0_16 = arith.constant 0 : index
    %c0_17 = arith.constant 0 : index
    %34 = vector.load %arg6[%c0_16, %c0_17] : memref<1x32xf32, #tpu.memory_space<vmem>>, vector<1x32xf32>
    %35 = vector.broadcast %34 : vector<1x32xf32> to vector<8x32xf32>
    %36 = arith.mulf %33, %35 : vector<8x32xf32>
    %c0_18 = arith.constant 0 : index
    %c0_19 = arith.constant 0 : index
    %37 = vector.load %arg7[%c0_18, %c0_19] : memref<1x32xf32, #tpu.memory_space<vmem>>, vector<1x32xf32>
    %38 = vector.broadcast %37 : vector<1x32xf32> to vector<8x32xf32>
    %39 = arith.addf %36, %38 : vector<8x32xf32>
    %c0_20 = arith.constant 0 : index
    %c0_21 = arith.constant 0 : index
    %40 = vector.load %arg8[%c0_20, %c0_21] : memref<8x32xf32, #tpu.memory_space<vmem>>, vector<8x32xf32>
    tpu.vector_store %arg8[%c0_20, %c0_21], %39 {strides = array<i32>} : memref<8x32xf32, #tpu.memory_space<vmem>>, vector<8x32xf32>,
    return
  }
  func.func @transform_0(%arg0: i32) -> (i32, i32) {
    %c0_i32 = arith.constant 0 : i32
    %c0_i32_0 = arith.constant 0 : i32
    return %arg0, %c0_i32 : i32, i32
  }
  func.func @transform_1(%arg0: i32) -> (i32, i32) {
    %c0_i32 = arith.constant 0 : i32
    %c0_i32_0 = arith.constant 0 : i32
    %c0_i32_1 = arith.constant 0 : i32
    return %c0_i32, %c0_i32_0 : i32, i32
  }
  func.func @transform_2(%arg0: i32) -> (i32, i32) {
    %c0_i32 = arith.constant 0 : i32
    %c0_i32_0 = arith.constant 0 : i32
    %c0_i32_1 = arith.constant 0 : i32
    return %c0_i32, %c0_i32_0 : i32, i32
  }
  func.func @transform_3(%arg0: i32) -> (i32, i32) {
    %c0_i32 = arith.constant 0 : i32
    %c0_i32_0 = arith.constant 0 : i32
    %c0_i32_1 = arith.constant 0 : i32
    return %c0_i32, %c0_i32_0 : i32, i32
  }
  func.func @transform_4(%arg0: i32) -> (i32, i32) {
    %c0_i32 = arith.constant 0 : i32
    %c0_i32_0 = arith.constant 0 : i32
    %c0_i32_1 = arith.constant 0 : i32
    return %c0_i32, %c0_i32_0 : i32, i32
  }
  func.func @transform_5(%arg0: i32) -> (i32, i32) {
    %c0_i32 = arith.constant 0 : i32
    %c0_i32_0 = arith.constant 0 : i32
    %c0_i32_1 = arith.constant 0 : i32
    return %c0_i32, %c0_i32_0 : i32, i32
  }
  func.func @transform_6(%arg0: i32) -> (i32, i32) {
    %c0_i32 = arith.constant 0 : i32
    %c0_i32_0 = arith.constant 0 : i32
    %c0_i32_1 = arith.constant 0 : i32
    return %c0_i32, %c0_i32_0 : i32, i32
  }
  func.func @transform_7(%arg0: i32) -> (i32, i32) {
    %c0_i32 = arith.constant 0 : i32
    %c0_i32_0 = arith.constant 0 : i32
    return %arg0, %c0_i32 : i32, i32
  }
}

module attributes {stable_mosaic.version = 11 : i64} {
  func.func @_mha_block_kernel(%arg0: i32, %arg1: memref<1x8x32xf32, #tpu.memory_space<vmem>>, %arg2: memref<1x8x32xf32, #tpu.memory_space<vmem>>, %arg3: memref<32x96xf32, #tpu.memory_space<vmem>>, %arg4: memref<1x96xf32, #tpu.memory_space<vmem>>, %arg5: memref<32x32xf32, #tpu.memory_space<vmem>>, %arg6: memref<1x32xf32, #tpu.memory_space<vmem>>, %arg7: memref<1x32xf32, #tpu.memory_space<vmem>>, %arg8: memref<1x32xf32, #tpu.memory_space<vmem>>, %arg9: memref<1x8x32xf32, #tpu.memory_space<vmem>>) attributes {dimension_semantics = [#tpu.dimension_semantics<parallel>], iteration_bounds = array<i64: 2>, scalar_prefetch = 0 : i64, scratch_operands = 0 : i64, tpu.core_type = #tpu.core_type<tc>, window_params = [{transform_indices = @transform_0, window_bounds = array<i64: 1, 8, 32>}, {transform_indices = @transform_1, window_bounds = array<i64: 1, 8, 32>}, {pipeline_mode = #tpu.pipeline_mode<synchronous>, transform_indices = @transform_2, window_bounds = array<i64: 32, 96>}, {pipeline_mode = #tpu.pipeline_mode<synchronous>, transform_indices = @transform_3, window_bounds = array<i64: 1, 96>}, {pipeline_mode = #tpu.pipeline_mode<synchronous>, transform_indices = @transform_4, window_bounds = array<i64: 32, 32>}, {pipeline_mode = #tpu.pipeline_mode<synchronous>, transform_indices = @transform_5, window_bounds = array<i64: 1, 32>}, {pipeline_mode = #tpu.pipeline_mode<synchronous>, transform_indices = @transform_6, window_bounds = array<i64: 1, 32>}, {pipeline_mode = #tpu.pipeline_mode<synchronous>, transform_indices = @transform_7, window_bounds = array<i64: 1, 32>}, {transform_indices = @transform_8, window_bounds = array<i64: 1, 8, 32>}]} {
    %c0 = arith.constant 0 : index
    %c0_0 = arith.constant 0 : index
    %c0_1 = arith.constant 0 : index
    %0 = vector.load %arg1[%c0, %c0_0, %c0_1] : memref<1x8x32xf32, #tpu.memory_space<vmem>>, vector<1x8x32xf32>
    %1 = vector.shape_cast %0 : vector<1x8x32xf32> to vector<8x32xf32>
    %c0_2 = arith.constant 0 : index
    %c0_3 = arith.constant 0 : index
    %2 = vector.load %arg3[%c0_2, %c0_3] : memref<32x96xf32, #tpu.memory_space<vmem>>, vector<32x96xf32>
    %3 = arith.truncf %2 : vector<32x96xf32> to vector<32x96xbf16>
    %c0_4 = arith.constant 0 : index
    %c0_5 = arith.constant 0 : index
    %4 = vector.load %arg4[%c0_4, %c0_5] : memref<1x96xf32, #tpu.memory_space<vmem>>, vector<1x96xf32>
    %c0_6 = arith.constant 0 : index
    %c0_7 = arith.constant 0 : index
    %c0_8 = arith.constant 0 : index
    %5 = vector.load %arg2[%c0_6, %c0_7, %c0_8] : memref<1x8x32xf32, #tpu.memory_space<vmem>>, vector<1x8x32xf32>
    %6 = vector.shape_cast %5 : vector<1x8x32xf32> to vector<8x32xf32>
    %7 = arith.truncf %1 : vector<8x32xf32> to vector<8x32xbf16>
    %8 = vector.extract_strided_slice %3 {offsets = [0, 0], sizes = [32, 32], strides = [1, 1]} : vector<32x96xbf16> to vector<32x32xbf16>
    %cst = arith.constant dense<0.000000e+00> : vector<8x32xf32>
    %9 = tpu.matmul %7, %8, %cst {dimension_numbers = #tpu.dot_dimension_numbers<[1], [0], [0], [1], [0, 0, 1, 1], [], []>} : vector<8x32xbf16>, vector<32x32xbf16>, vector<8x32xf32> -> vector<8x32xf32>
    %10 = vector.extract_strided_slice %4 {offsets = [0, 0], sizes = [1, 32], strides = [1, 1]} : vector<1x96xf32> to vector<1x32xf32>
    %11 = vector.broadcast %10 : vector<1x32xf32> to vector<8x32xf32>
    %12 = arith.addf %9, %11 : vector<8x32xf32>
    %13 = arith.truncf %6 : vector<8x32xf32> to vector<8x32xbf16>
    %14 = vector.extract_strided_slice %3 {offsets = [0, 32], sizes = [32, 64], strides = [1, 1]} : vector<32x96xbf16> to vector<32x64xbf16>
    %cst_9 = arith.constant dense<0.000000e+00> : vector<8x64xf32>
    %15 = tpu.matmul %13, %14, %cst_9 {dimension_numbers = #tpu.dot_dimension_numbers<[1], [0], [0], [1], [0, 0, 1, 1], [], []>} : vector<8x32xbf16>, vector<32x64xbf16>, vector<8x64xf32> -> vector<8x64xf32>
    %16 = vector.extract_strided_slice %4 {offsets = [0, 32], sizes = [1, 64], strides = [1, 1]} : vector<1x96xf32> to vector<1x64xf32>
    %17 = vector.broadcast %16 : vector<1x64xf32> to vector<8x64xf32>
    %18 = arith.addf %15, %17 : vector<8x64xf32>
    %19 = vector.extract_strided_slice %18 {offsets = [0, 0], sizes = [8, 32], strides = [1, 1]} : vector<8x64xf32> to vector<8x32xf32>
    %20 = vector.extract_strided_slice %18 {offsets = [0, 32], sizes = [8, 32], strides = [1, 1]} : vector<8x64xf32> to vector<8x32xf32>
    %c0_10 = arith.constant 0 : index
    %c0_11 = arith.constant 0 : index
    %21 = vector.load %arg5[%c0_10, %c0_11] : memref<32x32xf32, #tpu.memory_space<vmem>>, vector<32x32xf32>
    %22 = arith.truncf %21 : vector<32x32xf32> to vector<32x32xbf16>
    %cst_12 = arith.constant 0.000000e+00 : f32
    %23 = vector.broadcast %cst_12 : f32 to vector<8x32xf32>
    %24 = vector.extract_strided_slice %12 {offsets = [0, 0], sizes = [8, 8], strides = [1, 1]} : vector<8x32xf32> to vector<8x8xf32>
    %cst_13 = arith.constant 0.353553385 : f32
    %25 = vector.broadcast %cst_13 : f32 to vector<8x8xf32>
    %26 = arith.mulf %24, %25 : vector<8x8xf32>
    %27 = arith.truncf %26 : vector<8x8xf32> to vector<8x8xbf16>
    %28 = vector.extract_strided_slice %19 {offsets = [0, 0], sizes = [8, 8], strides = [1, 1]} : vector<8x32xf32> to vector<8x8xf32>
    %29 = arith.truncf %28 : vector<8x8xf32> to vector<8x8xbf16>
    %30 = vector.extract_strided_slice %20 {offsets = [0, 0], sizes = [8, 8], strides = [1, 1]} : vector<8x32xf32> to vector<8x8xf32>
    %31 = arith.truncf %30 : vector<8x8xf32> to vector<8x8xbf16>
    %cst_14 = arith.constant dense<0.000000e+00> : vector<8x8xf32>
    %32 = tpu.matmul %27, %29, %cst_14 {dimension_numbers = #tpu.dot_dimension_numbers<[1], [1], [0], [0], [0, 0, 1, 0], [], []>} : vector<8x8xbf16>, vector<8x8xbf16>, vector<8x8xf32> -> vector<8x8xf32>
    %cst_15 = arith.constant dense<0xFF800000> : vector<8xf32>
    %33 = vector.multi_reduction <maximumf>, %32, %cst_15 [1] : vector<8x8xf32> to vector<8xf32>
    %34 = vector.shape_cast %33 : vector<8xf32> to vector<8x1xf32>
    %35 = vector.broadcast %34 : vector<8x1xf32> to vector<8x8xf32>
    %36 = arith.subf %32, %35 : vector<8x8xf32>
    %37 = math.exp %36 : vector<8x8xf32>
    %cst_16 = arith.constant dense<0.000000e+00> : vector<8xf32>
    %38 = vector.multi_reduction <add>, %37, %cst_16 [1] : vector<8x8xf32> to vector<8xf32>
    %39 = vector.shape_cast %38 : vector<8xf32> to vector<8x1xf32>
    %40 = tpu.reciprocal %39 {approx = true} : vector<8x1xf32> -> vector<8x1xf32>
    %41 = vector.broadcast %40 : vector<8x1xf32> to vector<8x8xf32>
    %42 = arith.mulf %37, %41 : vector<8x8xf32>
    %43 = arith.truncf %42 : vector<8x8xf32> to vector<8x8xbf16>
    %cst_17 = arith.constant dense<0.000000e+00> : vector<8x8xf32>
    %44 = tpu.matmul %43, %31, %cst_17 {dimension_numbers = #tpu.dot_dimension_numbers<[1], [0], [0], [1], [0, 0, 1, 1], [], []>} : vector<8x8xbf16>, vector<8x8xbf16>, vector<8x8xf32> -> vector<8x8xf32>
    %45 = arith.truncf %44 : vector<8x8xf32> to vector<8x8xbf16>
    %46 = vector.extract_strided_slice %22 {offsets = [0, 0], sizes = [8, 32], strides = [1, 1]} : vector<32x32xbf16> to vector<8x32xbf16>
    %cst_18 = arith.constant dense<0.000000e+00> : vector<8x32xf32>
    %47 = tpu.matmul %45, %46, %cst_18 {dimension_numbers = #tpu.dot_dimension_numbers<[1], [0], [0], [1], [0, 0, 1, 1], [], []>} : vector<8x8xbf16>, vector<8x32xbf16>, vector<8x32xf32> -> vector<8x32xf32>
    %48 = arith.addf %23, %47 : vector<8x32xf32>
    %49 = vector.extract_strided_slice %12 {offsets = [0, 8], sizes = [8, 8], strides = [1, 1]} : vector<8x32xf32> to vector<8x8xf32>
    %cst_19 = arith.constant 0.353553385 : f32
    %50 = vector.broadcast %cst_19 : f32 to vector<8x8xf32>
    %51 = arith.mulf %49, %50 : vector<8x8xf32>
    %52 = arith.truncf %51 : vector<8x8xf32> to vector<8x8xbf16>
    %53 = vector.extract_strided_slice %19 {offsets = [0, 8], sizes = [8, 8], strides = [1, 1]} : vector<8x32xf32> to vector<8x8xf32>
    %54 = arith.truncf %53 : vector<8x8xf32> to vector<8x8xbf16>
    %55 = vector.extract_strided_slice %20 {offsets = [0, 8], sizes = [8, 8], strides = [1, 1]} : vector<8x32xf32> to vector<8x8xf32>
    %56 = arith.truncf %55 : vector<8x8xf32> to vector<8x8xbf16>
    %cst_20 = arith.constant dense<0.000000e+00> : vector<8x8xf32>
    %57 = tpu.matmul %52, %54, %cst_20 {dimension_numbers = #tpu.dot_dimension_numbers<[1], [1], [0], [0], [0, 0, 1, 0], [], []>} : vector<8x8xbf16>, vector<8x8xbf16>, vector<8x8xf32> -> vector<8x8xf32>
    %cst_21 = arith.constant dense<0xFF800000> : vector<8xf32>
    %58 = vector.multi_reduction <maximumf>, %57, %cst_21 [1] : vector<8x8xf32> to vector<8xf32>
    %59 = vector.shape_cast %58 : vector<8xf32> to vector<8x1xf32>
    %60 = vector.broadcast %59 : vector<8x1xf32> to vector<8x8xf32>
    %61 = arith.subf %57, %60 : vector<8x8xf32>
    %62 = math.exp %61 : vector<8x8xf32>
    %cst_22 = arith.constant dense<0.000000e+00> : vector<8xf32>
    %63 = vector.multi_reduction <add>, %62, %cst_22 [1] : vector<8x8xf32> to vector<8xf32>
    %64 = vector.shape_cast %63 : vector<8xf32> to vector<8x1xf32>
    %65 = tpu.reciprocal %64 {approx = true} : vector<8x1xf32> -> vector<8x1xf32>
    %66 = vector.broadcast %65 : vector<8x1xf32> to vector<8x8xf32>
    %67 = arith.mulf %62, %66 : vector<8x8xf32>
    %68 = arith.truncf %67 : vector<8x8xf32> to vector<8x8xbf16>
    %cst_23 = arith.constant dense<0.000000e+00> : vector<8x8xf32>
    %69 = tpu.matmul %68, %56, %cst_23 {dimension_numbers = #tpu.dot_dimension_numbers<[1], [0], [0], [1], [0, 0, 1, 1], [], []>} : vector<8x8xbf16>, vector<8x8xbf16>, vector<8x8xf32> -> vector<8x8xf32>
    %70 = arith.truncf %69 : vector<8x8xf32> to vector<8x8xbf16>
    %71 = vector.extract_strided_slice %22 {offsets = [8, 0], sizes = [8, 32], strides = [1, 1]} : vector<32x32xbf16> to vector<8x32xbf16>
    %cst_24 = arith.constant dense<0.000000e+00> : vector<8x32xf32>
    %72 = tpu.matmul %70, %71, %cst_24 {dimension_numbers = #tpu.dot_dimension_numbers<[1], [0], [0], [1], [0, 0, 1, 1], [], []>} : vector<8x8xbf16>, vector<8x32xbf16>, vector<8x32xf32> -> vector<8x32xf32>
    %73 = arith.addf %48, %72 : vector<8x32xf32>
    %74 = vector.extract_strided_slice %12 {offsets = [0, 16], sizes = [8, 8], strides = [1, 1]} : vector<8x32xf32> to vector<8x8xf32>
    %cst_25 = arith.constant 0.353553385 : f32
    %75 = vector.broadcast %cst_25 : f32 to vector<8x8xf32>
    %76 = arith.mulf %74, %75 : vector<8x8xf32>
    %77 = arith.truncf %76 : vector<8x8xf32> to vector<8x8xbf16>
    %78 = vector.extract_strided_slice %19 {offsets = [0, 16], sizes = [8, 8], strides = [1, 1]} : vector<8x32xf32> to vector<8x8xf32>
    %79 = arith.truncf %78 : vector<8x8xf32> to vector<8x8xbf16>
    %80 = vector.extract_strided_slice %20 {offsets = [0, 16], sizes = [8, 8], strides = [1, 1]} : vector<8x32xf32> to vector<8x8xf32>
    %81 = arith.truncf %80 : vector<8x8xf32> to vector<8x8xbf16>
    %cst_26 = arith.constant dense<0.000000e+00> : vector<8x8xf32>
    %82 = tpu.matmul %77, %79, %cst_26 {dimension_numbers = #tpu.dot_dimension_numbers<[1], [1], [0], [0], [0, 0, 1, 0], [], []>} : vector<8x8xbf16>, vector<8x8xbf16>, vector<8x8xf32> -> vector<8x8xf32>
    %cst_27 = arith.constant dense<0xFF800000> : vector<8xf32>
    %83 = vector.multi_reduction <maximumf>, %82, %cst_27 [1] : vector<8x8xf32> to vector<8xf32>
    %84 = vector.shape_cast %83 : vector<8xf32> to vector<8x1xf32>
    %85 = vector.broadcast %84 : vector<8x1xf32> to vector<8x8xf32>
    %86 = arith.subf %82, %85 : vector<8x8xf32>
    %87 = math.exp %86 : vector<8x8xf32>
    %cst_28 = arith.constant dense<0.000000e+00> : vector<8xf32>
    %88 = vector.multi_reduction <add>, %87, %cst_28 [1] : vector<8x8xf32> to vector<8xf32>
    %89 = vector.shape_cast %88 : vector<8xf32> to vector<8x1xf32>
    %90 = tpu.reciprocal %89 {approx = true} : vector<8x1xf32> -> vector<8x1xf32>
    %91 = vector.broadcast %90 : vector<8x1xf32> to vector<8x8xf32>
    %92 = arith.mulf %87, %91 : vector<8x8xf32>
    %93 = arith.truncf %92 : vector<8x8xf32> to vector<8x8xbf16>
    %cst_29 = arith.constant dense<0.000000e+00> : vector<8x8xf32>
    %94 = tpu.matmul %93, %81, %cst_29 {dimension_numbers = #tpu.dot_dimension_numbers<[1], [0], [0], [1], [0, 0, 1, 1], [], []>} : vector<8x8xbf16>, vector<8x8xbf16>, vector<8x8xf32> -> vector<8x8xf32>
    %95 = arith.truncf %94 : vector<8x8xf32> to vector<8x8xbf16>
    %96 = vector.extract_strided_slice %22 {offsets = [16, 0], sizes = [8, 32], strides = [1, 1]} : vector<32x32xbf16> to vector<8x32xbf16>
    %cst_30 = arith.constant dense<0.000000e+00> : vector<8x32xf32>
    %97 = tpu.matmul %95, %96, %cst_30 {dimension_numbers = #tpu.dot_dimension_numbers<[1], [0], [0], [1], [0, 0, 1, 1], [], []>} : vector<8x8xbf16>, vector<8x32xbf16>, vector<8x32xf32> -> vector<8x32xf32>
    %98 = arith.addf %73, %97 : vector<8x32xf32>
    %99 = vector.extract_strided_slice %12 {offsets = [0, 24], sizes = [8, 8], strides = [1, 1]} : vector<8x32xf32> to vector<8x8xf32>
    %cst_31 = arith.constant 0.353553385 : f32
    %100 = vector.broadcast %cst_31 : f32 to vector<8x8xf32>
    %101 = arith.mulf %99, %100 : vector<8x8xf32>
    %102 = arith.truncf %101 : vector<8x8xf32> to vector<8x8xbf16>
    %103 = vector.extract_strided_slice %19 {offsets = [0, 24], sizes = [8, 8], strides = [1, 1]} : vector<8x32xf32> to vector<8x8xf32>
    %104 = arith.truncf %103 : vector<8x8xf32> to vector<8x8xbf16>
    %105 = vector.extract_strided_slice %20 {offsets = [0, 24], sizes = [8, 8], strides = [1, 1]} : vector<8x32xf32> to vector<8x8xf32>
    %106 = arith.truncf %105 : vector<8x8xf32> to vector<8x8xbf16>
    %cst_32 = arith.constant dense<0.000000e+00> : vector<8x8xf32>
    %107 = tpu.matmul %102, %104, %cst_32 {dimension_numbers = #tpu.dot_dimension_numbers<[1], [1], [0], [0], [0, 0, 1, 0], [], []>} : vector<8x8xbf16>, vector<8x8xbf16>, vector<8x8xf32> -> vector<8x8xf32>
    %cst_33 = arith.constant dense<0xFF800000> : vector<8xf32>
    %108 = vector.multi_reduction <maximumf>, %107, %cst_33 [1] : vector<8x8xf32> to vector<8xf32>
    %109 = vector.shape_cast %108 : vector<8xf32> to vector<8x1xf32>
    %110 = vector.broadcast %109 : vector<8x1xf32> to vector<8x8xf32>
    %111 = arith.subf %107, %110 : vector<8x8xf32>
    %112 = math.exp %111 : vector<8x8xf32>
    %cst_34 = arith.constant dense<0.000000e+00> : vector<8xf32>
    %113 = vector.multi_reduction <add>, %112, %cst_34 [1] : vector<8x8xf32> to vector<8xf32>
    %114 = vector.shape_cast %113 : vector<8xf32> to vector<8x1xf32>
    %115 = tpu.reciprocal %114 {approx = true} : vector<8x1xf32> -> vector<8x1xf32>
    %116 = vector.broadcast %115 : vector<8x1xf32> to vector<8x8xf32>
    %117 = arith.mulf %112, %116 : vector<8x8xf32>
    %118 = arith.truncf %117 : vector<8x8xf32> to vector<8x8xbf16>
    %cst_35 = arith.constant dense<0.000000e+00> : vector<8x8xf32>
    %119 = tpu.matmul %118, %106, %cst_35 {dimension_numbers = #tpu.dot_dimension_numbers<[1], [0], [0], [1], [0, 0, 1, 1], [], []>} : vector<8x8xbf16>, vector<8x8xbf16>, vector<8x8xf32> -> vector<8x8xf32>
    %120 = arith.truncf %119 : vector<8x8xf32> to vector<8x8xbf16>
    %121 = vector.extract_strided_slice %22 {offsets = [24, 0], sizes = [8, 32], strides = [1, 1]} : vector<32x32xbf16> to vector<8x32xbf16>
    %cst_36 = arith.constant dense<0.000000e+00> : vector<8x32xf32>
    %122 = tpu.matmul %120, %121, %cst_36 {dimension_numbers = #tpu.dot_dimension_numbers<[1], [0], [0], [1], [0, 0, 1, 1], [], []>} : vector<8x8xbf16>, vector<8x32xbf16>, vector<8x32xf32> -> vector<8x32xf32>
    %123 = arith.addf %98, %122 : vector<8x32xf32>
    %c0_37 = arith.constant 0 : index
    %c0_38 = arith.constant 0 : index
    %124 = vector.load %arg6[%c0_37, %c0_38] : memref<1x32xf32, #tpu.memory_space<vmem>>, vector<1x32xf32>
    %125 = vector.broadcast %124 : vector<1x32xf32> to vector<8x32xf32>
    %126 = arith.addf %123, %125 : vector<8x32xf32>
    %127 = arith.addf %1, %126 : vector<8x32xf32>
    %cst_39 = arith.constant dense<0.000000e+00> : vector<8xf32>
    %128 = vector.multi_reduction <add>, %127, %cst_39 [1] : vector<8x32xf32> to vector<8xf32>
    %129 = vector.shape_cast %128 : vector<8xf32> to vector<8x1xf32>
    %cst_40 = arith.constant 3.125000e-02 : f32
    %130 = vector.broadcast %cst_40 : f32 to vector<8x1xf32>
    %131 = arith.mulf %129, %130 : vector<8x1xf32>
    %132 = vector.broadcast %131 : vector<8x1xf32> to vector<8x32xf32>
    %133 = arith.subf %127, %132 : vector<8x32xf32>
    %134 = arith.mulf %133, %133 : vector<8x32xf32>
    %cst_41 = arith.constant dense<0.000000e+00> : vector<8xf32>
    %135 = vector.multi_reduction <add>, %134, %cst_41 [1] : vector<8x32xf32> to vector<8xf32>
    %136 = vector.shape_cast %135 : vector<8xf32> to vector<8x1xf32>
    %cst_42 = arith.constant 3.125000e-02 : f32
    %137 = vector.broadcast %cst_42 : f32 to vector<8x1xf32>
    %138 = arith.mulf %136, %137 : vector<8x1xf32>
    %cst_43 = arith.constant 9.99999974E-6 : f32
    %139 = vector.broadcast %cst_43 : f32 to vector<8x1xf32>
    %140 = arith.addf %138, %139 : vector<8x1xf32>
    %141 = math.rsqrt %140 : vector<8x1xf32>
    %142 = vector.broadcast %141 : vector<8x1xf32> to vector<8x32xf32>
    %143 = arith.mulf %133, %142 : vector<8x32xf32>
    %c0_44 = arith.constant 0 : index
    %c0_45 = arith.constant 0 : index
    %144 = vector.load %arg7[%c0_44, %c0_45] : memref<1x32xf32, #tpu.memory_space<vmem>>, vector<1x32xf32>
    %145 = vector.broadcast %144 : vector<1x32xf32> to vector<8x32xf32>
    %146 = arith.mulf %143, %145 : vector<8x32xf32>
    %c0_46 = arith.constant 0 : index
    %c0_47 = arith.constant 0 : index
    %147 = vector.load %arg8[%c0_46, %c0_47] : memref<1x32xf32, #tpu.memory_space<vmem>>, vector<1x32xf32>
    %148 = vector.broadcast %147 : vector<1x32xf32> to vector<8x32xf32>
    %149 = arith.addf %146, %148 : vector<8x32xf32>
    %c0_48 = arith.constant 0 : index
    %c0_49 = arith.constant 0 : index
    %c0_50 = arith.constant 0 : index
    %150 = vector.load %arg9[%c0_48, %c0_49, %c0_50] : memref<1x8x32xf32, #tpu.memory_space<vmem>>, vector<1x8x32xf32>
    %151 = vector.shape_cast %150 : vector<1x8x32xf32> to vector<8x32xf32>
    %152 = vector.shape_cast %149 : vector<8x32xf32> to vector<1x8x32xf32>
    tpu.vector_store %arg9[%c0_48, %c0_49, %c0_50], %152 {strides = array<i32>} : memref<1x8x32xf32, #tpu.memory_space<vmem>>, vector<1x8x32xf32>,
    return
  }
  func.func @transform_0(%arg0: i32) -> (i32, i32, i32) {
    %c0_i32 = arith.constant 0 : i32
    %c0_i32_0 = arith.constant 0 : i32
    %c0_i32_1 = arith.constant 0 : i32
    return %arg0, %c0_i32, %c0_i32_0 : i32, i32, i32
  }
  func.func @transform_1(%arg0: i32) -> (i32, i32, i32) {
    %c0_i32 = arith.constant 0 : i32
    %c0_i32_0 = arith.constant 0 : i32
    %c0_i32_1 = arith.constant 0 : i32
    return %arg0, %c0_i32, %c0_i32_0 : i32, i32, i32
  }
  func.func @transform_2(%arg0: i32) -> (i32, i32) {
    %c0_i32 = arith.constant 0 : i32
    %c0_i32_0 = arith.constant 0 : i32
    %c0_i32_1 = arith.constant 0 : i32
    return %c0_i32, %c0_i32_0 : i32, i32
  }
  func.func @transform_3(%arg0: i32) -> (i32, i32) {
    %c0_i32 = arith.constant 0 : i32
    %c0_i32_0 = arith.constant 0 : i32
    %c0_i32_1 = arith.constant 0 : i32
    return %c0_i32, %c0_i32_0 : i32, i32
  }
  func.func @transform_4(%arg0: i32) -> (i32, i32) {
    %c0_i32 = arith.constant 0 : i32
    %c0_i32_0 = arith.constant 0 : i32
    %c0_i32_1 = arith.constant 0 : i32
    return %c0_i32, %c0_i32_0 : i32, i32
  }
  func.func @transform_5(%arg0: i32) -> (i32, i32) {
    %c0_i32 = arith.constant 0 : i32
    %c0_i32_0 = arith.constant 0 : i32
    %c0_i32_1 = arith.constant 0 : i32
    return %c0_i32, %c0_i32_0 : i32, i32
  }
  func.func @transform_6(%arg0: i32) -> (i32, i32) {
    %c0_i32 = arith.constant 0 : i32
    %c0_i32_0 = arith.constant 0 : i32
    %c0_i32_1 = arith.constant 0 : i32
    return %c0_i32, %c0_i32_0 : i32, i32
  }
  func.func @transform_7(%arg0: i32) -> (i32, i32) {
    %c0_i32 = arith.constant 0 : i32
    %c0_i32_0 = arith.constant 0 : i32
    %c0_i32_1 = arith.constant 0 : i32
    return %c0_i32, %c0_i32_0 : i32, i32
  }
  func.func @transform_8(%arg0: i32) -> (i32, i32, i32) {
    %c0_i32 = arith.constant 0 : i32
    %c0_i32_0 = arith.constant 0 : i32
    %c0_i32_1 = arith.constant 0 : i32
    return %arg0, %c0_i32, %c0_i32_0 : i32, i32, i32
  }
}

module attributes {stable_mosaic.version = 11 : i64} {
  func.func @_mha_block_kernel(%arg0: i32, %arg1: memref<1x8x32xf32, #tpu.memory_space<vmem>>, %arg2: memref<32x96xf32, #tpu.memory_space<vmem>>, %arg3: memref<1x96xf32, #tpu.memory_space<vmem>>, %arg4: memref<32x32xf32, #tpu.memory_space<vmem>>, %arg5: memref<1x32xf32, #tpu.memory_space<vmem>>, %arg6: memref<1x32xf32, #tpu.memory_space<vmem>>, %arg7: memref<1x32xf32, #tpu.memory_space<vmem>>, %arg8: memref<1x8x32xf32, #tpu.memory_space<vmem>>) attributes {dimension_semantics = [#tpu.dimension_semantics<parallel>], iteration_bounds = array<i64: 2>, scalar_prefetch = 0 : i64, scratch_operands = 0 : i64, tpu.core_type = #tpu.core_type<tc>, window_params = [{transform_indices = @transform_0, window_bounds = array<i64: 1, 8, 32>}, {pipeline_mode = #tpu.pipeline_mode<synchronous>, transform_indices = @transform_1, window_bounds = array<i64: 32, 96>}, {pipeline_mode = #tpu.pipeline_mode<synchronous>, transform_indices = @transform_2, window_bounds = array<i64: 1, 96>}, {pipeline_mode = #tpu.pipeline_mode<synchronous>, transform_indices = @transform_3, window_bounds = array<i64: 32, 32>}, {pipeline_mode = #tpu.pipeline_mode<synchronous>, transform_indices = @transform_4, window_bounds = array<i64: 1, 32>}, {pipeline_mode = #tpu.pipeline_mode<synchronous>, transform_indices = @transform_5, window_bounds = array<i64: 1, 32>}, {pipeline_mode = #tpu.pipeline_mode<synchronous>, transform_indices = @transform_6, window_bounds = array<i64: 1, 32>}, {transform_indices = @transform_7, window_bounds = array<i64: 1, 8, 32>}]} {
    %c0 = arith.constant 0 : index
    %c0_0 = arith.constant 0 : index
    %c0_1 = arith.constant 0 : index
    %0 = vector.load %arg1[%c0, %c0_0, %c0_1] : memref<1x8x32xf32, #tpu.memory_space<vmem>>, vector<1x8x32xf32>
    %1 = vector.shape_cast %0 : vector<1x8x32xf32> to vector<8x32xf32>
    %c0_2 = arith.constant 0 : index
    %c0_3 = arith.constant 0 : index
    %2 = vector.load %arg2[%c0_2, %c0_3] : memref<32x96xf32, #tpu.memory_space<vmem>>, vector<32x96xf32>
    %3 = arith.truncf %2 : vector<32x96xf32> to vector<32x96xbf16>
    %c0_4 = arith.constant 0 : index
    %c0_5 = arith.constant 0 : index
    %4 = vector.load %arg3[%c0_4, %c0_5] : memref<1x96xf32, #tpu.memory_space<vmem>>, vector<1x96xf32>
    %5 = arith.truncf %1 : vector<8x32xf32> to vector<8x32xbf16>
    %cst = arith.constant dense<0.000000e+00> : vector<8x96xf32>
    %6 = tpu.matmul %5, %3, %cst {dimension_numbers = #tpu.dot_dimension_numbers<[1], [0], [0], [1], [0, 0, 1, 1], [], []>} : vector<8x32xbf16>, vector<32x96xbf16>, vector<8x96xf32> -> vector<8x96xf32>
    %7 = vector.broadcast %4 : vector<1x96xf32> to vector<8x96xf32>
    %8 = arith.addf %6, %7 : vector<8x96xf32>
    %9 = vector.extract_strided_slice %8 {offsets = [0, 0], sizes = [8, 32], strides = [1, 1]} : vector<8x96xf32> to vector<8x32xf32>
    %10 = vector.extract_strided_slice %8 {offsets = [0, 32], sizes = [8, 32], strides = [1, 1]} : vector<8x96xf32> to vector<8x32xf32>
    %11 = vector.extract_strided_slice %8 {offsets = [0, 64], sizes = [8, 32], strides = [1, 1]} : vector<8x96xf32> to vector<8x32xf32>
    %12 = tpu.iota {dimensions = array<i32: 0>} : vector<8x8xi32>
    %13 = tpu.iota {dimensions = array<i32: 1>} : vector<8x8xi32>
    %14 = arith.cmpi sle, %13, %12 : vector<8x8xi32>
    %cst_6 = arith.constant 0.000000e+00 : f32
    %cst_7 = arith.constant -1.000000e+09 : f32
    %15 = vector.broadcast %cst_6 : f32 to vector<8x8xf32>
    %16 = vector.broadcast %cst_7 : f32 to vector<8x8xf32>
    %17 = arith.select %14, %15, %16 : vector<8x8xi1>, vector<8x8xf32>
    %c0_8 = arith.constant 0 : index
    %c0_9 = arith.constant 0 : index
    %18 = vector.load %arg4[%c0_8, %c0_9] : memref<32x32xf32, #tpu.memory_space<vmem>>, vector<32x32xf32>
    %19 = arith.truncf %18 : vector<32x32xf32> to vector<32x32xbf16>
    %cst_10 = arith.constant 0.000000e+00 : f32
    %20 = vector.broadcast %cst_10 : f32 to vector<8x32xf32>
    %21 = vector.extract_strided_slice %9 {offsets = [0, 0], sizes = [8, 8], strides = [1, 1]} : vector<8x32xf32> to vector<8x8xf32>
    %cst_11 = arith.constant 0.353553385 : f32
    %22 = vector.broadcast %cst_11 : f32 to vector<8x8xf32>
    %23 = arith.mulf %21, %22 : vector<8x8xf32>
    %24 = arith.truncf %23 : vector<8x8xf32> to vector<8x8xbf16>
    %25 = vector.extract_strided_slice %10 {offsets = [0, 0], sizes = [8, 8], strides = [1, 1]} : vector<8x32xf32> to vector<8x8xf32>
    %26 = arith.truncf %25 : vector<8x8xf32> to vector<8x8xbf16>
    %27 = vector.extract_strided_slice %11 {offsets = [0, 0], sizes = [8, 8], strides = [1, 1]} : vector<8x32xf32> to vector<8x8xf32>
    %28 = arith.truncf %27 : vector<8x8xf32> to vector<8x8xbf16>
    %cst_12 = arith.constant dense<0.000000e+00> : vector<8x8xf32>
    %29 = tpu.matmul %24, %26, %cst_12 {dimension_numbers = #tpu.dot_dimension_numbers<[1], [1], [0], [0], [0, 0, 1, 0], [], []>} : vector<8x8xbf16>, vector<8x8xbf16>, vector<8x8xf32> -> vector<8x8xf32>
    %30 = arith.addf %29, %17 : vector<8x8xf32>
    %cst_13 = arith.constant dense<0xFF800000> : vector<8xf32>
    %31 = vector.multi_reduction <maximumf>, %30, %cst_13 [1] : vector<8x8xf32> to vector<8xf32>
    %32 = vector.shape_cast %31 : vector<8xf32> to vector<8x1xf32>
    %33 = vector.broadcast %32 : vector<8x1xf32> to vector<8x8xf32>
    %34 = arith.subf %30, %33 : vector<8x8xf32>
    %35 = math.exp %34 : vector<8x8xf32>
    %cst_14 = arith.constant dense<0.000000e+00> : vector<8xf32>
    %36 = vector.multi_reduction <add>, %35, %cst_14 [1] : vector<8x8xf32> to vector<8xf32>
    %37 = vector.shape_cast %36 : vector<8xf32> to vector<8x1xf32>
    %38 = tpu.reciprocal %37 {approx = true} : vector<8x1xf32> -> vector<8x1xf32>
    %39 = vector.broadcast %38 : vector<8x1xf32> to vector<8x8xf32>
    %40 = arith.mulf %35, %39 : vector<8x8xf32>
    %41 = arith.truncf %40 : vector<8x8xf32> to vector<8x8xbf16>
    %cst_15 = arith.constant dense<0.000000e+00> : vector<8x8xf32>
    %42 = tpu.matmul %41, %28, %cst_15 {dimension_numbers = #tpu.dot_dimension_numbers<[1], [0], [0], [1], [0, 0, 1, 1], [], []>} : vector<8x8xbf16>, vector<8x8xbf16>, vector<8x8xf32> -> vector<8x8xf32>
    %43 = arith.truncf %42 : vector<8x8xf32> to vector<8x8xbf16>
    %44 = vector.extract_strided_slice %19 {offsets = [0, 0], sizes = [8, 32], strides = [1, 1]} : vector<32x32xbf16> to vector<8x32xbf16>
    %cst_16 = arith.constant dense<0.000000e+00> : vector<8x32xf32>
    %45 = tpu.matmul %43, %44, %cst_16 {dimension_numbers = #tpu.dot_dimension_numbers<[1], [0], [0], [1], [0, 0, 1, 1], [], []>} : vector<8x8xbf16>, vector<8x32xbf16>, vector<8x32xf32> -> vector<8x32xf32>
    %46 = arith.addf %20, %45 : vector<8x32xf32>
    %47 = vector.extract_strided_slice %9 {offsets = [0, 8], sizes = [8, 8], strides = [1, 1]} : vector<8x32xf32> to vector<8x8xf32>
    %cst_17 = arith.constant 0.353553385 : f32
    %48 = vector.broadcast %cst_17 : f32 to vector<8x8xf32>
    %49 = arith.mulf %47, %48 : vector<8x8xf32>
    %50 = arith.truncf %49 : vector<8x8xf32> to vector<8x8xbf16>
    %51 = vector.extract_strided_slice %10 {offsets = [0, 8], sizes = [8, 8], strides = [1, 1]} : vector<8x32xf32> to vector<8x8xf32>
    %52 = arith.truncf %51 : vector<8x8xf32> to vector<8x8xbf16>
    %53 = vector.extract_strided_slice %11 {offsets = [0, 8], sizes = [8, 8], strides = [1, 1]} : vector<8x32xf32> to vector<8x8xf32>
    %54 = arith.truncf %53 : vector<8x8xf32> to vector<8x8xbf16>
    %cst_18 = arith.constant dense<0.000000e+00> : vector<8x8xf32>
    %55 = tpu.matmul %50, %52, %cst_18 {dimension_numbers = #tpu.dot_dimension_numbers<[1], [1], [0], [0], [0, 0, 1, 0], [], []>} : vector<8x8xbf16>, vector<8x8xbf16>, vector<8x8xf32> -> vector<8x8xf32>
    %56 = arith.addf %55, %17 : vector<8x8xf32>
    %cst_19 = arith.constant dense<0xFF800000> : vector<8xf32>
    %57 = vector.multi_reduction <maximumf>, %56, %cst_19 [1] : vector<8x8xf32> to vector<8xf32>
    %58 = vector.shape_cast %57 : vector<8xf32> to vector<8x1xf32>
    %59 = vector.broadcast %58 : vector<8x1xf32> to vector<8x8xf32>
    %60 = arith.subf %56, %59 : vector<8x8xf32>
    %61 = math.exp %60 : vector<8x8xf32>
    %cst_20 = arith.constant dense<0.000000e+00> : vector<8xf32>
    %62 = vector.multi_reduction <add>, %61, %cst_20 [1] : vector<8x8xf32> to vector<8xf32>
    %63 = vector.shape_cast %62 : vector<8xf32> to vector<8x1xf32>
    %64 = tpu.reciprocal %63 {approx = true} : vector<8x1xf32> -> vector<8x1xf32>
    %65 = vector.broadcast %64 : vector<8x1xf32> to vector<8x8xf32>
    %66 = arith.mulf %61, %65 : vector<8x8xf32>
    %67 = arith.truncf %66 : vector<8x8xf32> to vector<8x8xbf16>
    %cst_21 = arith.constant dense<0.000000e+00> : vector<8x8xf32>
    %68 = tpu.matmul %67, %54, %cst_21 {dimension_numbers = #tpu.dot_dimension_numbers<[1], [0], [0], [1], [0, 0, 1, 1], [], []>} : vector<8x8xbf16>, vector<8x8xbf16>, vector<8x8xf32> -> vector<8x8xf32>
    %69 = arith.truncf %68 : vector<8x8xf32> to vector<8x8xbf16>
    %70 = vector.extract_strided_slice %19 {offsets = [8, 0], sizes = [8, 32], strides = [1, 1]} : vector<32x32xbf16> to vector<8x32xbf16>
    %cst_22 = arith.constant dense<0.000000e+00> : vector<8x32xf32>
    %71 = tpu.matmul %69, %70, %cst_22 {dimension_numbers = #tpu.dot_dimension_numbers<[1], [0], [0], [1], [0, 0, 1, 1], [], []>} : vector<8x8xbf16>, vector<8x32xbf16>, vector<8x32xf32> -> vector<8x32xf32>
    %72 = arith.addf %46, %71 : vector<8x32xf32>
    %73 = vector.extract_strided_slice %9 {offsets = [0, 16], sizes = [8, 8], strides = [1, 1]} : vector<8x32xf32> to vector<8x8xf32>
    %cst_23 = arith.constant 0.353553385 : f32
    %74 = vector.broadcast %cst_23 : f32 to vector<8x8xf32>
    %75 = arith.mulf %73, %74 : vector<8x8xf32>
    %76 = arith.truncf %75 : vector<8x8xf32> to vector<8x8xbf16>
    %77 = vector.extract_strided_slice %10 {offsets = [0, 16], sizes = [8, 8], strides = [1, 1]} : vector<8x32xf32> to vector<8x8xf32>
    %78 = arith.truncf %77 : vector<8x8xf32> to vector<8x8xbf16>
    %79 = vector.extract_strided_slice %11 {offsets = [0, 16], sizes = [8, 8], strides = [1, 1]} : vector<8x32xf32> to vector<8x8xf32>
    %80 = arith.truncf %79 : vector<8x8xf32> to vector<8x8xbf16>
    %cst_24 = arith.constant dense<0.000000e+00> : vector<8x8xf32>
    %81 = tpu.matmul %76, %78, %cst_24 {dimension_numbers = #tpu.dot_dimension_numbers<[1], [1], [0], [0], [0, 0, 1, 0], [], []>} : vector<8x8xbf16>, vector<8x8xbf16>, vector<8x8xf32> -> vector<8x8xf32>
    %82 = arith.addf %81, %17 : vector<8x8xf32>
    %cst_25 = arith.constant dense<0xFF800000> : vector<8xf32>
    %83 = vector.multi_reduction <maximumf>, %82, %cst_25 [1] : vector<8x8xf32> to vector<8xf32>
    %84 = vector.shape_cast %83 : vector<8xf32> to vector<8x1xf32>
    %85 = vector.broadcast %84 : vector<8x1xf32> to vector<8x8xf32>
    %86 = arith.subf %82, %85 : vector<8x8xf32>
    %87 = math.exp %86 : vector<8x8xf32>
    %cst_26 = arith.constant dense<0.000000e+00> : vector<8xf32>
    %88 = vector.multi_reduction <add>, %87, %cst_26 [1] : vector<8x8xf32> to vector<8xf32>
    %89 = vector.shape_cast %88 : vector<8xf32> to vector<8x1xf32>
    %90 = tpu.reciprocal %89 {approx = true} : vector<8x1xf32> -> vector<8x1xf32>
    %91 = vector.broadcast %90 : vector<8x1xf32> to vector<8x8xf32>
    %92 = arith.mulf %87, %91 : vector<8x8xf32>
    %93 = arith.truncf %92 : vector<8x8xf32> to vector<8x8xbf16>
    %cst_27 = arith.constant dense<0.000000e+00> : vector<8x8xf32>
    %94 = tpu.matmul %93, %80, %cst_27 {dimension_numbers = #tpu.dot_dimension_numbers<[1], [0], [0], [1], [0, 0, 1, 1], [], []>} : vector<8x8xbf16>, vector<8x8xbf16>, vector<8x8xf32> -> vector<8x8xf32>
    %95 = arith.truncf %94 : vector<8x8xf32> to vector<8x8xbf16>
    %96 = vector.extract_strided_slice %19 {offsets = [16, 0], sizes = [8, 32], strides = [1, 1]} : vector<32x32xbf16> to vector<8x32xbf16>
    %cst_28 = arith.constant dense<0.000000e+00> : vector<8x32xf32>
    %97 = tpu.matmul %95, %96, %cst_28 {dimension_numbers = #tpu.dot_dimension_numbers<[1], [0], [0], [1], [0, 0, 1, 1], [], []>} : vector<8x8xbf16>, vector<8x32xbf16>, vector<8x32xf32> -> vector<8x32xf32>
    %98 = arith.addf %72, %97 : vector<8x32xf32>
    %99 = vector.extract_strided_slice %9 {offsets = [0, 24], sizes = [8, 8], strides = [1, 1]} : vector<8x32xf32> to vector<8x8xf32>
    %cst_29 = arith.constant 0.353553385 : f32
    %100 = vector.broadcast %cst_29 : f32 to vector<8x8xf32>
    %101 = arith.mulf %99, %100 : vector<8x8xf32>
    %102 = arith.truncf %101 : vector<8x8xf32> to vector<8x8xbf16>
    %103 = vector.extract_strided_slice %10 {offsets = [0, 24], sizes = [8, 8], strides = [1, 1]} : vector<8x32xf32> to vector<8x8xf32>
    %104 = arith.truncf %103 : vector<8x8xf32> to vector<8x8xbf16>
    %105 = vector.extract_strided_slice %11 {offsets = [0, 24], sizes = [8, 8], strides = [1, 1]} : vector<8x32xf32> to vector<8x8xf32>
    %106 = arith.truncf %105 : vector<8x8xf32> to vector<8x8xbf16>
    %cst_30 = arith.constant dense<0.000000e+00> : vector<8x8xf32>
    %107 = tpu.matmul %102, %104, %cst_30 {dimension_numbers = #tpu.dot_dimension_numbers<[1], [1], [0], [0], [0, 0, 1, 0], [], []>} : vector<8x8xbf16>, vector<8x8xbf16>, vector<8x8xf32> -> vector<8x8xf32>
    %108 = arith.addf %107, %17 : vector<8x8xf32>
    %cst_31 = arith.constant dense<0xFF800000> : vector<8xf32>
    %109 = vector.multi_reduction <maximumf>, %108, %cst_31 [1] : vector<8x8xf32> to vector<8xf32>
    %110 = vector.shape_cast %109 : vector<8xf32> to vector<8x1xf32>
    %111 = vector.broadcast %110 : vector<8x1xf32> to vector<8x8xf32>
    %112 = arith.subf %108, %111 : vector<8x8xf32>
    %113 = math.exp %112 : vector<8x8xf32>
    %cst_32 = arith.constant dense<0.000000e+00> : vector<8xf32>
    %114 = vector.multi_reduction <add>, %113, %cst_32 [1] : vector<8x8xf32> to vector<8xf32>
    %115 = vector.shape_cast %114 : vector<8xf32> to vector<8x1xf32>
    %116 = tpu.reciprocal %115 {approx = true} : vector<8x1xf32> -> vector<8x1xf32>
    %117 = vector.broadcast %116 : vector<8x1xf32> to vector<8x8xf32>
    %118 = arith.mulf %113, %117 : vector<8x8xf32>
    %119 = arith.truncf %118 : vector<8x8xf32> to vector<8x8xbf16>
    %cst_33 = arith.constant dense<0.000000e+00> : vector<8x8xf32>
    %120 = tpu.matmul %119, %106, %cst_33 {dimension_numbers = #tpu.dot_dimension_numbers<[1], [0], [0], [1], [0, 0, 1, 1], [], []>} : vector<8x8xbf16>, vector<8x8xbf16>, vector<8x8xf32> -> vector<8x8xf32>
    %121 = arith.truncf %120 : vector<8x8xf32> to vector<8x8xbf16>
    %122 = vector.extract_strided_slice %19 {offsets = [24, 0], sizes = [8, 32], strides = [1, 1]} : vector<32x32xbf16> to vector<8x32xbf16>
    %cst_34 = arith.constant dense<0.000000e+00> : vector<8x32xf32>
    %123 = tpu.matmul %121, %122, %cst_34 {dimension_numbers = #tpu.dot_dimension_numbers<[1], [0], [0], [1], [0, 0, 1, 1], [], []>} : vector<8x8xbf16>, vector<8x32xbf16>, vector<8x32xf32> -> vector<8x32xf32>
    %124 = arith.addf %98, %123 : vector<8x32xf32>
    %c0_35 = arith.constant 0 : index
    %c0_36 = arith.constant 0 : index
    %125 = vector.load %arg5[%c0_35, %c0_36] : memref<1x32xf32, #tpu.memory_space<vmem>>, vector<1x32xf32>
    %126 = vector.broadcast %125 : vector<1x32xf32> to vector<8x32xf32>
    %127 = arith.addf %124, %126 : vector<8x32xf32>
    %128 = arith.addf %1, %127 : vector<8x32xf32>
    %cst_37 = arith.constant dense<0.000000e+00> : vector<8xf32>
    %129 = vector.multi_reduction <add>, %128, %cst_37 [1] : vector<8x32xf32> to vector<8xf32>
    %130 = vector.shape_cast %129 : vector<8xf32> to vector<8x1xf32>
    %cst_38 = arith.constant 3.125000e-02 : f32
    %131 = vector.broadcast %cst_38 : f32 to vector<8x1xf32>
    %132 = arith.mulf %130, %131 : vector<8x1xf32>
    %133 = vector.broadcast %132 : vector<8x1xf32> to vector<8x32xf32>
    %134 = arith.subf %128, %133 : vector<8x32xf32>
    %135 = arith.mulf %134, %134 : vector<8x32xf32>
    %cst_39 = arith.constant dense<0.000000e+00> : vector<8xf32>
    %136 = vector.multi_reduction <add>, %135, %cst_39 [1] : vector<8x32xf32> to vector<8xf32>
    %137 = vector.shape_cast %136 : vector<8xf32> to vector<8x1xf32>
    %cst_40 = arith.constant 3.125000e-02 : f32
    %138 = vector.broadcast %cst_40 : f32 to vector<8x1xf32>
    %139 = arith.mulf %137, %138 : vector<8x1xf32>
    %cst_41 = arith.constant 9.99999974E-6 : f32
    %140 = vector.broadcast %cst_41 : f32 to vector<8x1xf32>
    %141 = arith.addf %139, %140 : vector<8x1xf32>
    %142 = math.rsqrt %141 : vector<8x1xf32>
    %143 = vector.broadcast %142 : vector<8x1xf32> to vector<8x32xf32>
    %144 = arith.mulf %134, %143 : vector<8x32xf32>
    %c0_42 = arith.constant 0 : index
    %c0_43 = arith.constant 0 : index
    %145 = vector.load %arg6[%c0_42, %c0_43] : memref<1x32xf32, #tpu.memory_space<vmem>>, vector<1x32xf32>
    %146 = vector.broadcast %145 : vector<1x32xf32> to vector<8x32xf32>
    %147 = arith.mulf %144, %146 : vector<8x32xf32>
    %c0_44 = arith.constant 0 : index
    %c0_45 = arith.constant 0 : index
    %148 = vector.load %arg7[%c0_44, %c0_45] : memref<1x32xf32, #tpu.memory_space<vmem>>, vector<1x32xf32>
    %149 = vector.broadcast %148 : vector<1x32xf32> to vector<8x32xf32>
    %150 = arith.addf %147, %149 : vector<8x32xf32>
    %c0_46 = arith.constant 0 : index
    %c0_47 = arith.constant 0 : index
    %c0_48 = arith.constant 0 : index
    %151 = vector.load %arg8[%c0_46, %c0_47, %c0_48] : memref<1x8x32xf32, #tpu.memory_space<vmem>>, vector<1x8x32xf32>
    %152 = vector.shape_cast %151 : vector<1x8x32xf32> to vector<8x32xf32>
    %153 = vector.shape_cast %150 : vector<8x32xf32> to vector<1x8x32xf32>
    tpu.vector_store %arg8[%c0_46, %c0_47, %c0_48], %153 {strides = array<i32>} : memref<1x8x32xf32, #tpu.memory_space<vmem>>, vector<1x8x32xf32>,
    return
  }
  func.func @transform_0(%arg0: i32) -> (i32, i32, i32) {
    %c0_i32 = arith.constant 0 : i32
    %c0_i32_0 = arith.constant 0 : i32
    %c0_i32_1 = arith.constant 0 : i32
    return %arg0, %c0_i32, %c0_i32_0 : i32, i32, i32
  }
  func.func @transform_1(%arg0: i32) -> (i32, i32) {
    %c0_i32 = arith.constant 0 : i32
    %c0_i32_0 = arith.constant 0 : i32
    %c0_i32_1 = arith.constant 0 : i32
    return %c0_i32, %c0_i32_0 : i32, i32
  }
  func.func @transform_2(%arg0: i32) -> (i32, i32) {
    %c0_i32 = arith.constant 0 : i32
    %c0_i32_0 = arith.constant 0 : i32
    %c0_i32_1 = arith.constant 0 : i32
    return %c0_i32, %c0_i32_0 : i32, i32
  }
  func.func @transform_3(%arg0: i32) -> (i32, i32) {
    %c0_i32 = arith.constant 0 : i32
    %c0_i32_0 = arith.constant 0 : i32
    %c0_i32_1 = arith.constant 0 : i32
    return %c0_i32, %c0_i32_0 : i32, i32
  }
  func.func @transform_4(%arg0: i32) -> (i32, i32) {
    %c0_i32 = arith.constant 0 : i32
    %c0_i32_0 = arith.constant 0 : i32
    %c0_i32_1 = arith.constant 0 : i32
    return %c0_i32, %c0_i32_0 : i32, i32
  }
  func.func @transform_5(%arg0: i32) -> (i32, i32) {
    %c0_i32 = arith.constant 0 : i32
    %c0_i32_0 = arith.constant 0 : i32
    %c0_i32_1 = arith.constant 0 : i32
    return %c0_i32, %c0_i32_0 : i32, i32
  }
  func.func @transform_6(%arg0: i32) -> (i32, i32) {
    %c0_i32 = arith.constant 0 : i32
    %c0_i32_0 = arith.constant 0 : i32
    %c0_i32_1 = arith.constant 0 : i32
    return %c0_i32, %c0_i32_0 : i32, i32
  }
  func.func @transform_7(%arg0: i32) -> (i32, i32, i32) {
    %c0_i32 = arith.constant 0 : i32
    %c0_i32_0 = arith.constant 0 : i32
    %c0_i32_1 = arith.constant 0 : i32
    return %arg0, %c0_i32, %c0_i32_0 : i32, i32, i32
  }
}

module attributes {stable_mosaic.version = 11 : i64} {
  func.func @_mha_block_kernel(%arg0: i32, %arg1: memref<1x8x32xf32, #tpu.memory_space<vmem>>, %arg2: memref<32x96xf32, #tpu.memory_space<vmem>>, %arg3: memref<1x96xf32, #tpu.memory_space<vmem>>, %arg4: memref<32x32xf32, #tpu.memory_space<vmem>>, %arg5: memref<1x32xf32, #tpu.memory_space<vmem>>, %arg6: memref<1x32xf32, #tpu.memory_space<vmem>>, %arg7: memref<1x32xf32, #tpu.memory_space<vmem>>, %arg8: memref<1x8x32xf32, #tpu.memory_space<vmem>>) attributes {dimension_semantics = [#tpu.dimension_semantics<parallel>], iteration_bounds = array<i64: 2>, scalar_prefetch = 0 : i64, scratch_operands = 0 : i64, tpu.core_type = #tpu.core_type<tc>, window_params = [{transform_indices = @transform_0, window_bounds = array<i64: 1, 8, 32>}, {pipeline_mode = #tpu.pipeline_mode<synchronous>, transform_indices = @transform_1, window_bounds = array<i64: 32, 96>}, {pipeline_mode = #tpu.pipeline_mode<synchronous>, transform_indices = @transform_2, window_bounds = array<i64: 1, 96>}, {pipeline_mode = #tpu.pipeline_mode<synchronous>, transform_indices = @transform_3, window_bounds = array<i64: 32, 32>}, {pipeline_mode = #tpu.pipeline_mode<synchronous>, transform_indices = @transform_4, window_bounds = array<i64: 1, 32>}, {pipeline_mode = #tpu.pipeline_mode<synchronous>, transform_indices = @transform_5, window_bounds = array<i64: 1, 32>}, {pipeline_mode = #tpu.pipeline_mode<synchronous>, transform_indices = @transform_6, window_bounds = array<i64: 1, 32>}, {transform_indices = @transform_7, window_bounds = array<i64: 1, 8, 32>}]} {
    %c0 = arith.constant 0 : index
    %c0_0 = arith.constant 0 : index
    %c0_1 = arith.constant 0 : index
    %0 = vector.load %arg1[%c0, %c0_0, %c0_1] : memref<1x8x32xf32, #tpu.memory_space<vmem>>, vector<1x8x32xf32>
    %1 = vector.shape_cast %0 : vector<1x8x32xf32> to vector<8x32xf32>
    %c0_2 = arith.constant 0 : index
    %c0_3 = arith.constant 0 : index
    %2 = vector.load %arg2[%c0_2, %c0_3] : memref<32x96xf32, #tpu.memory_space<vmem>>, vector<32x96xf32>
    %3 = arith.truncf %2 : vector<32x96xf32> to vector<32x96xbf16>
    %c0_4 = arith.constant 0 : index
    %c0_5 = arith.constant 0 : index
    %4 = vector.load %arg3[%c0_4, %c0_5] : memref<1x96xf32, #tpu.memory_space<vmem>>, vector<1x96xf32>
    %5 = arith.truncf %1 : vector<8x32xf32> to vector<8x32xbf16>
    %cst = arith.constant dense<0.000000e+00> : vector<8x96xf32>
    %6 = tpu.matmul %5, %3, %cst {dimension_numbers = #tpu.dot_dimension_numbers<[1], [0], [0], [1], [0, 0, 1, 1], [], []>} : vector<8x32xbf16>, vector<32x96xbf16>, vector<8x96xf32> -> vector<8x96xf32>
    %7 = vector.broadcast %4 : vector<1x96xf32> to vector<8x96xf32>
    %8 = arith.addf %6, %7 : vector<8x96xf32>
    %9 = vector.extract_strided_slice %8 {offsets = [0, 0], sizes = [8, 32], strides = [1, 1]} : vector<8x96xf32> to vector<8x32xf32>
    %10 = vector.extract_strided_slice %8 {offsets = [0, 32], sizes = [8, 32], strides = [1, 1]} : vector<8x96xf32> to vector<8x32xf32>
    %11 = vector.extract_strided_slice %8 {offsets = [0, 64], sizes = [8, 32], strides = [1, 1]} : vector<8x96xf32> to vector<8x32xf32>
    %12 = tpu.iota {dimensions = array<i32: 0>} : vector<8x8xi32>
    %13 = tpu.iota {dimensions = array<i32: 1>} : vector<8x8xi32>
    %14 = arith.cmpi sle, %13, %12 : vector<8x8xi32>
    %cst_6 = arith.constant 0.000000e+00 : f32
    %cst_7 = arith.constant -1.000000e+09 : f32
    %15 = vector.broadcast %cst_6 : f32 to vector<8x8xf32>
    %16 = vector.broadcast %cst_7 : f32 to vector<8x8xf32>
    %17 = arith.select %14, %15, %16 : vector<8x8xi1>, vector<8x8xf32>
    %c0_8 = arith.constant 0 : index
    %c0_9 = arith.constant 0 : index
    %18 = vector.load %arg4[%c0_8, %c0_9] : memref<32x32xf32, #tpu.memory_space<vmem>>, vector<32x32xf32>
    %19 = arith.truncf %18 : vector<32x32xf32> to vector<32x32xbf16>
    %cst_10 = arith.constant 0.000000e+00 : f32
    %20 = vector.broadcast %cst_10 : f32 to vector<8x32xf32>
    %21 = vector.extract_strided_slice %9 {offsets = [0, 0], sizes = [8, 8], strides = [1, 1]} : vector<8x32xf32> to vector<8x8xf32>
    %cst_11 = arith.constant 0.353553385 : f32
    %22 = vector.broadcast %cst_11 : f32 to vector<8x8xf32>
    %23 = arith.mulf %21, %22 : vector<8x8xf32>
    %24 = arith.truncf %23 : vector<8x8xf32> to vector<8x8xbf16>
    %25 = vector.extract_strided_slice %10 {offsets = [0, 0], sizes = [8, 8], strides = [1, 1]} : vector<8x32xf32> to vector<8x8xf32>
    %26 = arith.truncf %25 : vector<8x8xf32> to vector<8x8xbf16>
    %27 = vector.extract_strided_slice %11 {offsets = [0, 0], sizes = [8, 8], strides = [1, 1]} : vector<8x32xf32> to vector<8x8xf32>
    %28 = arith.truncf %27 : vector<8x8xf32> to vector<8x8xbf16>
    %cst_12 = arith.constant dense<0.000000e+00> : vector<8x8xf32>
    %29 = tpu.matmul %24, %26, %cst_12 {dimension_numbers = #tpu.dot_dimension_numbers<[1], [1], [0], [0], [0, 0, 1, 0], [], []>} : vector<8x8xbf16>, vector<8x8xbf16>, vector<8x8xf32> -> vector<8x8xf32>
    %30 = arith.addf %29, %17 : vector<8x8xf32>
    %cst_13 = arith.constant dense<0xFF800000> : vector<8xf32>
    %31 = vector.multi_reduction <maximumf>, %30, %cst_13 [1] : vector<8x8xf32> to vector<8xf32>
    %32 = vector.shape_cast %31 : vector<8xf32> to vector<8x1xf32>
    %33 = vector.broadcast %32 : vector<8x1xf32> to vector<8x8xf32>
    %34 = arith.subf %30, %33 : vector<8x8xf32>
    %35 = math.exp %34 : vector<8x8xf32>
    %cst_14 = arith.constant dense<0.000000e+00> : vector<8xf32>
    %36 = vector.multi_reduction <add>, %35, %cst_14 [1] : vector<8x8xf32> to vector<8xf32>
    %37 = vector.shape_cast %36 : vector<8xf32> to vector<8x1xf32>
    %38 = tpu.reciprocal %37 {approx = true} : vector<8x1xf32> -> vector<8x1xf32>
    %39 = vector.broadcast %38 : vector<8x1xf32> to vector<8x8xf32>
    %40 = arith.mulf %35, %39 : vector<8x8xf32>
    %41 = arith.truncf %40 : vector<8x8xf32> to vector<8x8xbf16>
    %cst_15 = arith.constant dense<0.000000e+00> : vector<8x8xf32>
    %42 = tpu.matmul %41, %28, %cst_15 {dimension_numbers = #tpu.dot_dimension_numbers<[1], [0], [0], [1], [0, 0, 1, 1], [], []>} : vector<8x8xbf16>, vector<8x8xbf16>, vector<8x8xf32> -> vector<8x8xf32>
    %43 = arith.truncf %42 : vector<8x8xf32> to vector<8x8xbf16>
    %44 = vector.extract_strided_slice %19 {offsets = [0, 0], sizes = [8, 32], strides = [1, 1]} : vector<32x32xbf16> to vector<8x32xbf16>
    %cst_16 = arith.constant dense<0.000000e+00> : vector<8x32xf32>
    %45 = tpu.matmul %43, %44, %cst_16 {dimension_numbers = #tpu.dot_dimension_numbers<[1], [0], [0], [1], [0, 0, 1, 1], [], []>} : vector<8x8xbf16>, vector<8x32xbf16>, vector<8x32xf32> -> vector<8x32xf32>
    %46 = arith.addf %20, %45 : vector<8x32xf32>
    %47 = vector.extract_strided_slice %9 {offsets = [0, 8], sizes = [8, 8], strides = [1, 1]} : vector<8x32xf32> to vector<8x8xf32>
    %cst_17 = arith.constant 0.353553385 : f32
    %48 = vector.broadcast %cst_17 : f32 to vector<8x8xf32>
    %49 = arith.mulf %47, %48 : vector<8x8xf32>
    %50 = arith.truncf %49 : vector<8x8xf32> to vector<8x8xbf16>
    %51 = vector.extract_strided_slice %10 {offsets = [0, 8], sizes = [8, 8], strides = [1, 1]} : vector<8x32xf32> to vector<8x8xf32>
    %52 = arith.truncf %51 : vector<8x8xf32> to vector<8x8xbf16>
    %53 = vector.extract_strided_slice %11 {offsets = [0, 8], sizes = [8, 8], strides = [1, 1]} : vector<8x32xf32> to vector<8x8xf32>
    %54 = arith.truncf %53 : vector<8x8xf32> to vector<8x8xbf16>
    %cst_18 = arith.constant dense<0.000000e+00> : vector<8x8xf32>
    %55 = tpu.matmul %50, %52, %cst_18 {dimension_numbers = #tpu.dot_dimension_numbers<[1], [1], [0], [0], [0, 0, 1, 0], [], []>} : vector<8x8xbf16>, vector<8x8xbf16>, vector<8x8xf32> -> vector<8x8xf32>
    %56 = arith.addf %55, %17 : vector<8x8xf32>
    %cst_19 = arith.constant dense<0xFF800000> : vector<8xf32>
    %57 = vector.multi_reduction <maximumf>, %56, %cst_19 [1] : vector<8x8xf32> to vector<8xf32>
    %58 = vector.shape_cast %57 : vector<8xf32> to vector<8x1xf32>
    %59 = vector.broadcast %58 : vector<8x1xf32> to vector<8x8xf32>
    %60 = arith.subf %56, %59 : vector<8x8xf32>
    %61 = math.exp %60 : vector<8x8xf32>
    %cst_20 = arith.constant dense<0.000000e+00> : vector<8xf32>
    %62 = vector.multi_reduction <add>, %61, %cst_20 [1] : vector<8x8xf32> to vector<8xf32>
    %63 = vector.shape_cast %62 : vector<8xf32> to vector<8x1xf32>
    %64 = tpu.reciprocal %63 {approx = true} : vector<8x1xf32> -> vector<8x1xf32>
    %65 = vector.broadcast %64 : vector<8x1xf32> to vector<8x8xf32>
    %66 = arith.mulf %61, %65 : vector<8x8xf32>
    %67 = arith.truncf %66 : vector<8x8xf32> to vector<8x8xbf16>
    %cst_21 = arith.constant dense<0.000000e+00> : vector<8x8xf32>
    %68 = tpu.matmul %67, %54, %cst_21 {dimension_numbers = #tpu.dot_dimension_numbers<[1], [0], [0], [1], [0, 0, 1, 1], [], []>} : vector<8x8xbf16>, vector<8x8xbf16>, vector<8x8xf32> -> vector<8x8xf32>
    %69 = arith.truncf %68 : vector<8x8xf32> to vector<8x8xbf16>
    %70 = vector.extract_strided_slice %19 {offsets = [8, 0], sizes = [8, 32], strides = [1, 1]} : vector<32x32xbf16> to vector<8x32xbf16>
    %cst_22 = arith.constant dense<0.000000e+00> : vector<8x32xf32>
    %71 = tpu.matmul %69, %70, %cst_22 {dimension_numbers = #tpu.dot_dimension_numbers<[1], [0], [0], [1], [0, 0, 1, 1], [], []>} : vector<8x8xbf16>, vector<8x32xbf16>, vector<8x32xf32> -> vector<8x32xf32>
    %72 = arith.addf %46, %71 : vector<8x32xf32>
    %73 = vector.extract_strided_slice %9 {offsets = [0, 16], sizes = [8, 8], strides = [1, 1]} : vector<8x32xf32> to vector<8x8xf32>
    %cst_23 = arith.constant 0.353553385 : f32
    %74 = vector.broadcast %cst_23 : f32 to vector<8x8xf32>
    %75 = arith.mulf %73, %74 : vector<8x8xf32>
    %76 = arith.truncf %75 : vector<8x8xf32> to vector<8x8xbf16>
    %77 = vector.extract_strided_slice %10 {offsets = [0, 16], sizes = [8, 8], strides = [1, 1]} : vector<8x32xf32> to vector<8x8xf32>
    %78 = arith.truncf %77 : vector<8x8xf32> to vector<8x8xbf16>
    %79 = vector.extract_strided_slice %11 {offsets = [0, 16], sizes = [8, 8], strides = [1, 1]} : vector<8x32xf32> to vector<8x8xf32>
    %80 = arith.truncf %79 : vector<8x8xf32> to vector<8x8xbf16>
    %cst_24 = arith.constant dense<0.000000e+00> : vector<8x8xf32>
    %81 = tpu.matmul %76, %78, %cst_24 {dimension_numbers = #tpu.dot_dimension_numbers<[1], [1], [0], [0], [0, 0, 1, 0], [], []>} : vector<8x8xbf16>, vector<8x8xbf16>, vector<8x8xf32> -> vector<8x8xf32>
    %82 = arith.addf %81, %17 : vector<8x8xf32>
    %cst_25 = arith.constant dense<0xFF800000> : vector<8xf32>
    %83 = vector.multi_reduction <maximumf>, %82, %cst_25 [1] : vector<8x8xf32> to vector<8xf32>
    %84 = vector.shape_cast %83 : vector<8xf32> to vector<8x1xf32>
    %85 = vector.broadcast %84 : vector<8x1xf32> to vector<8x8xf32>
    %86 = arith.subf %82, %85 : vector<8x8xf32>
    %87 = math.exp %86 : vector<8x8xf32>
    %cst_26 = arith.constant dense<0.000000e+00> : vector<8xf32>
    %88 = vector.multi_reduction <add>, %87, %cst_26 [1] : vector<8x8xf32> to vector<8xf32>
    %89 = vector.shape_cast %88 : vector<8xf32> to vector<8x1xf32>
    %90 = tpu.reciprocal %89 {approx = true} : vector<8x1xf32> -> vector<8x1xf32>
    %91 = vector.broadcast %90 : vector<8x1xf32> to vector<8x8xf32>
    %92 = arith.mulf %87, %91 : vector<8x8xf32>
    %93 = arith.truncf %92 : vector<8x8xf32> to vector<8x8xbf16>
    %cst_27 = arith.constant dense<0.000000e+00> : vector<8x8xf32>
    %94 = tpu.matmul %93, %80, %cst_27 {dimension_numbers = #tpu.dot_dimension_numbers<[1], [0], [0], [1], [0, 0, 1, 1], [], []>} : vector<8x8xbf16>, vector<8x8xbf16>, vector<8x8xf32> -> vector<8x8xf32>
    %95 = arith.truncf %94 : vector<8x8xf32> to vector<8x8xbf16>
    %96 = vector.extract_strided_slice %19 {offsets = [16, 0], sizes = [8, 32], strides = [1, 1]} : vector<32x32xbf16> to vector<8x32xbf16>
    %cst_28 = arith.constant dense<0.000000e+00> : vector<8x32xf32>
    %97 = tpu.matmul %95, %96, %cst_28 {dimension_numbers = #tpu.dot_dimension_numbers<[1], [0], [0], [1], [0, 0, 1, 1], [], []>} : vector<8x8xbf16>, vector<8x32xbf16>, vector<8x32xf32> -> vector<8x32xf32>
    %98 = arith.addf %72, %97 : vector<8x32xf32>
    %99 = vector.extract_strided_slice %9 {offsets = [0, 24], sizes = [8, 8], strides = [1, 1]} : vector<8x32xf32> to vector<8x8xf32>
    %cst_29 = arith.constant 0.353553385 : f32
    %100 = vector.broadcast %cst_29 : f32 to vector<8x8xf32>
    %101 = arith.mulf %99, %100 : vector<8x8xf32>
    %102 = arith.truncf %101 : vector<8x8xf32> to vector<8x8xbf16>
    %103 = vector.extract_strided_slice %10 {offsets = [0, 24], sizes = [8, 8], strides = [1, 1]} : vector<8x32xf32> to vector<8x8xf32>
    %104 = arith.truncf %103 : vector<8x8xf32> to vector<8x8xbf16>
    %105 = vector.extract_strided_slice %11 {offsets = [0, 24], sizes = [8, 8], strides = [1, 1]} : vector<8x32xf32> to vector<8x8xf32>
    %106 = arith.truncf %105 : vector<8x8xf32> to vector<8x8xbf16>
    %cst_30 = arith.constant dense<0.000000e+00> : vector<8x8xf32>
    %107 = tpu.matmul %102, %104, %cst_30 {dimension_numbers = #tpu.dot_dimension_numbers<[1], [1], [0], [0], [0, 0, 1, 0], [], []>} : vector<8x8xbf16>, vector<8x8xbf16>, vector<8x8xf32> -> vector<8x8xf32>
    %108 = arith.addf %107, %17 : vector<8x8xf32>
    %cst_31 = arith.constant dense<0xFF800000> : vector<8xf32>
    %109 = vector.multi_reduction <maximumf>, %108, %cst_31 [1] : vector<8x8xf32> to vector<8xf32>
    %110 = vector.shape_cast %109 : vector<8xf32> to vector<8x1xf32>
    %111 = vector.broadcast %110 : vector<8x1xf32> to vector<8x8xf32>
    %112 = arith.subf %108, %111 : vector<8x8xf32>
    %113 = math.exp %112 : vector<8x8xf32>
    %cst_32 = arith.constant dense<0.000000e+00> : vector<8xf32>
    %114 = vector.multi_reduction <add>, %113, %cst_32 [1] : vector<8x8xf32> to vector<8xf32>
    %115 = vector.shape_cast %114 : vector<8xf32> to vector<8x1xf32>
    %116 = tpu.reciprocal %115 {approx = true} : vector<8x1xf32> -> vector<8x1xf32>
    %117 = vector.broadcast %116 : vector<8x1xf32> to vector<8x8xf32>
    %118 = arith.mulf %113, %117 : vector<8x8xf32>
    %119 = arith.truncf %118 : vector<8x8xf32> to vector<8x8xbf16>
    %cst_33 = arith.constant dense<0.000000e+00> : vector<8x8xf32>
    %120 = tpu.matmul %119, %106, %cst_33 {dimension_numbers = #tpu.dot_dimension_numbers<[1], [0], [0], [1], [0, 0, 1, 1], [], []>} : vector<8x8xbf16>, vector<8x8xbf16>, vector<8x8xf32> -> vector<8x8xf32>
    %121 = arith.truncf %120 : vector<8x8xf32> to vector<8x8xbf16>
    %122 = vector.extract_strided_slice %19 {offsets = [24, 0], sizes = [8, 32], strides = [1, 1]} : vector<32x32xbf16> to vector<8x32xbf16>
    %cst_34 = arith.constant dense<0.000000e+00> : vector<8x32xf32>
    %123 = tpu.matmul %121, %122, %cst_34 {dimension_numbers = #tpu.dot_dimension_numbers<[1], [0], [0], [1], [0, 0, 1, 1], [], []>} : vector<8x8xbf16>, vector<8x32xbf16>, vector<8x32xf32> -> vector<8x32xf32>
    %124 = arith.addf %98, %123 : vector<8x32xf32>
    %c0_35 = arith.constant 0 : index
    %c0_36 = arith.constant 0 : index
    %125 = vector.load %arg5[%c0_35, %c0_36] : memref<1x32xf32, #tpu.memory_space<vmem>>, vector<1x32xf32>
    %126 = vector.broadcast %125 : vector<1x32xf32> to vector<8x32xf32>
    %127 = arith.addf %124, %126 : vector<8x32xf32>
    %128 = arith.addf %1, %127 : vector<8x32xf32>
    %cst_37 = arith.constant dense<0.000000e+00> : vector<8xf32>
    %129 = vector.multi_reduction <add>, %128, %cst_37 [1] : vector<8x32xf32> to vector<8xf32>
    %130 = vector.shape_cast %129 : vector<8xf32> to vector<8x1xf32>
    %cst_38 = arith.constant 3.125000e-02 : f32
    %131 = vector.broadcast %cst_38 : f32 to vector<8x1xf32>
    %132 = arith.mulf %130, %131 : vector<8x1xf32>
    %133 = vector.broadcast %132 : vector<8x1xf32> to vector<8x32xf32>
    %134 = arith.subf %128, %133 : vector<8x32xf32>
    %135 = arith.mulf %134, %134 : vector<8x32xf32>
    %cst_39 = arith.constant dense<0.000000e+00> : vector<8xf32>
    %136 = vector.multi_reduction <add>, %135, %cst_39 [1] : vector<8x32xf32> to vector<8xf32>
    %137 = vector.shape_cast %136 : vector<8xf32> to vector<8x1xf32>
    %cst_40 = arith.constant 3.125000e-02 : f32
    %138 = vector.broadcast %cst_40 : f32 to vector<8x1xf32>
    %139 = arith.mulf %137, %138 : vector<8x1xf32>
    %cst_41 = arith.constant 9.99999974E-6 : f32
    %140 = vector.broadcast %cst_41 : f32 to vector<8x1xf32>
    %141 = arith.addf %139, %140 : vector<8x1xf32>
    %142 = math.rsqrt %141 : vector<8x1xf32>
    %143 = vector.broadcast %142 : vector<8x1xf32> to vector<8x32xf32>
    %144 = arith.mulf %134, %143 : vector<8x32xf32>
    %c0_42 = arith.constant 0 : index
    %c0_43 = arith.constant 0 : index
    %145 = vector.load %arg6[%c0_42, %c0_43] : memref<1x32xf32, #tpu.memory_space<vmem>>, vector<1x32xf32>
    %146 = vector.broadcast %145 : vector<1x32xf32> to vector<8x32xf32>
    %147 = arith.mulf %144, %146 : vector<8x32xf32>
    %c0_44 = arith.constant 0 : index
    %c0_45 = arith.constant 0 : index
    %148 = vector.load %arg7[%c0_44, %c0_45] : memref<1x32xf32, #tpu.memory_space<vmem>>, vector<1x32xf32>
    %149 = vector.broadcast %148 : vector<1x32xf32> to vector<8x32xf32>
    %150 = arith.addf %147, %149 : vector<8x32xf32>
    %c0_46 = arith.constant 0 : index
    %c0_47 = arith.constant 0 : index
    %c0_48 = arith.constant 0 : index
    %151 = vector.load %arg8[%c0_46, %c0_47, %c0_48] : memref<1x8x32xf32, #tpu.memory_space<vmem>>, vector<1x8x32xf32>
    %152 = vector.shape_cast %151 : vector<1x8x32xf32> to vector<8x32xf32>
    %153 = vector.shape_cast %150 : vector<8x32xf32> to vector<1x8x32xf32>
    tpu.vector_store %arg8[%c0_46, %c0_47, %c0_48], %153 {strides = array<i32>} : memref<1x8x32xf32, #tpu.memory_space<vmem>>, vector<1x8x32xf32>,
    return
  }
  func.func @transform_0(%arg0: i32) -> (i32, i32, i32) {
    %c0_i32 = arith.constant 0 : i32
    %c0_i32_0 = arith.constant 0 : i32
    %c0_i32_1 = arith.constant 0 : i32
    return %arg0, %c0_i32, %c0_i32_0 : i32, i32, i32
  }
  func.func @transform_1(%arg0: i32) -> (i32, i32) {
    %c0_i32 = arith.constant 0 : i32
    %c0_i32_0 = arith.constant 0 : i32
    %c0_i32_1 = arith.constant 0 : i32
    return %c0_i32, %c0_i32_0 : i32, i32
  }
  func.func @transform_2(%arg0: i32) -> (i32, i32) {
    %c0_i32 = arith.constant 0 : i32
    %c0_i32_0 = arith.constant 0 : i32
    %c0_i32_1 = arith.constant 0 : i32
    return %c0_i32, %c0_i32_0 : i32, i32
  }
  func.func @transform_3(%arg0: i32) -> (i32, i32) {
    %c0_i32 = arith.constant 0 : i32
    %c0_i32_0 = arith.constant 0 : i32
    %c0_i32_1 = arith.constant 0 : i32
    return %c0_i32, %c0_i32_0 : i32, i32
  }
  func.func @transform_4(%arg0: i32) -> (i32, i32) {
    %c0_i32 = arith.constant 0 : i32
    %c0_i32_0 = arith.constant 0 : i32
    %c0_i32_1 = arith.constant 0 : i32
    return %c0_i32, %c0_i32_0 : i32, i32
  }
  func.func @transform_5(%arg0: i32) -> (i32, i32) {
    %c0_i32 = arith.constant 0 : i32
    %c0_i32_0 = arith.constant 0 : i32
    %c0_i32_1 = arith.constant 0 : i32
    return %c0_i32, %c0_i32_0 : i32, i32
  }
  func.func @transform_6(%arg0: i32) -> (i32, i32) {
    %c0_i32 = arith.constant 0 : i32
    %c0_i32_0 = arith.constant 0 : i32
    %c0_i32_1 = arith.constant 0 : i32
    return %c0_i32, %c0_i32_0 : i32, i32
  }
  func.func @transform_7(%arg0: i32) -> (i32, i32, i32) {
    %c0_i32 = arith.constant 0 : i32
    %c0_i32_0 = arith.constant 0 : i32
    %c0_i32_1 = arith.constant 0 : i32
    return %arg0, %c0_i32, %c0_i32_0 : i32, i32, i32
  }
}

module attributes {stable_mosaic.version = 11 : i64} {
  func.func @_mha_block_kernel(%arg0: i32, %arg1: memref<1x8x32xf32, #tpu.memory_space<vmem>>, %arg2: memref<1x8x32xf32, #tpu.memory_space<vmem>>, %arg3: memref<32x96xf32, #tpu.memory_space<vmem>>, %arg4: memref<1x96xf32, #tpu.memory_space<vmem>>, %arg5: memref<32x32xf32, #tpu.memory_space<vmem>>, %arg6: memref<1x32xf32, #tpu.memory_space<vmem>>, %arg7: memref<1x32xf32, #tpu.memory_space<vmem>>, %arg8: memref<1x32xf32, #tpu.memory_space<vmem>>, %arg9: memref<1x8x32xf32, #tpu.memory_space<vmem>>) attributes {dimension_semantics = [#tpu.dimension_semantics<parallel>], iteration_bounds = array<i64: 2>, scalar_prefetch = 0 : i64, scratch_operands = 0 : i64, tpu.core_type = #tpu.core_type<tc>, window_params = [{transform_indices = @transform_0, window_bounds = array<i64: 1, 8, 32>}, {transform_indices = @transform_1, window_bounds = array<i64: 1, 8, 32>}, {pipeline_mode = #tpu.pipeline_mode<synchronous>, transform_indices = @transform_2, window_bounds = array<i64: 32, 96>}, {pipeline_mode = #tpu.pipeline_mode<synchronous>, transform_indices = @transform_3, window_bounds = array<i64: 1, 96>}, {pipeline_mode = #tpu.pipeline_mode<synchronous>, transform_indices = @transform_4, window_bounds = array<i64: 32, 32>}, {pipeline_mode = #tpu.pipeline_mode<synchronous>, transform_indices = @transform_5, window_bounds = array<i64: 1, 32>}, {pipeline_mode = #tpu.pipeline_mode<synchronous>, transform_indices = @transform_6, window_bounds = array<i64: 1, 32>}, {pipeline_mode = #tpu.pipeline_mode<synchronous>, transform_indices = @transform_7, window_bounds = array<i64: 1, 32>}, {transform_indices = @transform_8, window_bounds = array<i64: 1, 8, 32>}]} {
    %c0 = arith.constant 0 : index
    %c0_0 = arith.constant 0 : index
    %c0_1 = arith.constant 0 : index
    %0 = vector.load %arg1[%c0, %c0_0, %c0_1] : memref<1x8x32xf32, #tpu.memory_space<vmem>>, vector<1x8x32xf32>
    %1 = vector.shape_cast %0 : vector<1x8x32xf32> to vector<8x32xf32>
    %c0_2 = arith.constant 0 : index
    %c0_3 = arith.constant 0 : index
    %2 = vector.load %arg3[%c0_2, %c0_3] : memref<32x96xf32, #tpu.memory_space<vmem>>, vector<32x96xf32>
    %3 = arith.truncf %2 : vector<32x96xf32> to vector<32x96xbf16>
    %c0_4 = arith.constant 0 : index
    %c0_5 = arith.constant 0 : index
    %4 = vector.load %arg4[%c0_4, %c0_5] : memref<1x96xf32, #tpu.memory_space<vmem>>, vector<1x96xf32>
    %c0_6 = arith.constant 0 : index
    %c0_7 = arith.constant 0 : index
    %c0_8 = arith.constant 0 : index
    %5 = vector.load %arg2[%c0_6, %c0_7, %c0_8] : memref<1x8x32xf32, #tpu.memory_space<vmem>>, vector<1x8x32xf32>
    %6 = vector.shape_cast %5 : vector<1x8x32xf32> to vector<8x32xf32>
    %7 = arith.truncf %1 : vector<8x32xf32> to vector<8x32xbf16>
    %8 = vector.extract_strided_slice %3 {offsets = [0, 0], sizes = [32, 32], strides = [1, 1]} : vector<32x96xbf16> to vector<32x32xbf16>
    %cst = arith.constant dense<0.000000e+00> : vector<8x32xf32>
    %9 = tpu.matmul %7, %8, %cst {dimension_numbers = #tpu.dot_dimension_numbers<[1], [0], [0], [1], [0, 0, 1, 1], [], []>} : vector<8x32xbf16>, vector<32x32xbf16>, vector<8x32xf32> -> vector<8x32xf32>
    %10 = vector.extract_strided_slice %4 {offsets = [0, 0], sizes = [1, 32], strides = [1, 1]} : vector<1x96xf32> to vector<1x32xf32>
    %11 = vector.broadcast %10 : vector<1x32xf32> to vector<8x32xf32>
    %12 = arith.addf %9, %11 : vector<8x32xf32>
    %13 = arith.truncf %6 : vector<8x32xf32> to vector<8x32xbf16>
    %14 = vector.extract_strided_slice %3 {offsets = [0, 32], sizes = [32, 64], strides = [1, 1]} : vector<32x96xbf16> to vector<32x64xbf16>
    %cst_9 = arith.constant dense<0.000000e+00> : vector<8x64xf32>
    %15 = tpu.matmul %13, %14, %cst_9 {dimension_numbers = #tpu.dot_dimension_numbers<[1], [0], [0], [1], [0, 0, 1, 1], [], []>} : vector<8x32xbf16>, vector<32x64xbf16>, vector<8x64xf32> -> vector<8x64xf32>
    %16 = vector.extract_strided_slice %4 {offsets = [0, 32], sizes = [1, 64], strides = [1, 1]} : vector<1x96xf32> to vector<1x64xf32>
    %17 = vector.broadcast %16 : vector<1x64xf32> to vector<8x64xf32>
    %18 = arith.addf %15, %17 : vector<8x64xf32>
    %19 = vector.extract_strided_slice %18 {offsets = [0, 0], sizes = [8, 32], strides = [1, 1]} : vector<8x64xf32> to vector<8x32xf32>
    %20 = vector.extract_strided_slice %18 {offsets = [0, 32], sizes = [8, 32], strides = [1, 1]} : vector<8x64xf32> to vector<8x32xf32>
    %c0_10 = arith.constant 0 : index
    %c0_11 = arith.constant 0 : index
    %21 = vector.load %arg5[%c0_10, %c0_11] : memref<32x32xf32, #tpu.memory_space<vmem>>, vector<32x32xf32>
    %22 = arith.truncf %21 : vector<32x32xf32> to vector<32x32xbf16>
    %cst_12 = arith.constant 0.000000e+00 : f32
    %23 = vector.broadcast %cst_12 : f32 to vector<8x32xf32>
    %24 = vector.extract_strided_slice %12 {offsets = [0, 0], sizes = [8, 8], strides = [1, 1]} : vector<8x32xf32> to vector<8x8xf32>
    %cst_13 = arith.constant 0.353553385 : f32
    %25 = vector.broadcast %cst_13 : f32 to vector<8x8xf32>
    %26 = arith.mulf %24, %25 : vector<8x8xf32>
    %27 = arith.truncf %26 : vector<8x8xf32> to vector<8x8xbf16>
    %28 = vector.extract_strided_slice %19 {offsets = [0, 0], sizes = [8, 8], strides = [1, 1]} : vector<8x32xf32> to vector<8x8xf32>
    %29 = arith.truncf %28 : vector<8x8xf32> to vector<8x8xbf16>
    %30 = vector.extract_strided_slice %20 {offsets = [0, 0], sizes = [8, 8], strides = [1, 1]} : vector<8x32xf32> to vector<8x8xf32>
    %31 = arith.truncf %30 : vector<8x8xf32> to vector<8x8xbf16>
    %cst_14 = arith.constant dense<0.000000e+00> : vector<8x8xf32>
    %32 = tpu.matmul %27, %29, %cst_14 {dimension_numbers = #tpu.dot_dimension_numbers<[1], [1], [0], [0], [0, 0, 1, 0], [], []>} : vector<8x8xbf16>, vector<8x8xbf16>, vector<8x8xf32> -> vector<8x8xf32>
    %cst_15 = arith.constant dense<0xFF800000> : vector<8xf32>
    %33 = vector.multi_reduction <maximumf>, %32, %cst_15 [1] : vector<8x8xf32> to vector<8xf32>
    %34 = vector.shape_cast %33 : vector<8xf32> to vector<8x1xf32>
    %35 = vector.broadcast %34 : vector<8x1xf32> to vector<8x8xf32>
    %36 = arith.subf %32, %35 : vector<8x8xf32>
    %37 = math.exp %36 : vector<8x8xf32>
    %cst_16 = arith.constant dense<0.000000e+00> : vector<8xf32>
    %38 = vector.multi_reduction <add>, %37, %cst_16 [1] : vector<8x8xf32> to vector<8xf32>
    %39 = vector.shape_cast %38 : vector<8xf32> to vector<8x1xf32>
    %40 = tpu.reciprocal %39 {approx = true} : vector<8x1xf32> -> vector<8x1xf32>
    %41 = vector.broadcast %40 : vector<8x1xf32> to vector<8x8xf32>
    %42 = arith.mulf %37, %41 : vector<8x8xf32>
    %43 = arith.truncf %42 : vector<8x8xf32> to vector<8x8xbf16>
    %cst_17 = arith.constant dense<0.000000e+00> : vector<8x8xf32>
    %44 = tpu.matmul %43, %31, %cst_17 {dimension_numbers = #tpu.dot_dimension_numbers<[1], [0], [0], [1], [0, 0, 1, 1], [], []>} : vector<8x8xbf16>, vector<8x8xbf16>, vector<8x8xf32> -> vector<8x8xf32>
    %45 = arith.truncf %44 : vector<8x8xf32> to vector<8x8xbf16>
    %46 = vector.extract_strided_slice %22 {offsets = [0, 0], sizes = [8, 32], strides = [1, 1]} : vector<32x32xbf16> to vector<8x32xbf16>
    %cst_18 = arith.constant dense<0.000000e+00> : vector<8x32xf32>
    %47 = tpu.matmul %45, %46, %cst_18 {dimension_numbers = #tpu.dot_dimension_numbers<[1], [0], [0], [1], [0, 0, 1, 1], [], []>} : vector<8x8xbf16>, vector<8x32xbf16>, vector<8x32xf32> -> vector<8x32xf32>
    %48 = arith.addf %23, %47 : vector<8x32xf32>
    %49 = vector.extract_strided_slice %12 {offsets = [0, 8], sizes = [8, 8], strides = [1, 1]} : vector<8x32xf32> to vector<8x8xf32>
    %cst_19 = arith.constant 0.353553385 : f32
    %50 = vector.broadcast %cst_19 : f32 to vector<8x8xf32>
    %51 = arith.mulf %49, %50 : vector<8x8xf32>
    %52 = arith.truncf %51 : vector<8x8xf32> to vector<8x8xbf16>
    %53 = vector.extract_strided_slice %19 {offsets = [0, 8], sizes = [8, 8], strides = [1, 1]} : vector<8x32xf32> to vector<8x8xf32>
    %54 = arith.truncf %53 : vector<8x8xf32> to vector<8x8xbf16>
    %55 = vector.extract_strided_slice %20 {offsets = [0, 8], sizes = [8, 8], strides = [1, 1]} : vector<8x32xf32> to vector<8x8xf32>
    %56 = arith.truncf %55 : vector<8x8xf32> to vector<8x8xbf16>
    %cst_20 = arith.constant dense<0.000000e+00> : vector<8x8xf32>
    %57 = tpu.matmul %52, %54, %cst_20 {dimension_numbers = #tpu.dot_dimension_numbers<[1], [1], [0], [0], [0, 0, 1, 0], [], []>} : vector<8x8xbf16>, vector<8x8xbf16>, vector<8x8xf32> -> vector<8x8xf32>
    %cst_21 = arith.constant dense<0xFF800000> : vector<8xf32>
    %58 = vector.multi_reduction <maximumf>, %57, %cst_21 [1] : vector<8x8xf32> to vector<8xf32>
    %59 = vector.shape_cast %58 : vector<8xf32> to vector<8x1xf32>
    %60 = vector.broadcast %59 : vector<8x1xf32> to vector<8x8xf32>
    %61 = arith.subf %57, %60 : vector<8x8xf32>
    %62 = math.exp %61 : vector<8x8xf32>
    %cst_22 = arith.constant dense<0.000000e+00> : vector<8xf32>
    %63 = vector.multi_reduction <add>, %62, %cst_22 [1] : vector<8x8xf32> to vector<8xf32>
    %64 = vector.shape_cast %63 : vector<8xf32> to vector<8x1xf32>
    %65 = tpu.reciprocal %64 {approx = true} : vector<8x1xf32> -> vector<8x1xf32>
    %66 = vector.broadcast %65 : vector<8x1xf32> to vector<8x8xf32>
    %67 = arith.mulf %62, %66 : vector<8x8xf32>
    %68 = arith.truncf %67 : vector<8x8xf32> to vector<8x8xbf16>
    %cst_23 = arith.constant dense<0.000000e+00> : vector<8x8xf32>
    %69 = tpu.matmul %68, %56, %cst_23 {dimension_numbers = #tpu.dot_dimension_numbers<[1], [0], [0], [1], [0, 0, 1, 1], [], []>} : vector<8x8xbf16>, vector<8x8xbf16>, vector<8x8xf32> -> vector<8x8xf32>
    %70 = arith.truncf %69 : vector<8x8xf32> to vector<8x8xbf16>
    %71 = vector.extract_strided_slice %22 {offsets = [8, 0], sizes = [8, 32], strides = [1, 1]} : vector<32x32xbf16> to vector<8x32xbf16>
    %cst_24 = arith.constant dense<0.000000e+00> : vector<8x32xf32>
    %72 = tpu.matmul %70, %71, %cst_24 {dimension_numbers = #tpu.dot_dimension_numbers<[1], [0], [0], [1], [0, 0, 1, 1], [], []>} : vector<8x8xbf16>, vector<8x32xbf16>, vector<8x32xf32> -> vector<8x32xf32>
    %73 = arith.addf %48, %72 : vector<8x32xf32>
    %74 = vector.extract_strided_slice %12 {offsets = [0, 16], sizes = [8, 8], strides = [1, 1]} : vector<8x32xf32> to vector<8x8xf32>
    %cst_25 = arith.constant 0.353553385 : f32
    %75 = vector.broadcast %cst_25 : f32 to vector<8x8xf32>
    %76 = arith.mulf %74, %75 : vector<8x8xf32>
    %77 = arith.truncf %76 : vector<8x8xf32> to vector<8x8xbf16>
    %78 = vector.extract_strided_slice %19 {offsets = [0, 16], sizes = [8, 8], strides = [1, 1]} : vector<8x32xf32> to vector<8x8xf32>
    %79 = arith.truncf %78 : vector<8x8xf32> to vector<8x8xbf16>
    %80 = vector.extract_strided_slice %20 {offsets = [0, 16], sizes = [8, 8], strides = [1, 1]} : vector<8x32xf32> to vector<8x8xf32>
    %81 = arith.truncf %80 : vector<8x8xf32> to vector<8x8xbf16>
    %cst_26 = arith.constant dense<0.000000e+00> : vector<8x8xf32>
    %82 = tpu.matmul %77, %79, %cst_26 {dimension_numbers = #tpu.dot_dimension_numbers<[1], [1], [0], [0], [0, 0, 1, 0], [], []>} : vector<8x8xbf16>, vector<8x8xbf16>, vector<8x8xf32> -> vector<8x8xf32>
    %cst_27 = arith.constant dense<0xFF800000> : vector<8xf32>
    %83 = vector.multi_reduction <maximumf>, %82, %cst_27 [1] : vector<8x8xf32> to vector<8xf32>
    %84 = vector.shape_cast %83 : vector<8xf32> to vector<8x1xf32>
    %85 = vector.broadcast %84 : vector<8x1xf32> to vector<8x8xf32>
    %86 = arith.subf %82, %85 : vector<8x8xf32>
    %87 = math.exp %86 : vector<8x8xf32>
    %cst_28 = arith.constant dense<0.000000e+00> : vector<8xf32>
    %88 = vector.multi_reduction <add>, %87, %cst_28 [1] : vector<8x8xf32> to vector<8xf32>
    %89 = vector.shape_cast %88 : vector<8xf32> to vector<8x1xf32>
    %90 = tpu.reciprocal %89 {approx = true} : vector<8x1xf32> -> vector<8x1xf32>
    %91 = vector.broadcast %90 : vector<8x1xf32> to vector<8x8xf32>
    %92 = arith.mulf %87, %91 : vector<8x8xf32>
    %93 = arith.truncf %92 : vector<8x8xf32> to vector<8x8xbf16>
    %cst_29 = arith.constant dense<0.000000e+00> : vector<8x8xf32>
    %94 = tpu.matmul %93, %81, %cst_29 {dimension_numbers = #tpu.dot_dimension_numbers<[1], [0], [0], [1], [0, 0, 1, 1], [], []>} : vector<8x8xbf16>, vector<8x8xbf16>, vector<8x8xf32> -> vector<8x8xf32>
    %95 = arith.truncf %94 : vector<8x8xf32> to vector<8x8xbf16>
    %96 = vector.extract_strided_slice %22 {offsets = [16, 0], sizes = [8, 32], strides = [1, 1]} : vector<32x32xbf16> to vector<8x32xbf16>
    %cst_30 = arith.constant dense<0.000000e+00> : vector<8x32xf32>
    %97 = tpu.matmul %95, %96, %cst_30 {dimension_numbers = #tpu.dot_dimension_numbers<[1], [0], [0], [1], [0, 0, 1, 1], [], []>} : vector<8x8xbf16>, vector<8x32xbf16>, vector<8x32xf32> -> vector<8x32xf32>
    %98 = arith.addf %73, %97 : vector<8x32xf32>
    %99 = vector.extract_strided_slice %12 {offsets = [0, 24], sizes = [8, 8], strides = [1, 1]} : vector<8x32xf32> to vector<8x8xf32>
    %cst_31 = arith.constant 0.353553385 : f32
    %100 = vector.broadcast %cst_31 : f32 to vector<8x8xf32>
    %101 = arith.mulf %99, %100 : vector<8x8xf32>
    %102 = arith.truncf %101 : vector<8x8xf32> to vector<8x8xbf16>
    %103 = vector.extract_strided_slice %19 {offsets = [0, 24], sizes = [8, 8], strides = [1, 1]} : vector<8x32xf32> to vector<8x8xf32>
    %104 = arith.truncf %103 : vector<8x8xf32> to vector<8x8xbf16>
    %105 = vector.extract_strided_slice %20 {offsets = [0, 24], sizes = [8, 8], strides = [1, 1]} : vector<8x32xf32> to vector<8x8xf32>
    %106 = arith.truncf %105 : vector<8x8xf32> to vector<8x8xbf16>
    %cst_32 = arith.constant dense<0.000000e+00> : vector<8x8xf32>
    %107 = tpu.matmul %102, %104, %cst_32 {dimension_numbers = #tpu.dot_dimension_numbers<[1], [1], [0], [0], [0, 0, 1, 0], [], []>} : vector<8x8xbf16>, vector<8x8xbf16>, vector<8x8xf32> -> vector<8x8xf32>
    %cst_33 = arith.constant dense<0xFF800000> : vector<8xf32>
    %108 = vector.multi_reduction <maximumf>, %107, %cst_33 [1] : vector<8x8xf32> to vector<8xf32>
    %109 = vector.shape_cast %108 : vector<8xf32> to vector<8x1xf32>
    %110 = vector.broadcast %109 : vector<8x1xf32> to vector<8x8xf32>
    %111 = arith.subf %107, %110 : vector<8x8xf32>
    %112 = math.exp %111 : vector<8x8xf32>
    %cst_34 = arith.constant dense<0.000000e+00> : vector<8xf32>
    %113 = vector.multi_reduction <add>, %112, %cst_34 [1] : vector<8x8xf32> to vector<8xf32>
    %114 = vector.shape_cast %113 : vector<8xf32> to vector<8x1xf32>
    %115 = tpu.reciprocal %114 {approx = true} : vector<8x1xf32> -> vector<8x1xf32>
    %116 = vector.broadcast %115 : vector<8x1xf32> to vector<8x8xf32>
    %117 = arith.mulf %112, %116 : vector<8x8xf32>
    %118 = arith.truncf %117 : vector<8x8xf32> to vector<8x8xbf16>
    %cst_35 = arith.constant dense<0.000000e+00> : vector<8x8xf32>
    %119 = tpu.matmul %118, %106, %cst_35 {dimension_numbers = #tpu.dot_dimension_numbers<[1], [0], [0], [1], [0, 0, 1, 1], [], []>} : vector<8x8xbf16>, vector<8x8xbf16>, vector<8x8xf32> -> vector<8x8xf32>
    %120 = arith.truncf %119 : vector<8x8xf32> to vector<8x8xbf16>
    %121 = vector.extract_strided_slice %22 {offsets = [24, 0], sizes = [8, 32], strides = [1, 1]} : vector<32x32xbf16> to vector<8x32xbf16>
    %cst_36 = arith.constant dense<0.000000e+00> : vector<8x32xf32>
    %122 = tpu.matmul %120, %121, %cst_36 {dimension_numbers = #tpu.dot_dimension_numbers<[1], [0], [0], [1], [0, 0, 1, 1], [], []>} : vector<8x8xbf16>, vector<8x32xbf16>, vector<8x32xf32> -> vector<8x32xf32>
    %123 = arith.addf %98, %122 : vector<8x32xf32>
    %c0_37 = arith.constant 0 : index
    %c0_38 = arith.constant 0 : index
    %124 = vector.load %arg6[%c0_37, %c0_38] : memref<1x32xf32, #tpu.memory_space<vmem>>, vector<1x32xf32>
    %125 = vector.broadcast %124 : vector<1x32xf32> to vector<8x32xf32>
    %126 = arith.addf %123, %125 : vector<8x32xf32>
    %127 = arith.addf %1, %126 : vector<8x32xf32>
    %cst_39 = arith.constant dense<0.000000e+00> : vector<8xf32>
    %128 = vector.multi_reduction <add>, %127, %cst_39 [1] : vector<8x32xf32> to vector<8xf32>
    %129 = vector.shape_cast %128 : vector<8xf32> to vector<8x1xf32>
    %cst_40 = arith.constant 3.125000e-02 : f32
    %130 = vector.broadcast %cst_40 : f32 to vector<8x1xf32>
    %131 = arith.mulf %129, %130 : vector<8x1xf32>
    %132 = vector.broadcast %131 : vector<8x1xf32> to vector<8x32xf32>
    %133 = arith.subf %127, %132 : vector<8x32xf32>
    %134 = arith.mulf %133, %133 : vector<8x32xf32>
    %cst_41 = arith.constant dense<0.000000e+00> : vector<8xf32>
    %135 = vector.multi_reduction <add>, %134, %cst_41 [1] : vector<8x32xf32> to vector<8xf32>
    %136 = vector.shape_cast %135 : vector<8xf32> to vector<8x1xf32>
    %cst_42 = arith.constant 3.125000e-02 : f32
    %137 = vector.broadcast %cst_42 : f32 to vector<8x1xf32>
    %138 = arith.mulf %136, %137 : vector<8x1xf32>
    %cst_43 = arith.constant 9.99999974E-6 : f32
    %139 = vector.broadcast %cst_43 : f32 to vector<8x1xf32>
    %140 = arith.addf %138, %139 : vector<8x1xf32>
    %141 = math.rsqrt %140 : vector<8x1xf32>
    %142 = vector.broadcast %141 : vector<8x1xf32> to vector<8x32xf32>
    %143 = arith.mulf %133, %142 : vector<8x32xf32>
    %c0_44 = arith.constant 0 : index
    %c0_45 = arith.constant 0 : index
    %144 = vector.load %arg7[%c0_44, %c0_45] : memref<1x32xf32, #tpu.memory_space<vmem>>, vector<1x32xf32>
    %145 = vector.broadcast %144 : vector<1x32xf32> to vector<8x32xf32>
    %146 = arith.mulf %143, %145 : vector<8x32xf32>
    %c0_46 = arith.constant 0 : index
    %c0_47 = arith.constant 0 : index
    %147 = vector.load %arg8[%c0_46, %c0_47] : memref<1x32xf32, #tpu.memory_space<vmem>>, vector<1x32xf32>
    %148 = vector.broadcast %147 : vector<1x32xf32> to vector<8x32xf32>
    %149 = arith.addf %146, %148 : vector<8x32xf32>
    %c0_48 = arith.constant 0 : index
    %c0_49 = arith.constant 0 : index
    %c0_50 = arith.constant 0 : index
    %150 = vector.load %arg9[%c0_48, %c0_49, %c0_50] : memref<1x8x32xf32, #tpu.memory_space<vmem>>, vector<1x8x32xf32>
    %151 = vector.shape_cast %150 : vector<1x8x32xf32> to vector<8x32xf32>
    %152 = vector.shape_cast %149 : vector<8x32xf32> to vector<1x8x32xf32>
    tpu.vector_store %arg9[%c0_48, %c0_49, %c0_50], %152 {strides = array<i32>} : memref<1x8x32xf32, #tpu.memory_space<vmem>>, vector<1x8x32xf32>,
    return
  }
  func.func @transform_0(%arg0: i32) -> (i32, i32, i32) {
    %c0_i32 = arith.constant 0 : i32
    %c0_i32_0 = arith.constant 0 : i32
    %c0_i32_1 = arith.constant 0 : i32
    return %arg0, %c0_i32, %c0_i32_0 : i32, i32, i32
  }
  func.func @transform_1(%arg0: i32) -> (i32, i32, i32) {
    %c0_i32 = arith.constant 0 : i32
    %c0_i32_0 = arith.constant 0 : i32
    %c0_i32_1 = arith.constant 0 : i32
    return %arg0, %c0_i32, %c0_i32_0 : i32, i32, i32
  }
  func.func @transform_2(%arg0: i32) -> (i32, i32) {
    %c0_i32 = arith.constant 0 : i32
    %c0_i32_0 = arith.constant 0 : i32
    %c0_i32_1 = arith.constant 0 : i32
    return %c0_i32, %c0_i32_0 : i32, i32
  }
  func.func @transform_3(%arg0: i32) -> (i32, i32) {
    %c0_i32 = arith.constant 0 : i32
    %c0_i32_0 = arith.constant 0 : i32
    %c0_i32_1 = arith.constant 0 : i32
    return %c0_i32, %c0_i32_0 : i32, i32
  }
  func.func @transform_4(%arg0: i32) -> (i32, i32) {
    %c0_i32 = arith.constant 0 : i32
    %c0_i32_0 = arith.constant 0 : i32
    %c0_i32_1 = arith.constant 0 : i32
    return %c0_i32, %c0_i32_0 : i32, i32
  }
  func.func @transform_5(%arg0: i32) -> (i32, i32) {
    %c0_i32 = arith.constant 0 : i32
    %c0_i32_0 = arith.constant 0 : i32
    %c0_i32_1 = arith.constant 0 : i32
    return %c0_i32, %c0_i32_0 : i32, i32
  }
  func.func @transform_6(%arg0: i32) -> (i32, i32) {
    %c0_i32 = arith.constant 0 : i32
    %c0_i32_0 = arith.constant 0 : i32
    %c0_i32_1 = arith.constant 0 : i32
    return %c0_i32, %c0_i32_0 : i32, i32
  }
  func.func @transform_7(%arg0: i32) -> (i32, i32) {
    %c0_i32 = arith.constant 0 : i32
    %c0_i32_0 = arith.constant 0 : i32
    %c0_i32_1 = arith.constant 0 : i32
    return %c0_i32, %c0_i32_0 : i32, i32
  }
  func.func @transform_8(%arg0: i32) -> (i32, i32, i32) {
    %c0_i32 = arith.constant 0 : i32
    %c0_i32_0 = arith.constant 0 : i32
    %c0_i32_1 = arith.constant 0 : i32
    return %arg0, %c0_i32, %c0_i32_0 : i32, i32, i32
  }
}

module attributes {stable_mosaic.version = 11 : i64} {
  func.func @_layernorm_kernel(%arg0: i32, %arg1: memref<8x32xf32, #tpu.memory_space<vmem>>, %arg2: memref<1x32xf32, #tpu.memory_space<vmem>>, %arg3: memref<1x32xf32, #tpu.memory_space<vmem>>, %arg4: memref<8x32xf32, #tpu.memory_space<vmem>>) attributes {dimension_semantics = [#tpu.dimension_semantics<parallel>], iteration_bounds = array<i64: 2>, scalar_prefetch = 0 : i64, scratch_operands = 0 : i64, tpu.core_type = #tpu.core_type<tc>, window_params = [{transform_indices = @transform_0, window_bounds = array<i64: 8, 32>}, {pipeline_mode = #tpu.pipeline_mode<synchronous>, transform_indices = @transform_1, window_bounds = array<i64: 1, 32>}, {pipeline_mode = #tpu.pipeline_mode<synchronous>, transform_indices = @transform_2, window_bounds = array<i64: 1, 32>}, {transform_indices = @transform_3, window_bounds = array<i64: 8, 32>}]} {
    %c0 = arith.constant 0 : index
    %c0_0 = arith.constant 0 : index
    %0 = vector.load %arg1[%c0, %c0_0] : memref<8x32xf32, #tpu.memory_space<vmem>>, vector<8x32xf32>
    %cst = arith.constant dense<0.000000e+00> : vector<8xf32>
    %1 = vector.multi_reduction <add>, %0, %cst [1] : vector<8x32xf32> to vector<8xf32>
    %2 = vector.shape_cast %1 : vector<8xf32> to vector<8x1xf32>
    %cst_1 = arith.constant 3.125000e-02 : f32
    %3 = vector.broadcast %cst_1 : f32 to vector<8x1xf32>
    %4 = arith.mulf %2, %3 : vector<8x1xf32>
    %5 = vector.broadcast %4 : vector<8x1xf32> to vector<8x32xf32>
    %6 = arith.subf %0, %5 : vector<8x32xf32>
    %7 = arith.mulf %6, %6 : vector<8x32xf32>
    %cst_2 = arith.constant dense<0.000000e+00> : vector<8xf32>
    %8 = vector.multi_reduction <add>, %7, %cst_2 [1] : vector<8x32xf32> to vector<8xf32>
    %9 = vector.shape_cast %8 : vector<8xf32> to vector<8x1xf32>
    %cst_3 = arith.constant 3.125000e-02 : f32
    %10 = vector.broadcast %cst_3 : f32 to vector<8x1xf32>
    %11 = arith.mulf %9, %10 : vector<8x1xf32>
    %cst_4 = arith.constant 9.99999974E-6 : f32
    %12 = vector.broadcast %cst_4 : f32 to vector<8x1xf32>
    %13 = arith.addf %11, %12 : vector<8x1xf32>
    %14 = math.rsqrt %13 : vector<8x1xf32>
    %15 = vector.broadcast %14 : vector<8x1xf32> to vector<8x32xf32>
    %16 = arith.mulf %6, %15 : vector<8x32xf32>
    %c0_5 = arith.constant 0 : index
    %c0_6 = arith.constant 0 : index
    %17 = vector.load %arg2[%c0_5, %c0_6] : memref<1x32xf32, #tpu.memory_space<vmem>>, vector<1x32xf32>
    %18 = vector.broadcast %17 : vector<1x32xf32> to vector<8x32xf32>
    %19 = arith.mulf %16, %18 : vector<8x32xf32>
    %c0_7 = arith.constant 0 : index
    %c0_8 = arith.constant 0 : index
    %20 = vector.load %arg3[%c0_7, %c0_8] : memref<1x32xf32, #tpu.memory_space<vmem>>, vector<1x32xf32>
    %21 = vector.broadcast %20 : vector<1x32xf32> to vector<8x32xf32>
    %22 = arith.addf %19, %21 : vector<8x32xf32>
    %c0_9 = arith.constant 0 : index
    %c0_10 = arith.constant 0 : index
    %23 = vector.load %arg4[%c0_9, %c0_10] : memref<8x32xf32, #tpu.memory_space<vmem>>, vector<8x32xf32>
    tpu.vector_store %arg4[%c0_9, %c0_10], %22 {strides = array<i32>} : memref<8x32xf32, #tpu.memory_space<vmem>>, vector<8x32xf32>,
    return
  }
  func.func @transform_0(%arg0: i32) -> (i32, i32) {
    %c0_i32 = arith.constant 0 : i32
    %c0_i32_0 = arith.constant 0 : i32
    return %arg0, %c0_i32 : i32, i32
  }
  func.func @transform_1(%arg0: i32) -> (i32, i32) {
    %c0_i32 = arith.constant 0 : i32
    %c0_i32_0 = arith.constant 0 : i32
    %c0_i32_1 = arith.constant 0 : i32
    return %c0_i32, %c0_i32_0 : i32, i32
  }
  func.func @transform_2(%arg0: i32) -> (i32, i32) {
    %c0_i32 = arith.constant 0 : i32
    %c0_i32_0 = arith.constant 0 : i32
    %c0_i32_1 = arith.constant 0 : i32
    return %c0_i32, %c0_i32_0 : i32, i32
  }
  func.func @transform_3(%arg0: i32) -> (i32, i32) {
    %c0_i32 = arith.constant 0 : i32
    %c0_i32_0 = arith.constant 0 : i32
    return %arg0, %c0_i32 : i32, i32
  }
}

module attributes {stable_mosaic.version = 11 : i64} {
  func.func @_ffn_block_kernel(%arg0: i32, %arg1: memref<8x32xf32, #tpu.memory_space<vmem>>, %arg2: memref<32x64xf32, #tpu.memory_space<vmem>>, %arg3: memref<1x64xf32, #tpu.memory_space<vmem>>, %arg4: memref<64x32xf32, #tpu.memory_space<vmem>>, %arg5: memref<1x32xf32, #tpu.memory_space<vmem>>, %arg6: memref<1x32xf32, #tpu.memory_space<vmem>>, %arg7: memref<1x32xf32, #tpu.memory_space<vmem>>, %arg8: memref<8x32xf32, #tpu.memory_space<vmem>>) attributes {dimension_semantics = [#tpu.dimension_semantics<parallel>], iteration_bounds = array<i64: 2>, scalar_prefetch = 0 : i64, scratch_operands = 0 : i64, tpu.core_type = #tpu.core_type<tc>, window_params = [{transform_indices = @transform_0, window_bounds = array<i64: 8, 32>}, {pipeline_mode = #tpu.pipeline_mode<synchronous>, transform_indices = @transform_1, window_bounds = array<i64: 32, 64>}, {pipeline_mode = #tpu.pipeline_mode<synchronous>, transform_indices = @transform_2, window_bounds = array<i64: 1, 64>}, {pipeline_mode = #tpu.pipeline_mode<synchronous>, transform_indices = @transform_3, window_bounds = array<i64: 64, 32>}, {pipeline_mode = #tpu.pipeline_mode<synchronous>, transform_indices = @transform_4, window_bounds = array<i64: 1, 32>}, {pipeline_mode = #tpu.pipeline_mode<synchronous>, transform_indices = @transform_5, window_bounds = array<i64: 1, 32>}, {pipeline_mode = #tpu.pipeline_mode<synchronous>, transform_indices = @transform_6, window_bounds = array<i64: 1, 32>}, {transform_indices = @transform_7, window_bounds = array<i64: 8, 32>}]} {
    %c0 = arith.constant 0 : index
    %c0_0 = arith.constant 0 : index
    %0 = vector.load %arg1[%c0, %c0_0] : memref<8x32xf32, #tpu.memory_space<vmem>>, vector<8x32xf32>
    %1 = arith.truncf %0 : vector<8x32xf32> to vector<8x32xbf16>
    %c0_1 = arith.constant 0 : index
    %c0_2 = arith.constant 0 : index
    %2 = vector.load %arg2[%c0_1, %c0_2] : memref<32x64xf32, #tpu.memory_space<vmem>>, vector<32x64xf32>
    %3 = arith.truncf %2 : vector<32x64xf32> to vector<32x64xbf16>
    %cst = arith.constant dense<0.000000e+00> : vector<8x64xf32>
    %4 = tpu.matmul %1, %3, %cst {dimension_numbers = #tpu.dot_dimension_numbers<[1], [0], [0], [1], [0, 0, 1, 1], [], []>} : vector<8x32xbf16>, vector<32x64xbf16>, vector<8x64xf32> -> vector<8x64xf32>
    %c0_3 = arith.constant 0 : index
    %c0_4 = arith.constant 0 : index
    %5 = vector.load %arg3[%c0_3, %c0_4] : memref<1x64xf32, #tpu.memory_space<vmem>>, vector<1x64xf32>
    %6 = vector.broadcast %5 : vector<1x64xf32> to vector<8x64xf32>
    %7 = arith.addf %4, %6 : vector<8x64xf32>
    %cst_5 = arith.constant 0.000000e+00 : f32
    %8 = vector.broadcast %cst_5 : f32 to vector<8x64xf32>
    %9 = arith.maximumf %7, %8 : vector<8x64xf32>
    %10 = arith.truncf %9 : vector<8x64xf32> to vector<8x64xbf16>
    %c0_6 = arith.constant 0 : index
    %c0_7 = arith.constant 0 : index
    %11 = vector.load %arg4[%c0_6, %c0_7] : memref<64x32xf32, #tpu.memory_space<vmem>>, vector<64x32xf32>
    %12 = arith.truncf %11 : vector<64x32xf32> to vector<64x32xbf16>
    %cst_8 = arith.constant dense<0.000000e+00> : vector<8x32xf32>
    %13 = tpu.matmul %10, %12, %cst_8 {dimension_numbers = #tpu.dot_dimension_numbers<[1], [0], [0], [1], [0, 0, 1, 1], [], []>} : vector<8x64xbf16>, vector<64x32xbf16>, vector<8x32xf32> -> vector<8x32xf32>
    %c0_9 = arith.constant 0 : index
    %c0_10 = arith.constant 0 : index
    %14 = vector.load %arg5[%c0_9, %c0_10] : memref<1x32xf32, #tpu.memory_space<vmem>>, vector<1x32xf32>
    %15 = vector.broadcast %14 : vector<1x32xf32> to vector<8x32xf32>
    %16 = arith.addf %13, %15 : vector<8x32xf32>
    %17 = arith.addf %0, %16 : vector<8x32xf32>
    %cst_11 = arith.constant dense<0.000000e+00> : vector<8xf32>
    %18 = vector.multi_reduction <add>, %17, %cst_11 [1] : vector<8x32xf32> to vector<8xf32>
    %19 = vector.shape_cast %18 : vector<8xf32> to vector<8x1xf32>
    %cst_12 = arith.constant 3.125000e-02 : f32
    %20 = vector.broadcast %cst_12 : f32 to vector<8x1xf32>
    %21 = arith.mulf %19, %20 : vector<8x1xf32>
    %22 = vector.broadcast %21 : vector<8x1xf32> to vector<8x32xf32>
    %23 = arith.subf %17, %22 : vector<8x32xf32>
    %24 = arith.mulf %23, %23 : vector<8x32xf32>
    %cst_13 = arith.constant dense<0.000000e+00> : vector<8xf32>
    %25 = vector.multi_reduction <add>, %24, %cst_13 [1] : vector<8x32xf32> to vector<8xf32>
    %26 = vector.shape_cast %25 : vector<8xf32> to vector<8x1xf32>
    %cst_14 = arith.constant 3.125000e-02 : f32
    %27 = vector.broadcast %cst_14 : f32 to vector<8x1xf32>
    %28 = arith.mulf %26, %27 : vector<8x1xf32>
    %cst_15 = arith.constant 9.99999974E-6 : f32
    %29 = vector.broadcast %cst_15 : f32 to vector<8x1xf32>
    %30 = arith.addf %28, %29 : vector<8x1xf32>
    %31 = math.rsqrt %30 : vector<8x1xf32>
    %32 = vector.broadcast %31 : vector<8x1xf32> to vector<8x32xf32>
    %33 = arith.mulf %23, %32 : vector<8x32xf32>
    %c0_16 = arith.constant 0 : index
    %c0_17 = arith.constant 0 : index
    %34 = vector.load %arg6[%c0_16, %c0_17] : memref<1x32xf32, #tpu.memory_space<vmem>>, vector<1x32xf32>
    %35 = vector.broadcast %34 : vector<1x32xf32> to vector<8x32xf32>
    %36 = arith.mulf %33, %35 : vector<8x32xf32>
    %c0_18 = arith.constant 0 : index
    %c0_19 = arith.constant 0 : index
    %37 = vector.load %arg7[%c0_18, %c0_19] : memref<1x32xf32, #tpu.memory_space<vmem>>, vector<1x32xf32>
    %38 = vector.broadcast %37 : vector<1x32xf32> to vector<8x32xf32>
    %39 = arith.addf %36, %38 : vector<8x32xf32>
    %c0_20 = arith.constant 0 : index
    %c0_21 = arith.constant 0 : index
    %40 = vector.load %arg8[%c0_20, %c0_21] : memref<8x32xf32, #tpu.memory_space<vmem>>, vector<8x32xf32>
    tpu.vector_store %arg8[%c0_20, %c0_21], %39 {strides = array<i32>} : memref<8x32xf32, #tpu.memory_space<vmem>>, vector<8x32xf32>,
    return
  }
  func.func @transform_0(%arg0: i32) -> (i32, i32) {
    %c0_i32 = arith.constant 0 : i32
    %c0_i32_0 = arith.constant 0 : i32
    return %arg0, %c0_i32 : i32, i32
  }
  func.func @transform_1(%arg0: i32) -> (i32, i32) {
    %c0_i32 = arith.constant 0 : i32
    %c0_i32_0 = arith.constant 0 : i32
    %c0_i32_1 = arith.constant 0 : i32
    return %c0_i32, %c0_i32_0 : i32, i32
  }
  func.func @transform_2(%arg0: i32) -> (i32, i32) {
    %c0_i32 = arith.constant 0 : i32
    %c0_i32_0 = arith.constant 0 : i32
    %c0_i32_1 = arith.constant 0 : i32
    return %c0_i32, %c0_i32_0 : i32, i32
  }
  func.func @transform_3(%arg0: i32) -> (i32, i32) {
    %c0_i32 = arith.constant 0 : i32
    %c0_i32_0 = arith.constant 0 : i32
    %c0_i32_1 = arith.constant 0 : i32
    return %c0_i32, %c0_i32_0 : i32, i32
  }
  func.func @transform_4(%arg0: i32) -> (i32, i32) {
    %c0_i32 = arith.constant 0 : i32
    %c0_i32_0 = arith.constant 0 : i32
    %c0_i32_1 = arith.constant 0 : i32
    return %c0_i32, %c0_i32_0 : i32, i32
  }
  func.func @transform_5(%arg0: i32) -> (i32, i32) {
    %c0_i32 = arith.constant 0 : i32
    %c0_i32_0 = arith.constant 0 : i32
    %c0_i32_1 = arith.constant 0 : i32
    return %c0_i32, %c0_i32_0 : i32, i32
  }
  func.func @transform_6(%arg0: i32) -> (i32, i32) {
    %c0_i32 = arith.constant 0 : i32
    %c0_i32_0 = arith.constant 0 : i32
    %c0_i32_1 = arith.constant 0 : i32
    return %c0_i32, %c0_i32_0 : i32, i32
  }
  func.func @transform_7(%arg0: i32) -> (i32, i32) {
    %c0_i32 = arith.constant 0 : i32
    %c0_i32_0 = arith.constant 0 : i32
    return %arg0, %c0_i32 : i32, i32
  }
}

</mosaic_0001>

<bundles_post_ra>
// kernel: causal_decoder.9
= control target key start
LH: loop header
LB: loop body
LE: loop exit
PB: predicated region body
PF: predicated region fallthrough
CT: control target
= control target key end

     0   :  { %12 = vsyncpa [#allocation3], 0  ;;  %s899_s0 = inlined_call_operand.vmem [shape: f32[16,32], index: 0, kind: input, shape index: {}]   ;;  %s900_s1 = inlined_call_operand.vmem [shape: f32[32,64], index: 1, kind: input, shape index: {}]   ;;  %s901_s2 = inlined_call_operand.hbm [shape: f32[1,64], index: 2, kind: input, shape index: {}]   ;;  %s902_s3 = inlined_call_operand.vmem [shape: f32[64,32], index: 3, kind: input, shape index: {}]   ;;  %s903_s4 = inlined_call_operand.hbm [shape: f32[1,32], index: 4, kind: input, shape index: {}]   ;;  %s904_s5 = inlined_call_operand.hbm [shape: f32[1,32], index: 5, kind: input, shape index: {}]   ;;  %s905_s6 = inlined_call_operand.hbm [shape: f32[1,32], index: 6, kind: input, shape index: {}]   ;;  %s906_s7 = inlined_call_operand.vmem [shape: f32[16,32], index: 7, kind: output, shape index: {}]  }
   0x1   :  { %13 = vsyncpa [#allocation5], 0 }
   0x2   :  { %14 = vsyncpa [#allocation8], 0  ;;  %s784_s24 = smov 0  }
   0x3 LB: > { %s233_s27 = sshll.u32 %s903_s4, 4  ;;  %s793_s28 = sadd.s32 4294967295, %s738_s24   ;;  %s738_s24 = sphi %s784_s24, %s20_s24   ;;  %s234_s27 = int_to_ptr.hbm [resolvable:$true] %s233_s27 }
   0x4   : > { %p528_p0 = scmp.ge.s32.totalorder %s738_s24, 1  ;;  %p203_p1 = scmp.lt.s32.totalorder %s738_s24, 3 }
   0x5   : > { %p574_p2 = scmp.eq.s32.totalorder %s793_s28, 0  ;;  %s740_s30 = smov [#allocation4]  }
   0x6   : > { %p798_p3 = pnand %p528_p0, %p203_p1  ;;  %s235_s8 = sshll.u32 %s740_s30, 4  ;;  %s236_s8 = int_to_ptr.vmem [resolvable:$true] %s235_s8 }
   0x7   : > { %s218_s11 = sshll.u32 %s901_s2, 4  ;;  %s245_s14 = sshll.u32 %s904_s5, 4  ;;  %s219_s11 = int_to_ptr.hbm [resolvable:$true] %s218_s11  ;;  %s246_s14 = int_to_ptr.hbm [resolvable:$true] %s245_s14 }
   0x8   : > { %p561_p4 = pneg %p798_p3  ;;  %s741_s16 = smov [#allocation2]  }
   0x9   : > { %s220_s17 = sshll.u32 %s741_s16, 4  ;;  %s742_s18 = smov [#allocation6]   ;;  %s221_s17 = int_to_ptr.vmem [resolvable:$true] %s220_s17 }
   0xa   : > { %p812_p5 = pnand %p574_p2, %p561_p4  ;;  %s247_s19 = sshll.u32 %s742_s18, 4  ;;  %s248_s19 = int_to_ptr.vmem [resolvable:$true] %s247_s19 }
   0xb   : > { %s257_s22 = sshll.u32 %s905_s6, 4  ;;  %s743_s23 = smov [#allocation7]   ;;  %s258_s22 = int_to_ptr.hbm [resolvable:$true] %s257_s22 }
   0xc   : > { %567 = dma.hbm_to_vmem [thread:$0]  (!%p812_p5), %s234_s27, 16, %s236_s8, [#allocation5]  }
   0xd   : > { %564 = dma.hbm_to_vmem [thread:$0]  (!%p812_p5), %s219_s11, 16, %s221_s17, [#allocation3]  }
   0xe   : > { %570 = dma.hbm_to_vmem [thread:$0]  (!%p812_p5), %s246_s14, 16, %s248_s19, [#allocation5]  }
   0xf   : > { %s259_s25 = sshll.u32 %s743_s23, 4  ;;  %279 = sbr.rel (%p798_p3) target bundleno = 566 (0x236), region = 48  ;;  %s260_s25 = int_to_ptr.vmem [resolvable:$true] %s259_s25 }
  0x10   : > { %573 = dma.hbm_to_vmem [thread:$0]  (!%p812_p5), %s258_s22, 16, %s260_s25, [#allocation8]  }
  0x14   : > { %725 = dma.done.wait (%p574_p2), [#allocation3], 16  }
  0x15   : > { %727 = vsyncadd (%p574_p2), [#allocation3], 4294967280 }
  0x16   : > { %729 = dma.done.wait (%p574_p2), [#allocation5], 32  }
  0x17   : > { %731 = vsyncadd (%p574_p2), [#allocation5], 4294967264 }
  0x18   : > { %733 = dma.done.wait (%p574_p2), [#allocation8], 16  }
  0x19   : > { %735 = vsyncadd (%p574_p2), [#allocation8], 4294967280  ;;  %p325_p6 = scmp.lt.s32.totalorder %s793_s28, 1  ;;  %v338_v0 = vld [vmem:[%s900_s1 + $0x10] sm:$0xff]  ;;  %v339_v1 = vld [vmem:[%s900_s1 + $0x18] sm:$0xff]  ;;  %vm346_vm0 = vcmask 261120  }
  0x1a   : > { %v336_v2 = vld [vmem:[%s900_s1] sm:$0xff]  ;;  %v341_v3 = vpack.c.bf16 %v339_v1, %v338_v0  ;;  %v337_v4 = vld [vmem:[%s900_s1 + $0x8] sm:$0xff]  ;;  %v371_v5 = vld [vmem:[%s902_s3 + $0x30] sm:$0xff]  ;;  %vm381_vm1 = vcmask 523264  }
  0x1b   : > { %s910_s28 = smov (!%p325_p6, %s793_s28), 1  ;;  %v372_v6 = vld [vmem:[%s902_s3 + $0x38] sm:$0xff]  ;;  %v369_v7 = vld [vmem:[%s902_s3 + $0x20] sm:$0xff]  ;;  %v370_v8 = vld [vmem:[%s902_s3 + $0x28] sm:$0xff]  ;;  %v340_v9 = vpack.c.bf16 %v337_v4, %v336_v2 }
  0x1c   : > { %s539_s26 = sshll.u32 %s910_s28, 3  ;;  %356 = vmatpush.bf16.msra.mxu0 %v341_v3  ;;  %v376_v11 = vpack.c.bf16 %v372_v6, %v371_v5  ;;  %v375_v12 = vpack.c.bf16 %v370_v8, %v369_v7  ;;  %v367_v14 = vld [vmem:[%s902_s3 + $0x10] sm:$0xff]  ;;  %v368_v15 = vld [vmem:[%s902_s3 + $0x18] sm:$0xff]  ;;  %v365_v17 = vld [vmem:[%s902_s3] sm:$0xff] }
  0x1d   : > { %s328_s13 = scalar_lea.vmem %s899_s0, %s539_s26  ;;  %v374_v16 = vpack.c.bf16 %v368_v15, %v367_v14  ;;  %v366_v18 = vld [vmem:[%s902_s3 + $0x8] sm:$0xff]  ;;  %v594_v20 = vld [vmem:[#allocation2] ss:$0 sm:$0xff]  ;;  %v595_v26 = vld [vmem:[#allocation4] ss:$0 sm:$0xff]  ;;  %s332_s14 = scalar_lea.vmem %s906_s7, %s539_s26 }
  0x1e   : > { %v334_v10 = vld [vmem:[%s328_s13] sm:$0xff]  ;;  %389 = vmatpush.bf16.msra.mxu1 %v376_v11  ;;  %v373_v19 = vpack.c.bf16 %v366_v18, %v365_v17 }
  0x1f   : > { %v335_v13 = vpack.c.bf16 %v334_v10, %v334_v10  ;;  %v596_v46 = vld [vmem:[#allocation6] ss:$0 sm:$0xff]  ;;  %v597_v48 = vld [vmem:[#allocation7] ss:$0 sm:$0xff] }
  0x20   : > { %357 = vmatpush.bf16.msra.mxu0 %v340_v9 }
  0x22   : > { %390 = vmatpush.bf16.msra.mxu1 %v375_v12 }
  0x23   : > { %541 = vmatmul.msk.bf16.vlgmr.msra.gmra.mxu0 %vm346_vm0, %v335_v13 }
  0x26   : > { %391 = vmatpush.bf16.msra.mxu1 %v374_v16 }
  0x2a   : > { %392 = vmatpush.bf16.msra.mxu1 %v373_v19 }
  0xa0   : > { %v359_v21 = vpop.f32.mrf.mxu0 }
  0xa1   : > { %v360_v22 = vadd.f32 %v594_v20, %v359_v21 }
  0xa3   : > { %v363_v23 = vmax.f32 %v360_v22, 0.0 }
  0xa5   : > { %v364_v24 = vpack.c.bf16 %v363_v23, %v363_v23 }
  0xa7   : > { %542 = vmatmul.msk.bf16.vlgmr.msra.gmra.mxu1 %vm381_vm1, %v364_v24 }
  0xa8   : > { %v361_v25 = vpop.f32.mrf.mxu0 }
 0x124   : > { %v394_v27 = vpop.f32.mrf.mxu1 }
 0x125   : > { %v395_v28 = vadd.f32 %v595_v26, %v394_v27 }
 0x127   : > { %v398_v29 = vadd.f32 %v395_v28, %v334_v10 }
 0x129   : > { %v399_v30 = vsel %vm346_vm0, %v398_v29, 0.0 }
 0x12a   : > { %400 = vadd.xlane.f32.xlu0 %v399_v30 }
 0x12c   : > { %v396_v31 = vpop.f32.mrf.mxu1 }
 0x19d   : > { %v401_v32 = vpop.xlane.xlu0 %400 }
 0x19e   : > { %v402_v33 = vmul.f32 0.03125, %v401_v32 }
 0x1a0   : > { %v403_v34 = vsub.f32 %v398_v29, %v402_v33 }
 0x1a2   : > { %v404_v35 = vmul.f32 %v403_v34, %v403_v34 }
 0x1a4   : > { %v405_v36 = vsel %vm346_vm0, %v404_v35, 0.0 }
 0x1a5   : > { %406 = vadd.xlane.f32.xlu0 %v405_v36 }
 0x218   : > { %v407_v37 = vpop.xlane.xlu0 %406 }
 0x219   : > { %v408_v38 = vmul.f32 0.03125, %v407_v37 }
 0x21b   : > { %v409_v39 = vadd.f32 1e-05, %v408_v38 }
 0x21d   : > { %598 = vrsqrt.f32 %v409_v39  ;;  %vm416_vm3 = vweird.f32 %v409_v39 }
 0x223   : > { %v599_v40 = vpop.eup %598 }
 0x224   : > { %v411_v41 = vmul.f32 %v599_v40, %v409_v39  ;;  %vm417_vm2 = vweird.f32 %v599_v40 }
 0x225   : > { %vm418_vm4 = vmor %vm416_vm3, %vm417_vm2 }
 0x226   : > { %v412_v42 = vmul.f32 %v599_v40, %v411_v41 }
 0x228   : > { %v413_v43 = vmul.f32 0.5, %v412_v42 }
 0x22a   : > { %v414_v44 = vsub.f32 1.5, %v413_v43 }
 0x22c   : > { %v415_v45 = vmul.f32 %v599_v40, %v414_v44 }
 0x22e   : > { %v419_v47 = vsel %vm418_vm4, %v599_v40, %v415_v45 }
 0x22f   : > { %v420_v49 = vmul.f32 %v419_v47, %v403_v34 }
 0x231   : > { %v425_v50 = vmul.f32 %v596_v46, %v420_v49 }
 0x233   : > { %v430_v51 = vadd.f32 %v597_v48, %v425_v50 }
 0x235   : > { %431 = vst.msk [vmem:[%s332_s14] sm:$0xff] %vm346_vm0, %v430_v51 }
 0x236 PF: > { %s20_s24 = sadd.s32 1, %s738_s24  }
 0x237   : > { %p17_p7 = scmp.ge.s32.totalorder %s20_s24, 4  }
 0x239   :  { %19 = sbr.rel (!%p17_p7) target bundleno = 3 (0x3), region = 95 }
 0x23e   :  { %451 = vsyncpa [#allocation3], 1 }
 0x23f   :  { %453 = vsyncpa [#allocation3 + $0x1], 1 }
 0x240   :  { %454 = vsyncpa [#allocation5], 1 }
 0x241   :  { %455 = vsyncpa [#allocation8], 1 }

// kernel: causal_decoder.7
= control target key start
LH: loop header
LB: loop body
LE: loop exit
PB: predicated region body
PF: predicated region fallthrough
CT: control target
= control target key end

     0   :  { %12 = vsyncpa [#allocation3], 0  ;;  %s1604_s0 = inlined_call_operand.hbm [shape: f32[2,8,32], index: 0, kind: input, shape index: {}]   ;;  %s1605_s1 = inlined_call_operand.hbm [shape: f32[32,96], index: 1, kind: input, shape index: {}]   ;;  %s1606_s2 = inlined_call_operand.hbm [shape: f32[1,96], index: 2, kind: input, shape index: {}]   ;;  %s1607_s3 = inlined_call_operand.hbm [shape: f32[32,32], index: 3, kind: input, shape index: {}]   ;;  %s1608_s4 = inlined_call_operand.hbm [shape: f32[1,32], index: 4, kind: input, shape index: {}]   ;;  %s1609_s5 = inlined_call_operand.hbm [shape: f32[1,32], index: 5, kind: input, shape index: {}]   ;;  %s1610_s6 = inlined_call_operand.hbm [shape: f32[1,32], index: 6, kind: input, shape index: {}]   ;;  %s1611_s7 = inlined_call_operand.vmem [shape: f32[2,8,32], index: 7, kind: output, shape index: {}]  }
   0x1   :  { %14 = vsyncpa [#allocation3 + $0x1], 0 }
   0x2   :  { %15 = vsyncpa [#allocation5], 0 }
   0x3   :  { %16 = vsyncpa [#allocation8], 0 }
   0x4   :  { %17 = vsyncpa [#allocation11], 0  ;;  %s1392_s24 = smov 0   ;;  %s1394_s25 = smov 0  }
   0x5   :  { %s1396_s26 = smov 0   ;;  %s1398_s27 = smov 0  }
   0x6 LB: > { %s217_s30 = sshll.u32 %s1605_s1, 4  ;;  %s1416_s8 = sadd.s32 4294967295, %s1330_s27   ;;  %s1330_s27 = sphi %s1398_s27, %s1619_s27   ;;  %s1326_s26 = sphi %s1396_s26, %s1618_s26   ;;  %s1322_s25 = sphi %s1394_s25, %s1617_s25   ;;  %s1318_s24 = sphi %s1392_s24, %s1616_s24   ;;  %s218_s30 = int_to_ptr.hbm [resolvable:$true] %s217_s30 }
   0x7   : > { %p904_p0 = scmp.ge.s32.totalorder %s1330_s27, 1  ;;  %p44_p1 = scmp.eq.s32.totalorder %s1416_s8, 0 }
   0x8   : > { %p206_p2 = scmp.lt.s32.totalorder %s1330_s27, 3  ;;  %s1332_s10 = smov [#allocation4]  }
   0x9   : > { %s219_s11 = sshll.u32 %s1332_s10, 4  ;;  %s243_s14 = sshll.u32 %s1607_s3, 4  ;;  %s220_s11 = int_to_ptr.vmem [resolvable:$true] %s219_s11  ;;  %s244_s14 = int_to_ptr.hbm [resolvable:$true] %s243_s14 }
   0xa   : > { %p1421_p3 = pnand %p904_p0, %p206_p2  ;;  %s270_s18 = sshll.u32 %s1609_s5, 4  ;;  %s271_s18 = int_to_ptr.hbm [resolvable:$true] %s270_s18 }
   0xb   : > { %s1333_s19 = smov [#allocation7]   ;;  %s1334_s21 = smov 128  }
   0xc   : > { %p964_p4 = pneg %p1421_p3  ;;  %s245_s20 = sshll.u32 %s1333_s19, 4  ;;  %s246_s20 = int_to_ptr.vmem [resolvable:$true] %s245_s20 }
   0xd   : > { %s1335_s22 = smov 8   ;;  %s232_s29 = sshll.u32 %s1606_s2, 4  ;;  %s233_s29 = int_to_ptr.hbm [resolvable:$true] %s232_s29 }
   0xe   : > { %p1432_p5 = pnand %p964_p4, %p44_p1  ;;  %s1336_s10 = smov [#allocation10]  }
   0xf   : > { %s272_s12 = sshll.u32 %s1336_s10, 4  ;;  %s1337_s13 = smov [#allocation6]   ;;  %s273_s12 = int_to_ptr.vmem [resolvable:$true] %s272_s12 }
  0x10   : > { %967 = dma.hbm_to_vmem [thread:$0]  (!%p1432_p5), %s218_s30, 512, %s220_s11, [#allocation5], %s1334_s21, %s1334_s21, %s1335_s22  }
  0x11   : > { %973 = dma.hbm_to_vmem [thread:$0]  (!%p1432_p5), %s244_s14, 512, %s246_s20, [#allocation8], %s1334_s21, %s1334_s21, %s1335_s22  }
  0x12   : > { %979 = dma.hbm_to_vmem [thread:$0]  (!%p1432_p5), %s271_s18, 16, %s273_s12, [#allocation11]  }
  0x13   : > { %s234_s16 = sshll.u32 %s1337_s13, 4  ;;  %s258_s14 = sshll.u32 %s1608_s4, 4  ;;  %s235_s16 = int_to_ptr.vmem [resolvable:$true] %s234_s16  ;;  %s259_s14 = int_to_ptr.hbm [resolvable:$true] %s258_s14 }
  0x14   : > { %970 = dma.hbm_to_vmem [thread:$0]  (!%p1432_p5), %s233_s29, 16, %s235_s16, [#allocation5]  }
  0x15   : > { %s282_s18 = sshll.u32 %s1610_s6, 4  ;;  %s1338_s20 = smov [#allocation9]   ;;  %s283_s18 = int_to_ptr.hbm [resolvable:$true] %s282_s18 }
  0x16   : > { %s260_s21 = sshll.u32 %s1338_s20, 4  ;;  %s1339_s22 = smov [#allocation12]   ;;  %s261_s21 = int_to_ptr.vmem [resolvable:$true] %s260_s21 }
  0x17   : > { %976 = dma.hbm_to_vmem [thread:$0]  (!%p1432_p5), %s259_s14, 16, %s261_s21, [#allocation8]  }
  0x18   : > { %s284_s23 = sshll.u32 %s1339_s22, 4  ;;  %s1461_s28 = sadd.s32 1, %s1330_s27   ;;  %s285_s23 = int_to_ptr.vmem [resolvable:$true] %s284_s23 }
  0x19   : > { %982 = dma.hbm_to_vmem [thread:$0]  (!%p1432_p5), %s283_s18, 16, %s285_s23, [#allocation11]  }
  0x1a   : > { %s27_s29 = ssub.s32 %s1330_s27, %s1461_s28  ;;  %s30_s10 = sadd.s32 1, %s1326_s26 }
  0x1b   : > { %p28_p6 = scmp.eq.s32.totalorder %s27_s29, 0  ;;  %p37_p7 = scmp.ne.s32.totalorder %s1326_s26, %s1322_s25 }
  0x1c   : > { %p38_p8 = scmp.eq.s32.totalorder %s1330_s27, 0  ;;  %p43_p9 = scmp.ne.s32.totalorder %s1322_s25, %s1318_s24 }
  0x1d   : > { %s1472_s12 = scalar_select %p28_p6, %s1326_s26, %s30_s10  }
  0x1e   : > { %p1476_p10 = por %p44_p1, %p43_p9  ;;  %p993_p11 = scmp.lt.s32.totalorder %s1330_s27, 2 }
  0x1f   : > { %s295_s16 = sand.u32 1, %s1326_s26   ;;  %s913_s15 = sshll.u32 %s1330_s27, 3 }
  0x20   : > { %p39_p12 = por %p38_p8, %p37_p7  ;;  %s912_s30 = sshll.u32 %s295_s16, 3 }
  0x21   : > { %s303_s17 = scalar_lea.hbm %s1604_s0, %s913_s15  ;;  %s299_s18 = scalar_lea.vmem [#allocation2], %s912_s30 }
  0x22   : > { %s305_s19 = sshll.u32 %s303_s17, 4  ;;  %s307_s20 = sshll.u32 %s299_s18, 4  ;;  %s306_s19 = int_to_ptr.hbm [resolvable:$true] %s305_s19  ;;  %s308_s20 = int_to_ptr.vmem [resolvable:$true] %s307_s20 }
  0x23   : > { %p1486_p13 = pnand %p993_p11, %p39_p12  ;;  %s296_s21 = scalar_lea.sflag [#allocation3], %s295_s16 }
  0x24   : > { %s1254_s22 = sshra.s32 %s306_s19, 4  ;;  %s1261_s10 = scalar_lea.hbm %s1604_s0, 16  ;;  %s1255_s22 = int_to_ptr.hbm [resolvable:$true] %s1254_s22 }
  0x25   : > { %s1256_s27 = scalar_lea.hbm %s1255_s22, 8  ;;  %p1258_p2 = pneg %p1486_p13 }
  0x26   : > { %p1257_p0 = scmp.ne.s32.totalorder %s1255_s22, %s1256_s27  ;;  %p1262_p6 = scmp.lt.s32.totalorder %s1255_s22, %s1604_s0 }
  0x27   : > { %p1263_p7 = scmp.lt.s32.totalorder %s1261_s10, %s1256_s27 }
  0x28   : > { %p1259_p4 = pnand %p1258_p2, %p1257_p0 }
  0x29   : > { %p1264_p8 = por %p1263_p7, %p1262_p6 }
  0x2a   : > { %p1260_p5 = pneg %p1259_p4 }
  0x2c   : > { %p1265_p9 = pnand %p1264_p8, %p1260_p5 }
  0x2e   : > { %1268 = shalt.err (!%p1265_p9)
}
  0x2f   : > { %986 = dma.hbm_to_vmem [thread:$0]  (!%p1486_p13), %s306_s19, 128, %s308_s20, %s296_s21  }
  0x30   : > { %316 = sbr.rel (%p1421_p3) target bundleno = 1799 (0x707), region = 48  ;;  %s318_s16 = sand.u32 (!%p1421_p3), 1, %s1322_s25  }
  0x31   : > { %s915_s11 = sshll.u32 (!%p1421_p3), %s318_s16, 3  ;;  %s319_s14 = scalar_lea.sflag (!%p1421_p3), [#allocation3], %s318_s16 }
  0x32   : > { %s322_s17 = scalar_lea.vmem (!%p1421_p3), [#allocation2], %s915_s11 }
  0x35   : > { %1301 = dma.done.wait (%p1476_p10), %s319_s14, 128  }
  0x36   : > { %1303 = vsyncadd (%p1476_p10), %s319_s14, 4294967168 }
  0x37   : > { %1305 = dma.done.wait (%p44_p1), [#allocation5], 528  }
  0x38   : > { %1307 = vsyncadd (%p44_p1), [#allocation5], 4294966768 }
  0x39   : > { %1309 = dma.done.wait (%p44_p1), [#allocation8], 528  }
  0x3a   : > { %1311 = vsyncadd (%p44_p1), [#allocation8], 4294966768 }
  0x3b   : > { %1313 = dma.done.wait (%p44_p1), [#allocation11], 32  }
  0x3c   : > { %1315 = vsyncadd (%p44_p1), [#allocation11], 4294967264  ;;  %v391_v0 = vld [vmem:[#allocation4 + $0x10] sm:$0xff]  ;;  %v392_v1 = vld [vmem:[#allocation4 + $0x18] sm:$0xff]  ;;  %vm400_vm0 = vcmask 261120   ;;  %s1340_s9 = smov 88   ;;  %v417_v28 = vlaneseq }
  0x3d   : > { %v389_v2 = vld [vmem:[#allocation4] sm:$0xff]  ;;  %v394_v3 = vpack.c.bf16 %v392_v1, %v391_v0  ;;  %v390_v4 = vld [vmem:[#allocation4 + $0x8] sm:$0xff]  ;;  %v1519_v6 = vld [vmem:[%s322_s17] sm:$0xff]  ;;  %s1341_s13 = smov 96   ;;  %s1342_s19 = smov 120   ;;  %vm437_vm1 = vcmask 64512  }
  0x3e   : > { %v393_v5 = vpack.c.bf16 %v390_v4, %v389_v2  ;;  %v396_v7 = vpack.c.bf16 %v1519_v6, %v1519_v6  ;;  %v1052_v8 = vld [vmem:[#allocation6] ss:$0 sm:$0xff]  ;;  %s1343_s18 = smov 80   ;;  %s1344_s20 = smov 72   ;;  %v423_v20 = vld [vmem:[#allocation7] sm:$0xff]  ;;  %vm474_vm2 = vcmask 1043456  }
  0x3f   : > { %410 = vmatpush.bf16.msra.mxu0 %v394_v3  ;;  %s1345_s24 = smov 112   ;;  %v427_v21 = vpack.c.bf16 %v423_v20, %v423_v20  ;;  %v418_v29 = vshrl.u32 %v417_v28, 7  ;;  %v420_v30 = vand.u32 127, %v417_v28  ;;  %v1346_v31 = vmov -1e+09   ;;  %s1347_s21 = smov 56  }
  0x40   : > { %s1348_s22 = smov 40   ;;  %s1349_s27 = smov 64  }
  0x41   : > { %v573_v24 = vsel %vm474_vm2, %v427_v21, 0  ;;  %vm421_vm3 = vcmp.le.s32.totalorder %v420_v30, %v418_v29  ;;  %s1350_s23 = smov 104   ;;  %s1351_s29 = smov 48  }
  0x42   : > { %v1543_v32 = vsel %vm421_vm3, 0.0, %v1346_v31  ;;  %p383_p1 = scmp.lt.s32.totalorder %s1416_s8, 1 }
  0x43   : > { %411 = vmatpush.bf16.msra.mxu0 %v393_v5 }
  0x44   : > { %s1621_s8 = smov (!%p383_p1, %s1416_s8), 1 }
  0x45   : > { %s922_s10 = sshll.u32 %s1621_s8, 3 }
  0x46   : > { %923 = vmatmul.msk.bf16.vlgmr.msra.gmra.mxu0 %vm400_vm0, %v396_v7  ;;  %v424_v7 = vld [vmem:[#allocation7 + $0x8] sm:$0xff]  ;;  %s386_s16 = scalar_lea.vmem %s1611_s7, %s922_s10 }
  0xc3   : > { %v413_v9 = vpop.f32.mrf.mxu0 }
  0xc4   : > { %v414_v10 = vadd.f32 %v1052_v8, %v413_v9  ;;  %v428_v8 = vpack.c.bf16 %v424_v7, %v424_v7 }
  0xc6   : > { %v1524_v11 = vpack.c.bf16 %v414_v10, %v414_v10  ;;  %v431_v12 = vmul.f32 0.35355338, %v414_v10  ;;  %v554_v9 = vsel %vm474_vm2, %v428_v8, 0 }
  0xc7   : > { %563 = vmatpush.bf16.msrb.mxu0 %v554_v9 }
  0xc8   : > { %495 = vrot.lane.b32.xlu2 %v1524_v11, %s1340_s9  ;;  %435 = vrot.lane.b32.xlu0 %v1524_v11, %s1341_s13  ;;  %v1528_v14 = vpack.c.bf16 %v431_v12, %v431_v12 }
  0xcb   : > { %v415_v13 = vpop.f32.mrf.mxu0 }
  0xd0   : > { %493 = vrot.lane.b32.xlu2 %v1528_v14, %s1342_s19 }
  0xd8   : > { %590 = vrot.lane.b32.xlu2 %v1524_v11, %s1343_s18 }
  0xe0   : > { %667 = vrot.lane.b32.xlu2 %v1524_v11, %s1344_s20 }
  0xe8   : > { %588 = vrot.lane.b32.xlu2 %v1528_v14, %s1345_s24 }
 0x122   : > { %v496_v15 = vpop.permute.xlu2 %495 }
 0x123   : > { %v501_v16 = vsel %vm437_vm1, %v496_v15, 0 }
 0x124   : > { %510 = vmatpush.bf16.xpose.msra.mxu3 %v501_v16 }
 0x12a   : > { %v494_v17 = vpop.permute.xlu2 %493 }
 0x12b   : > { %926 = vmatmul.msk.bf16.vlgmr.msra.gmra.mxu3 %vm437_vm1, %v494_v17 }
 0x132   : > { %v591_v18 = vpop.permute.xlu2 %590 }
 0x133   : > { %v596_v19 = vsel %vm437_vm1, %v591_v18, 0 }
 0x134   : > { %605 = vmatpush.bf16.xpose.msrb.mxu3 %v596_v19 }
 0x13a   : > { %v436_v22 = vpop.permute.xlu0 %435  ;;  %v668_v23 = vpop.permute.xlu2 %667 }
 0x13b   : > { %v442_v25 = vsel %vm437_vm1, %v436_v22, 0  ;;  %v673_v27 = vsel %vm437_vm1, %v668_v23, 0 }
 0x13c   : > { %451 = vmatpush.bf16.xpose.msra.mxu1 %v442_v25 }
 0x142   : > { %v589_v26 = vpop.permute.xlu2 %588 }
 0x143   : > { %924 = vmatmul.msk.bf16.vlgmr.msra.gmra.mxu1 %vm437_vm1, %v1528_v14  ;;  %930 = vmatmul.msk.bf16.vlgmr.msrb.gmra.mxu3 %vm437_vm1, %v589_v26 }
 0x144   : > { %582 = vmatpush.bf16.msrb.mxu1 %v573_v24 }
 0x148   : > { %682 = vmatpush.bf16.xpose.msra.mxu1 %v673_v27 }
 0x1ae   : > { %v512_v33 = vpop.f32.mrf.mxu3 }
 0x1af   : > { %v513_v34 = vadd.f32 %v512_v33, %v1543_v32 }
 0x1b1   : > { %v516_v35 = vsel %vm437_vm1, %v513_v34, -inf }
 0x1b2   : > { %517 = vmax.xlane.f32.xlu2 %v516_v35 }
 0x1b6   : > { %v514_v36 = vpop.f32.mrf.mxu3 }
 0x1c0   : > { %v453_v37 = vpop.f32.mrf.mxu1 }
 0x1c1   : > { %v454_v38 = vadd.f32 %v453_v37, %v1543_v32 }
 0x1c3   : > { %v457_v39 = vsel %vm437_vm1, %v454_v38, -inf }
 0x1c4   : > { %458 = vmax.xlane.f32.xlu0 %v457_v39 }
 0x1c6   : > { %v607_v40 = vpop.f32.mrf.mxu3 }
 0x1c7   : > { %v1550_v41 = vadd.f32 %v607_v40, %v1543_v32 }
 0x1c8   : > { %v455_v42 = vpop.f32.mrf.mxu1 }
 0x1c9   : > { %v611_v43 = vsel %vm437_vm1, %v1550_v41, -inf }
 0x1cc   : > { %612 = vmax.xlane.f32.xlu0 %v611_v43 }
 0x1ce   : > { %v609_v44 = vpop.f32.mrf.mxu3 }
 0x225   : > { %v518_v45 = vpop.xlane.xlu2 %517 }
 0x226   : > { %v519_v46 = vsub.f32 %v513_v34, %v518_v45 }
 0x228   : > { %v520_v47 = vmul.f32 1.442695, %v519_v46 }
 0x22a   : > { %1056 = vpow2.f32 %v520_v47 }
 0x230   : > { %v1057_v48 = vpop.eup %1056 }
 0x231   : > { %v522_v49 = vsel %vm437_vm1, %v1057_v48, 0.0 }
 0x232   : > { %523 = vadd.xlane.f32.xlu0 %v522_v49 }
 0x237   : > { %v459_v50 = vpop.xlane.xlu0 %458 }
 0x238   : > { %v460_v51 = vsub.f32 %v454_v38, %v459_v50  ;;  %v426_v38 = vld [vmem:[#allocation7 + $0x18] sm:$0xff] }
 0x239   : > { %v430_v40 = vpack.c.bf16 %v426_v38, %v426_v38 }
 0x23a   : > { %v461_v52 = vmul.f32 1.442695, %v460_v51 }
 0x23b   : > { %v726_v45 = vsel %vm474_vm2, %v430_v40, 0 }
 0x23c   : > { %1058 = vpow2.f32 %v461_v52 }
 0x23f   : > { %v613_v55 = vpop.xlane.xlu0 %612 }
 0x240   : > { %v614_v20 = vsub.f32 %v1550_v41, %v613_v55 }
 0x242   : > { %v1059_v53 = vpop.eup %1058  ;;  %v615_v21 = vmul.f32 1.442695, %v614_v20  ;;  %v1055_v20 = vld [vmem:[#allocation12] ss:$0 sm:$0xff] }
 0x243   : > { %v463_v54 = vsel %vm437_vm1, %v1059_v53, 0.0 }
 0x244   : > { %464 = vadd.xlane.f32.xlu1 %v463_v54 }
 0x246   : > { %528 = vrot.lane.b32.xlu0 %v1524_v11, %s1347_s21 }
 0x24e   : > { %700 = vrot.lane.b32.xlu0 %v1524_v11, %s1348_s22 }
 0x25d   : > { %469 = vrot.lane.b32.xlu1 %v1524_v11, %s1349_s27 }
 0x265   : > { %665 = vrot.lane.b32.xlu1 %v1528_v14, %s1350_s23 }
 0x2a5   : > { %v524_v56 = vpop.xlane.xlu0 %523 }
 0x2b7   : > { %v465_v60 = vpop.xlane.xlu1 %464 }
 0x2b8   : > { %v529_v57 = vpop.permute.xlu0 %528  ;;  %1060 = vrcp.f32 %v465_v60 }
 0x2b9   : > { %v534_v1 = vsel %vm474_vm2, %v529_v57, 0  ;;  %1062 = vrcp.f32 %v524_v56 }
 0x2ba   : > { %1064 = vpow2.f32 %v615_v21 }
 0x2be   : > { %v1061_v61 = vpop.eup %1060 }
 0x2bf   : > { %v467_v62 = vmul.f32 %v1061_v61, %v1059_v53  ;;  %v1063_v3 = vpop.eup %1062 }
 0x2c0   : > { %v701_v58 = vpop.permute.xlu0 %700  ;;  %v526_v4 = vmul.f32 %v1063_v3, %v1057_v48  ;;  %v1065_v27 = vpop.eup %1064 }
 0x2c1   : > { %v706_v59 = vsel %vm474_vm2, %v701_v58, 0  ;;  %v468_v2 = vpack.c.bf16 %v467_v62, %v467_v62  ;;  %v617_v30 = vsel %vm437_vm1, %v1065_v27, 0.0 }
 0x2c2   : > { %715 = vmatpush.bf16.msra.mxu3 %v706_v59  ;;  %v527_v5 = vpack.c.bf16 %v526_v4, %v526_v4  ;;  %v1053_v59 = vld [vmem:[#allocation9] ss:$0 sm:$0xff] }
 0x2cf   : > { %v470_v63 = vpop.permute.xlu1 %469 }
 0x2d0   : > { %v476_v0 = vsel %vm474_vm2, %v470_v63, 0 }
 0x2d1   : > { %485 = vmatpush.bf16.msra.mxu2 %v476_v0 }
 0x2d4   : > { %925 = vmatmul.msk.bf16.vlgmr.msra.gmra.mxu2 %vm437_vm1, %v468_v2 }
 0x2d5   : > { %543 = vmatpush.bf16.msrb.mxu2 %v534_v1 }
 0x2d7   : > { %v666_v16 = vpop.permute.xlu1 %665 }
 0x2e4   : > { %927 = vmatmul.msk.bf16.vlgmr.msrb.gmra.mxu2 %vm437_vm1, %v527_v5 }
 0x357   : > { %v487_v10 = vpop.f32.mrf.mxu2 }
 0x358   : > { %v491_v12 = vpack.c.bf16 %v487_v10, %v487_v10 }
 0x35a   : > { %929 = vmatmul.msk.bf16.vlgmr.msrb.gmra.mxu1 %vm437_vm1, %v491_v12 }
 0x35f   : > { %v489_v13 = vpop.f32.mrf.mxu2 }
 0x367   : > { %v545_v14 = vpop.f32.mrf.mxu2 }
 0x368   : > { %v549_v15 = vpack.c.bf16 %v545_v14, %v545_v14 }
 0x36a   : > { %928 = vmatmul.msk.bf16.vlgmr.msrb.gmra.mxu0 %vm437_vm1, %v549_v15  ;;  %933 = vmatmul.msk.bf16.vlgmr.msra.gmra.mxu1 %vm437_vm1, %v666_v16 }
 0x36f   : > { %v547_v17 = vpop.f32.mrf.mxu2 }
 0x3d7   : > { %v584_v18 = vpop.f32.mrf.mxu1 }
 0x3df   : > { %v586_v19 = vpop.f32.mrf.mxu1 }
 0x3e7   : > { %v565_v22 = vpop.f32.mrf.mxu0  ;;  %v684_v23 = vpop.f32.mrf.mxu1 }
 0x3e8   : > { %v585_v24 = vadd.f32 %v584_v18, %v565_v22  ;;  %v685_v25 = vadd.f32 %v684_v23, %v1543_v32  ;;  %v1054_v18 = vld [vmem:[#allocation10] ss:$0 sm:$0xff] }
 0x3ea   : > { %v688_v26 = vsel %vm437_vm1, %v685_v25, -inf }
 0x3eb   : > { %689 = vmax.xlane.f32.xlu1 %v688_v26 }
 0x3ef   : > { %v567_v28 = vpop.f32.mrf.mxu0  ;;  %v686_v29 = vpop.f32.mrf.mxu1 }
 0x3f3   : > { %618 = vadd.xlane.f32.xlu1 %v617_v30 }
 0x45e   : > { %v690_v31 = vpop.xlane.xlu1 %689 }
 0x45f   : > { %v691_v33 = vsub.f32 %v685_v25, %v690_v31 }
 0x461   : > { %v692_v34 = vmul.f32 1.442695, %v691_v33 }
 0x463   : > { %1066 = vpow2.f32 %v692_v34 }
 0x466   : > { %v619_v32 = vpop.xlane.xlu1 %618 }
 0x467   : > { %1068 = vrcp.f32 %v619_v32 }
 0x469   : > { %v1067_v35 = vpop.eup %1066 }
 0x46a   : > { %v694_v36 = vsel %vm437_vm1, %v1067_v35, 0.0 }
 0x46b   : > { %695 = vadd.xlane.f32.xlu2 %v694_v36 }
 0x46d   : > { %v1069_v39 = vpop.eup %1068 }
 0x46e   : > { %v621_v42 = vmul.f32 %v1069_v39, %v1065_v27 }
 0x470   : > { %v622_v48 = vpack.c.bf16 %v621_v42, %v621_v42 }
 0x483   : > { %623 = vrot.lane.b32.xlu2 %v1524_v11, %s1351_s29  ;;  %v425_v11 = vld [vmem:[#allocation7 + $0x10] sm:$0xff] }
 0x484   : > { %v429_v49 = vpack.c.bf16 %v425_v11, %v425_v11 }
 0x486   : > { %v649_v50 = vsel %vm474_vm2, %v429_v49, 0 }
 0x487   : > { %658 = vmatpush.bf16.msra.mxu0 %v649_v50 }
 0x4de   : > { %v696_v37 = vpop.xlane.xlu2 %695 }
 0x4df   : > { %1070 = vrcp.f32 %v696_v37 }
 0x4e5   : > { %v1071_v41 = vpop.eup %1070 }
 0x4e6   : > { %v698_v43 = vmul.f32 %v1071_v41, %v1067_v35  ;;  %v624_v44 = vpop.permute.xlu2 %623 }
 0x4e7   : > { %v629_v46 = vsel %vm474_vm2, %v624_v44, 0 }
 0x4e8   : > { %v699_v47 = vpack.c.bf16 %v698_v43, %v698_v43  ;;  %638 = vmatpush.bf16.msra.mxu2 %v629_v46 }
 0x4ea   : > { %934 = vmatmul.msk.bf16.vlgmr.msra.gmra.mxu3 %vm437_vm1, %v699_v47 }
 0x4eb   : > { %931 = vmatmul.msk.bf16.vlgmr.msra.gmra.mxu2 %vm437_vm1, %v622_v48 }
 0x4ec   : > { %735 = vmatpush.bf16.msrb.mxu2 %v726_v45 }
 0x56d   : > { %v717_v51 = vpop.f32.mrf.mxu3 }
 0x56e   : > { %v721_v52 = vpack.c.bf16 %v717_v51, %v717_v51  ;;  %v640_v53 = vpop.f32.mrf.mxu2 }
 0x56f   : > { %v644_v54 = vpack.c.bf16 %v640_v53, %v640_v53 }
 0x570   : > { %935 = vmatmul.msk.bf16.vlgmr.msrb.gmra.mxu2 %vm437_vm1, %v721_v52 }
 0x571   : > { %932 = vmatmul.msk.bf16.vlgmr.msra.gmra.mxu0 %vm437_vm1, %v644_v54 }
 0x575   : > { %v719_v55 = vpop.f32.mrf.mxu3 }
 0x576   : > { %v642_v56 = vpop.f32.mrf.mxu2 }
 0x5ee   : > { %v660_v57 = vpop.f32.mrf.mxu0 }
 0x5ef   : > { %v664_v58 = vadd.f32 %v660_v57, %v585_v24 }
 0x5f3   : > { %v737_v60 = vpop.f32.mrf.mxu2 }
 0x5f4   : > { %v741_v61 = vadd.f32 %v737_v60, %v664_v58 }
 0x5f6   : > { %v746_v62 = vadd.f32 %v1053_v59, %v741_v61  ;;  %v662_v63 = vpop.f32.mrf.mxu0 }
 0x5f8   : > { %v747_v0 = vadd.f32 %v746_v62, %v1519_v6 }
 0x5fa   : > { %v748_v1 = vsel %vm400_vm0, %v747_v0, 0.0 }
 0x5fb   : > { %749 = vadd.xlane.f32.xlu1 %v748_v1  ;;  %v739_v2 = vpop.f32.mrf.mxu2 }
 0x66e   : > { %v750_v3 = vpop.xlane.xlu1 %749 }
 0x66f   : > { %v751_v4 = vmul.f32 0.03125, %v750_v3 }
 0x671   : > { %v752_v5 = vsub.f32 %v747_v0, %v751_v4 }
 0x673   : > { %v753_v7 = vmul.f32 %v752_v5, %v752_v5 }
 0x675   : > { %v754_v8 = vsel %vm400_vm0, %v753_v7, 0.0 }
 0x676   : > { %755 = vadd.xlane.f32.xlu0 %v754_v8 }
 0x6e9   : > { %v756_v9 = vpop.xlane.xlu0 %755 }
 0x6ea   : > { %v757_v10 = vmul.f32 0.03125, %v756_v9 }
 0x6ec   : > { %v758_v12 = vadd.f32 1e-05, %v757_v10 }
 0x6ee   : > { %1072 = vrsqrt.f32 %v758_v12  ;;  %vm765_vm5 = vweird.f32 %v758_v12 }
 0x6f4   : > { %v1073_v13 = vpop.eup %1072 }
 0x6f5   : > { %v760_v14 = vmul.f32 %v1073_v13, %v758_v12  ;;  %vm766_vm4 = vweird.f32 %v1073_v13 }
 0x6f6   : > { %vm767_vm6 = vmor %vm765_vm5, %vm766_vm4 }
 0x6f7   : > { %v761_v6 = vmul.f32 %v1073_v13, %v760_v14 }
 0x6f9   : > { %v762_v15 = vmul.f32 0.5, %v761_v6 }
 0x6fb   : > { %v763_v16 = vsub.f32 1.5, %v762_v15 }
 0x6fd   : > { %v764_v17 = vmul.f32 %v1073_v13, %v763_v16 }
 0x6ff   : > { %v768_v19 = vsel %vm767_vm6, %v1073_v13, %v764_v17 }
 0x700   : > { %v769_v21 = vmul.f32 %v768_v19, %v752_v5 }
 0x702   : > { %v774_v22 = vmul.f32 %v1054_v18, %v769_v21 }
 0x704   : > { %v779_v23 = vadd.f32 %v1055_v20, %v774_v22 }
 0x706   : > { %780 = vst.msk [vmem:[%s386_s16] sm:$0xff] %vm400_vm0, %v779_v23 }
 0x707 PF: > { %p20_p3 = scmp.ge.s32.totalorder %s1461_s28, 4   ;;  %s1616_s24 = smov %s1322_s25 }
 0x708   : > { %s1617_s25 = smov %s1326_s26  ;;  %s1618_s26 = smov %s1472_s12 }
 0x709   : > { %s1619_s27 = smov %s1461_s28  ;;  %22 = sbr.rel (!%p20_p3) target bundleno = 6 (0x6), region = 112 }
 0x70e   :  { %800 = vsyncpa [#allocation3], 1 }
 0x70f   :  { %802 = vsyncpa [#allocation3 + $0x1], 1 }
 0x710   :  { %803 = vsyncpa [#allocation5], 1 }
 0x711   :  { %804 = vsyncpa [#allocation8], 1 }
 0x712   :  { %805 = vsyncpa [#allocation11], 1 }

// kernel: causal_decoder.8
= control target key start
LH: loop header
LB: loop body
LE: loop exit
PB: predicated region body
PF: predicated region fallthrough
CT: control target
= control target key end

     0   :  { %13 = vsyncpa [#allocation3], 0  ;;  %s1697_s0 = inlined_call_operand.vmem [shape: f32[2,8,32], index: 0, kind: input, shape index: {}]   ;;  %s1698_s1 = inlined_call_operand.hbm [shape: f32[2,8,32], index: 1, kind: input, shape index: {}]   ;;  %s1699_s2 = inlined_call_operand.hbm [shape: f32[32,96], index: 2, kind: input, shape index: {}]   ;;  %s1700_s3 = inlined_call_operand.hbm [shape: f32[1,96], index: 3, kind: input, shape index: {}]   ;;  %s1701_s4 = inlined_call_operand.hbm [shape: f32[32,32], index: 4, kind: input, shape index: {}]   ;;  %s1702_s5 = inlined_call_operand.hbm [shape: f32[1,32], index: 5, kind: input, shape index: {}]   ;;  %s1703_s6 = inlined_call_operand.hbm [shape: f32[1,32], index: 6, kind: input, shape index: {}]   ;;  %s1704_s7 = inlined_call_operand.hbm [shape: f32[1,32], index: 7, kind: input, shape index: {}]   ;;  %s1705_s8 = inlined_call_operand.vmem [shape: f32[2,8,32], index: 8, kind: output, shape index: {}]  }
   0x1   :  { %15 = vsyncpa [#allocation3 + $0x1], 0 }
   0x2   :  { %16 = vsyncpa [#allocation5], 0 }
   0x3   :  { %17 = vsyncpa [#allocation8], 0 }
   0x4   :  { %18 = vsyncpa [#allocation11], 0  ;;  %s1478_s27 = smov 0   ;;  %s1480_s28 = smov 0  }
   0x5   :  { %s1482_s29 = smov 0   ;;  %s1484_s30 = smov 0  }
   0x6 LB: > { %s244_s11 = sshll.u32 %s1699_s2, 4  ;;  %s1502_s12 = sadd.s32 4294967295, %s1416_s30   ;;  %s1416_s30 = sphi %s1484_s30, %s1713_s30   ;;  %s1412_s29 = sphi %s1482_s29, %s1712_s29   ;;  %s1408_s28 = sphi %s1480_s28, %s1711_s28   ;;  %s1404_s27 = sphi %s1478_s27, %s1710_s27   ;;  %s245_s11 = int_to_ptr.hbm [resolvable:$true] %s244_s11 }
   0x7   : > { %p993_p0 = scmp.ge.s32.totalorder %s1416_s30, 1  ;;  %p71_p1 = scmp.eq.s32.totalorder %s1502_s12, 0 }
   0x8   : > { %p233_p2 = scmp.lt.s32.totalorder %s1416_s30, 3  ;;  %s1418_s14 = smov [#allocation4]  }
   0x9   : > { %s246_s15 = sshll.u32 %s1418_s14, 4  ;;  %s270_s18 = sshll.u32 %s1701_s4, 4  ;;  %s247_s15 = int_to_ptr.vmem [resolvable:$true] %s246_s15  ;;  %s271_s18 = int_to_ptr.hbm [resolvable:$true] %s270_s18 }
   0xa   : > { %p1507_p3 = pnand %p993_p0, %p233_p2  ;;  %s297_s22 = sshll.u32 %s1703_s6, 4  ;;  %s298_s22 = int_to_ptr.hbm [resolvable:$true] %s297_s22 }
   0xb   : > { %s1419_s23 = smov [#allocation7]   ;;  %s1420_s25 = smov 128  }
   0xc   : > { %p1055_p4 = pneg %p1507_p3  ;;  %s272_s24 = sshll.u32 %s1419_s23, 4  ;;  %s273_s24 = int_to_ptr.vmem [resolvable:$true] %s272_s24 }
   0xd   : > { %s1421_s26 = smov 8   ;;  %s259_s14 = sshll.u32 %s1700_s3, 4  ;;  %s260_s14 = int_to_ptr.hbm [resolvable:$true] %s259_s14 }
   0xe   : > { %p1518_p5 = pnand %p1055_p4, %p71_p1  ;;  %s1422_s16 = smov [#allocation10]  }
   0xf   : > { %s299_s17 = sshll.u32 %s1422_s16, 4  ;;  %s1423_s20 = smov [#allocation6]   ;;  %s300_s17 = int_to_ptr.vmem [resolvable:$true] %s299_s17 }
  0x10   : > { %1058 = dma.hbm_to_vmem [thread:$0]  (!%p1518_p5), %s245_s11, 512, %s247_s15, [#allocation5], %s1420_s25, %s1420_s25, %s1421_s26  }
  0x11   : > { %1064 = dma.hbm_to_vmem [thread:$0]  (!%p1518_p5), %s271_s18, 512, %s273_s24, [#allocation8], %s1420_s25, %s1420_s25, %s1421_s26  }
  0x12   : > { %1070 = dma.hbm_to_vmem [thread:$0]  (!%p1518_p5), %s298_s22, 16, %s300_s17, [#allocation11]  }
  0x13   : > { %s261_s21 = sshll.u32 %s1423_s20, 4  ;;  %s285_s18 = sshll.u32 %s1702_s5, 4  ;;  %s262_s21 = int_to_ptr.vmem [resolvable:$true] %s261_s21  ;;  %s286_s18 = int_to_ptr.hbm [resolvable:$true] %s285_s18 }
  0x14   : > { %1061 = dma.hbm_to_vmem [thread:$0]  (!%p1518_p5), %s260_s14, 16, %s262_s21, [#allocation5]  }
  0x15   : > { %s309_s22 = sshll.u32 %s1704_s7, 4  ;;  %s1424_s25 = smov [#allocation9]   ;;  %s310_s22 = int_to_ptr.hbm [resolvable:$true] %s309_s22 }
  0x16   : > { %s287_s26 = sshll.u32 %s1424_s25, 4  ;;  %s1425_s9 = smov [#allocation12]   ;;  %s288_s26 = int_to_ptr.vmem [resolvable:$true] %s287_s26 }
  0x17   : > { %1067 = dma.hbm_to_vmem [thread:$0]  (!%p1518_p5), %s286_s18, 16, %s288_s26, [#allocation8]  }
  0x18   : > { %s311_s10 = sshll.u32 %s1425_s9, 4  ;;  %s1547_s14 = sadd.s32 1, %s1416_s30   ;;  %s312_s10 = int_to_ptr.vmem [resolvable:$true] %s311_s10 }
  0x19   : > { %1073 = dma.hbm_to_vmem [thread:$0]  (!%p1518_p5), %s310_s22, 16, %s312_s10, [#allocation11]  }
  0x1a   : > { %s54_s16 = ssub.s32 %s1416_s30, %s1547_s14  ;;  %s57_s17 = sadd.s32 1, %s1412_s29 }
  0x1b   : > { %p55_p6 = scmp.eq.s32.totalorder %s54_s16, 0  ;;  %p64_p7 = scmp.ne.s32.totalorder %s1412_s29, %s1408_s28 }
  0x1c   : > { %p65_p8 = scmp.eq.s32.totalorder %s1416_s30, 0  ;;  %p70_p9 = scmp.ne.s32.totalorder %s1408_s28, %s1404_s27 }
  0x1d   : > { %s1558_s20 = scalar_select %p55_p6, %s1412_s29, %s57_s17  }
  0x1e   : > { %p1562_p10 = por %p71_p1, %p70_p9  ;;  %p1084_p11 = scmp.lt.s32.totalorder %s1416_s30, 2 }
  0x1f   : > { %s329_s11 = sand.u32 1, %s1412_s29   ;;  %s1002_s19 = sshll.u32 %s1416_s30, 3 }
  0x20   : > { %p66_p12 = por %p65_p8, %p64_p7  ;;  %s1001_s15 = sshll.u32 %s329_s11, 3 }
  0x21   : > { %s337_s24 = scalar_lea.hbm %s1698_s1, %s1002_s19  ;;  %s333_s25 = scalar_lea.vmem [#allocation2], %s1001_s15 }
  0x22   : > { %s339_s22 = sshll.u32 %s337_s24, 4  ;;  %s341_s26 = sshll.u32 %s333_s25, 4  ;;  %s340_s22 = int_to_ptr.hbm [resolvable:$true] %s339_s22  ;;  %s342_s26 = int_to_ptr.vmem [resolvable:$true] %s341_s26 }
  0x23   : > { %p1572_p13 = pnand %p1084_p11, %p66_p12  ;;  %s330_s9 = scalar_lea.sflag [#allocation3], %s329_s11 }
  0x24   : > { %s1340_s10 = sshra.s32 %s340_s22, 4  ;;  %s1347_s19 = scalar_lea.hbm %s1698_s1, 16  ;;  %s1341_s10 = int_to_ptr.hbm [resolvable:$true] %s1340_s10 }
  0x25   : > { %s1342_s30 = scalar_lea.hbm %s1341_s10, 8  ;;  %p1344_p2 = pneg %p1572_p13 }
  0x26   : > { %p1343_p0 = scmp.ne.s32.totalorder %s1341_s10, %s1342_s30  ;;  %p1348_p6 = scmp.lt.s32.totalorder %s1341_s10, %s1698_s1 }
  0x27   : > { %p1349_p7 = scmp.lt.s32.totalorder %s1347_s19, %s1342_s30 }
  0x28   : > { %p1345_p4 = pnand %p1344_p2, %p1343_p0 }
  0x29   : > { %p1350_p8 = por %p1349_p7, %p1348_p6 }
  0x2a   : > { %p1346_p5 = pneg %p1345_p4 }
  0x2c   : > { %p1351_p9 = pnand %p1350_p8, %p1346_p5 }
  0x2e   : > { %1354 = shalt.err (!%p1351_p9)
}
  0x2f   : > { %1077 = dma.hbm_to_vmem [thread:$0]  (!%p1572_p13), %s340_s22, 128, %s342_s26, %s330_s9  }
  0x30   : > { %350 = sbr.rel (%p1507_p3) target bundleno = 1793 (0x701), region = 52  ;;  %s352_s11 = sand.u32 (!%p1507_p3), 1, %s1408_s28  }
  0x31   : > { %s1589_s23 = sshll.u32 (!%p1507_p3), %s352_s11, 3  ;;  %s353_s24 = scalar_lea.sflag (!%p1507_p3), [#allocation3], %s352_s11 }
  0x32   : > { %s356_s25 = scalar_lea.vmem (!%p1507_p3), [#allocation2], %s1589_s23 }
  0x35   : > { %1387 = dma.done.wait (%p1562_p10), %s353_s24, 128  }
  0x36   : > { %1389 = vsyncadd (%p1562_p10), %s353_s24, 4294967168 }
  0x37   : > { %1391 = dma.done.wait (%p71_p1), [#allocation5], 528  }
  0x38   : > { %1393 = vsyncadd (%p71_p1), [#allocation5], 4294966768 }
  0x39   : > { %1395 = dma.done.wait (%p71_p1), [#allocation8], 528  }
  0x3a   : > { %1397 = vsyncadd (%p71_p1), [#allocation8], 4294966768 }
  0x3b   : > { %1399 = dma.done.wait (%p71_p1), [#allocation11], 32  }
  0x3c   : > { %1401 = vsyncadd (%p71_p1), [#allocation11], 4294967264  ;;  %v435_v0 = vld [vmem:[#allocation4 + $0x10] sm:$0xff]  ;;  %v436_v1 = vld [vmem:[#allocation4 + $0x18] sm:$0xff]  ;;  %s1426_s13 = smov 96   ;;  %p423_p1 = scmp.lt.s32.totalorder %s1502_s12, 1 }
  0x3d   : > { %v433_v2 = vld [vmem:[#allocation4] sm:$0xff]  ;;  %v439_v3 = vpack.c.bf16 %v435_v0, %v435_v0  ;;  %v440_v4 = vpack.c.bf16 %v436_v1, %v436_v1  ;;  %v434_v5 = vld [vmem:[#allocation4 + $0x8] sm:$0xff]  ;;  %vm459_vm0 = vcmask 261120   ;;  %v442_v18 = vld [vmem:[%s356_s25] sm:$0xff]  ;;  %vm513_vm1 = vcmask 64512   ;;  %s1427_s9 = smov 120  }
  0x3e   : > { %v437_v6 = vpack.c.bf16 %v433_v2, %v433_v2  ;;  %v438_v7 = vpack.c.bf16 %v434_v5, %v434_v5  ;;  %s1715_s12 = smov (!%p423_p1, %s1502_s12), 1  ;;  %v1138_v16 = vld [vmem:[#allocation6] ss:$0 sm:$0xff]  ;;  %v476_v20 = vpack.c.bf16 %v442_v18, %v442_v18  ;;  %s1428_s10 = smov 104   ;;  %v502_v32 = vld [vmem:[#allocation7] sm:$0xff]  ;;  %vm551_vm2 = vcmask 1043456  }
  0x3f   : > { %v453_v8 = vunpack.c.l.b16 %v439_v3  ;;  %v454_v9 = vunpack.c.l.b16 %v440_v4  ;;  %s1011_s21 = sshll.u32 %s1715_s12, 3  ;;  %483 = vrot.lane.b32.xlu1 %v1138_v16, %s1426_s13  ;;  %v506_v33 = vpack.c.bf16 %v502_v32, %v502_v32  ;;  %s1429_s30 = smov 112  }
  0x40   : > { %v451_v11 = vunpack.c.l.b16 %v437_v6  ;;  %v452_v12 = vunpack.c.l.b16 %v438_v7  ;;  %s426_s27 = scalar_lea.vmem %s1697_s0, %s1011_s21  ;;  %s1430_s16 = smov 88  }
  0x41   : > { %v456_v10 = vpack.c.b16 %v454_v9, %v453_v8  ;;  %v1620_v14 = vld [vmem:[%s426_s27] sm:$0xff]  ;;  %v650_v34 = vsel %vm551_vm2, %v506_v33, 0  ;;  %s1431_s17 = smov 72   ;;  %s1432_s19 = smov 80  }
  0x42   : > { %v455_v13 = vpack.c.b16 %v452_v12, %v451_v11  ;;  %v443_v15 = vpack.c.bf16 %v1620_v14, %v1620_v14  ;;  %v503_v33 = vld [vmem:[#allocation7 + $0x8] sm:$0xff]  ;;  %s430_s11 = scalar_lea.vmem %s1705_s8, %s1011_s21 }
  0x43   : > { %479 = vrot.lane.b32.xlu0 %v456_v10, %s1426_s13  ;;  %469 = vmatpush.bf16.msra.mxu0 %v456_v10 }
  0x47   : > { %470 = vmatpush.bf16.msra.mxu0 %v455_v13 }
  0x4a   : > { %1013 = vmatmul.msk.bf16.vlgmr.msra.gmra.mxu0 %vm459_vm0, %v443_v15 }
  0x4b   : > { %477 = vrot.lane.b32.xlu0 %v455_v13, %s1426_s13 }
  0xb1   : > { %v484_v23 = vpop.permute.xlu1 %483 }
  0xb5   : > { %v480_v17 = vpop.permute.xlu0 %479 }
  0xb6   : > { %495 = vmatpush.bf16.msra.mxu1 %v480_v17 }
  0xbd   : > { %v478_v19 = vpop.permute.xlu0 %477 }
  0xbe   : > { %496 = vmatpush.bf16.msra.mxu1 %v478_v19 }
  0xc1   : > { %1014 = vmatmul.msk.bf16.vlgmr.msra.gmra.mxu1 %vm459_vm0, %v476_v20 }
  0xc7   : > { %v472_v21 = vpop.f32.mrf.mxu0 }
  0xc8   : > { %v473_v25 = vadd.f32 %v1138_v16, %v472_v21 }
  0xca   : > { %v510_v28 = vmul.f32 0.35355338, %v473_v25 }
  0xcc   : > { %v511_v31 = vpack.c.bf16 %v510_v28, %v510_v28 }
  0xcf   : > { %v474_v22 = vpop.f32.mrf.mxu0 }
 0x13e   : > { %v498_v24 = vpop.f32.mrf.mxu1 }
 0x13f   : > { %v499_v26 = vadd.f32 %v498_v24, %v484_v23 }
 0x141   : > { %v1629_v27 = vpack.c.bf16 %v499_v26, %v499_v26 }
 0x143   : > { %572 = vrot.lane.b32.xlu0 %v1629_v27, %s1427_s9  ;;  %v518_v29 = vsel %vm513_vm1, %v1629_v27, 0 }
 0x144   : > { %527 = vmatpush.bf16.xpose.msra.mxu2 %v518_v29 }
 0x146   : > { %v500_v30 = vpop.f32.mrf.mxu1 }
 0x14b   : > { %570 = vrot.lane.b32.xlu0 %v511_v31, %s1427_s9  ;;  %1015 = vmatmul.msk.bf16.vlgmr.msra.gmra.mxu2 %vm513_vm1, %v511_v31 }
 0x14c   : > { %659 = vmatpush.bf16.msrb.mxu2 %v650_v34  ;;  %v507_v34 = vpack.c.bf16 %v503_v33, %v503_v33 }
 0x153   : > { %744 = vrot.lane.b32.xlu0 %v1629_v27, %s1428_s10 }
 0x15b   : > { %742 = vrot.lane.b32.xlu0 %v511_v31, %s1428_s10 }
 0x1b5   : > { %v573_v35 = vpop.permute.xlu0 %572 }
 0x1b6   : > { %v578_v52 = vsel %vm513_vm1, %v573_v35, 0  ;;  %v631_v35 = vsel %vm551_vm2, %v507_v34, 0 }
 0x1b7   : > { %640 = vmatpush.bf16.msrb.mxu1 %v631_v35 }
 0x1bd   : > { %v571_v36 = vpop.permute.xlu0 %570 }
 0x1c5   : > { %v745_v37 = vpop.permute.xlu0 %744 }
 0x1c6   : > { %v750_v38 = vsel %vm513_vm1, %v745_v37, 0 }
 0x1c7   : > { %759 = vmatpush.bf16.xpose.msra.mxu2 %v750_v38 }
 0x1cd   : > { %v743_v62 = vpop.permute.xlu0 %742 }
 0x1ce   : > { %v529_v39 = vpop.f32.mrf.mxu2 }
 0x1cf   : > { %v533_v40 = vsel %vm513_vm1, %v529_v39, -inf }
 0x1d0   : > { %534 = vmax.xlane.f32.xlu1 %v533_v40 }
 0x1d6   : > { %v531_v41 = vpop.f32.mrf.mxu2 }
 0x243   : > { %v535_v42 = vpop.xlane.xlu1 %534 }
 0x244   : > { %v536_v43 = vsub.f32 %v529_v39, %v535_v42 }
 0x246   : > { %v537_v44 = vmul.f32 1.442695, %v536_v43 }
 0x248   : > { %1142 = vpow2.f32 %v537_v44 }
 0x24e   : > { %v1143_v45 = vpop.eup %1142 }
 0x24f   : > { %v539_v46 = vsel %vm513_vm1, %v1143_v45, 0.0 }
 0x250   : > { %540 = vadd.xlane.f32.xlu2 %v539_v46 }
 0x268   : > { %546 = vrot.lane.b32.xlu2 %v1629_v27, %s1426_s13 }
 0x270   : > { %667 = vrot.lane.b32.xlu2 %v1629_v27, %s1429_s30 }
 0x278   : > { %665 = vrot.lane.b32.xlu2 %v511_v31, %s1429_s30 }
 0x2c3   : > { %v541_v47 = vpop.xlane.xlu2 %540 }
 0x2c4   : > { %1144 = vrcp.f32 %v541_v47 }
 0x2ca   : > { %v1145_v48 = vpop.eup %1144 }
 0x2cb   : > { %v547_v49 = vpop.permute.xlu2 %546  ;;  %v543_v50 = vmul.f32 %v1145_v48, %v1143_v45  ;;  %v504_v48 = vld [vmem:[#allocation7 + $0x10] sm:$0xff] }
 0x2cc   : > { %v553_v51 = vsel %vm551_vm2, %v547_v49, 0  ;;  %v508_v49 = vpack.c.bf16 %v504_v48, %v504_v48 }
 0x2cd   : > { %562 = vmatpush.bf16.msra.mxu3 %v553_v51  ;;  %v544_v53 = vpack.c.bf16 %v543_v50, %v543_v50  ;;  %v505_v51 = vld [vmem:[#allocation7 + $0x18] sm:$0xff] }
 0x2ce   : > { %v726_v50 = vsel %vm551_vm2, %v508_v49, 0 }
 0x2cf   : > { %735 = vmatpush.bf16.msra.mxu1 %v726_v50 }
 0x2d0   : > { %1016 = vmatmul.msk.bf16.vlgmr.msra.gmra.mxu3 %vm513_vm1, %v544_v53 }
 0x2d1   : > { %587 = vmatpush.bf16.xpose.msrb.mxu3 %v578_v52  ;;  %v509_v52 = vpack.c.bf16 %v505_v51, %v505_v51 }
 0x2d3   : > { %v668_v54 = vpop.permute.xlu2 %667  ;;  %v803_v53 = vsel %vm551_vm2, %v509_v52, 0 }
 0x2d4   : > { %v673_v55 = vsel %vm513_vm1, %v668_v54, 0 }
 0x2d9   : > { %682 = vmatpush.bf16.xpose.msra.mxu3 %v673_v55 }
 0x2db   : > { %v666_v56 = vpop.permute.xlu2 %665 }
 0x2e0   : > { %1017 = vmatmul.msk.bf16.vlgmr.msrb.gmra.mxu3 %vm513_vm1, %v571_v36 }
 0x2f0   : > { %1021 = vmatmul.msk.bf16.vlgmr.msra.gmra.mxu3 %vm513_vm1, %v666_v56 }
 0x353   : > { %v564_v57 = vpop.f32.mrf.mxu3 }
 0x354   : > { %v568_v58 = vpack.c.bf16 %v564_v57, %v564_v57 }
 0x356   : > { %1020 = vmatmul.msk.bf16.vlgmr.msrb.gmra.mxu2 %vm513_vm1, %v568_v58 }
 0x35b   : > { %v566_v59 = vpop.f32.mrf.mxu3 }
 0x363   : > { %v589_v60 = vpop.f32.mrf.mxu3 }
 0x364   : > { %v593_v61 = vsel %vm513_vm1, %v589_v60, -inf }
 0x365   : > { %594 = vmax.xlane.f32.xlu0 %v593_v61 }
 0x366   : > { %1024 = vmatmul.msk.bf16.vlgmr.msra.gmra.mxu2 %vm513_vm1, %v743_v62 }
 0x36b   : > { %v591_v63 = vpop.f32.mrf.mxu3 }
 0x373   : > { %v684_v0 = vpop.f32.mrf.mxu3 }
 0x374   : > { %v688_v1 = vsel %vm513_vm1, %v684_v0, -inf }
 0x375   : > { %689 = vmax.xlane.f32.xlu1 %v688_v1  ;;  %v1139_v1 = vld [vmem:[#allocation9] ss:$0 sm:$0xff] }
 0x37b   : > { %v686_v2 = vpop.f32.mrf.mxu3 }
 0x3d8   : > { %v595_v3 = vpop.xlane.xlu0 %594 }
 0x3d9   : > { %v596_v4 = vsub.f32 %v589_v60, %v595_v3  ;;  %v1653_v5 = vpop.f32.mrf.mxu2 }
 0x3db   : > { %v597_v6 = vmul.f32 1.442695, %v596_v4 }
 0x3dd   : > { %1146 = vpow2.f32 %v597_v6 }
 0x3e1   : > { %v663_v7 = vpop.f32.mrf.mxu2 }
 0x3e3   : > { %v1147_v8 = vpop.eup %1146 }
 0x3e4   : > { %v599_v9 = vsel %vm513_vm1, %v1147_v8, 0.0 }
 0x3e5   : > { %600 = vadd.xlane.f32.xlu1 %v599_v9 }
 0x3e8   : > { %v690_v10 = vpop.xlane.xlu1 %689 }
 0x3e9   : > { %v691_v11 = vsub.f32 %v684_v0, %v690_v10  ;;  %v761_v12 = vpop.f32.mrf.mxu2 }
 0x3ea   : > { %v765_v13 = vsel %vm513_vm1, %v761_v12, -inf }
 0x3eb   : > { %v692_v15 = vmul.f32 1.442695, %v691_v11  ;;  %766 = vmax.xlane.f32.xlu2 %v765_v13 }
 0x3ed   : > { %1148 = vpow2.f32 %v692_v15 }
 0x3f1   : > { %v763_v16 = vpop.f32.mrf.mxu2 }
 0x3f3   : > { %v1149_v17 = vpop.eup %1148 }
 0x3f4   : > { %v694_v18 = vsel %vm513_vm1, %v1149_v17, 0.0 }
 0x3f5   : > { %695 = vadd.xlane.f32.xlu0 %v694_v18 }
 0x3fe   : > { %605 = vrot.lane.b32.xlu1 %v1629_v27, %s1430_s16 }
 0x406   : > { %777 = vrot.lane.b32.xlu1 %v1629_v27, %s1431_s17 }
 0x458   : > { %v601_v22 = vpop.xlane.xlu1 %600 }
 0x45e   : > { %v767_v19 = vpop.xlane.xlu2 %766 }
 0x45f   : > { %v768_v20 = vsub.f32 %v761_v12, %v767_v19 }
 0x461   : > { %v769_v21 = vmul.f32 1.442695, %v768_v20 }
 0x463   : > { %1150 = vpow2.f32 %v769_v21 }
 0x464   : > { %1152 = vrcp.f32 %v601_v22 }
 0x468   : > { %v696_v36 = vpop.xlane.xlu0 %695 }
 0x469   : > { %v1151_v23 = vpop.eup %1150  ;;  %1154 = vrcp.f32 %v696_v36 }
 0x46a   : > { %v771_v24 = vsel %vm513_vm1, %v1151_v23, 0.0  ;;  %v1153_v25 = vpop.eup %1152 }
 0x46b   : > { %772 = vadd.xlane.f32.xlu2 %v771_v24  ;;  %v603_v26 = vmul.f32 %v1153_v25, %v1147_v8  ;;  %v1141_v25 = vld [vmem:[#allocation12] ss:$0 sm:$0xff] }
 0x46d   : > { %v604_v30 = vpack.c.bf16 %v603_v26, %v603_v26 }
 0x46f   : > { %v1155_v38 = vpop.eup %1154 }
 0x470   : > { %v606_v28 = vpop.permute.xlu1 %605  ;;  %v698_v40 = vmul.f32 %v1155_v38, %v1149_v17 }
 0x471   : > { %v611_v29 = vsel %vm551_vm2, %v606_v28, 0 }
 0x472   : > { %620 = vmatpush.bf16.msrb.mxu0 %v611_v29  ;;  %v699_v45 = vpack.c.bf16 %v698_v40, %v698_v40 }
 0x475   : > { %1018 = vmatmul.msk.bf16.vlgmr.msrb.gmra.mxu0 %vm513_vm1, %v604_v30 }
 0x478   : > { %v778_v31 = vpop.permute.xlu1 %777 }
 0x479   : > { %v783_v32 = vsel %vm551_vm2, %v778_v31, 0 }
 0x47a   : > { %792 = vmatpush.bf16.msrb.mxu3 %v783_v32 }
 0x483   : > { %700 = vrot.lane.b32.xlu2 %v1629_v27, %s1432_s19 }
 0x4de   : > { %v773_v37 = vpop.xlane.xlu2 %772 }
 0x4df   : > { %1156 = vrcp.f32 %v773_v37 }
 0x4e5   : > { %v1157_v39 = vpop.eup %1156 }
 0x4e6   : > { %v775_v41 = vmul.f32 %v1157_v39, %v1151_v23  ;;  %v701_v42 = vpop.permute.xlu2 %700  ;;  %v1140_v23 = vld [vmem:[#allocation10] ss:$0 sm:$0xff] }
 0x4e7   : > { %v706_v43 = vsel %vm551_vm2, %v701_v42, 0 }
 0x4e8   : > { %v776_v44 = vpack.c.bf16 %v775_v41, %v775_v41  ;;  %715 = vmatpush.bf16.msra.mxu0 %v706_v43 }
 0x4ea   : > { %1025 = vmatmul.msk.bf16.vlgmr.msrb.gmra.mxu3 %vm513_vm1, %v776_v44 }
 0x4eb   : > { %1022 = vmatmul.msk.bf16.vlgmr.msra.gmra.mxu0 %vm513_vm1, %v699_v45 }
 0x4ec   : > { %812 = vmatpush.bf16.msrb.mxu0 %v803_v53 }
 0x4f2   : > { %v622_v27 = vpop.f32.mrf.mxu0 }
 0x4f3   : > { %v626_v46 = vpack.c.bf16 %v622_v27, %v622_v27 }
 0x4f5   : > { %1019 = vmatmul.msk.bf16.vlgmr.msrb.gmra.mxu1 %vm513_vm1, %v626_v46 }
 0x4fa   : > { %v624_v47 = vpop.f32.mrf.mxu0 }
 0x568   : > { %v717_v54 = vpop.f32.mrf.mxu0 }
 0x569   : > { %v721_v55 = vpack.c.bf16 %v717_v54, %v717_v54 }
 0x56b   : > { %1023 = vmatmul.msk.bf16.vlgmr.msra.gmra.mxu1 %vm513_vm1, %v721_v55 }
 0x56d   : > { %v794_v56 = vpop.f32.mrf.mxu3 }
 0x56e   : > { %v798_v57 = vpack.c.bf16 %v794_v56, %v794_v56 }
 0x570   : > { %v719_v58 = vpop.f32.mrf.mxu0  ;;  %1026 = vmatmul.msk.bf16.vlgmr.msrb.gmra.mxu0 %vm513_vm1, %v798_v57 }
 0x572   : > { %v642_v59 = vpop.f32.mrf.mxu1 }
 0x573   : > { %v662_v63 = vadd.f32 %v1653_v5, %v642_v59 }
 0x575   : > { %v796_v60 = vpop.f32.mrf.mxu3 }
 0x57a   : > { %v644_v61 = vpop.f32.mrf.mxu1 }
 0x5e8   : > { %v737_v62 = vpop.f32.mrf.mxu1 }
 0x5e9   : > { %v741_v0 = vadd.f32 %v737_v62, %v662_v63 }
 0x5ed   : > { %v814_v2 = vpop.f32.mrf.mxu0 }
 0x5ee   : > { %v818_v3 = vadd.f32 %v814_v2, %v741_v0 }
 0x5f0   : > { %v823_v4 = vadd.f32 %v1139_v1, %v818_v3  ;;  %v739_v6 = vpop.f32.mrf.mxu1 }
 0x5f2   : > { %v824_v7 = vadd.f32 %v823_v4, %v1620_v14 }
 0x5f4   : > { %v825_v8 = vsel %vm459_vm0, %v824_v7, 0.0 }
 0x5f5   : > { %v816_v9 = vpop.f32.mrf.mxu0  ;;  %826 = vadd.xlane.f32.xlu0 %v825_v8 }
 0x668   : > { %v827_v10 = vpop.xlane.xlu0 %826 }
 0x669   : > { %v828_v11 = vmul.f32 0.03125, %v827_v10 }
 0x66b   : > { %v829_v12 = vsub.f32 %v824_v7, %v828_v11 }
 0x66d   : > { %v830_v13 = vmul.f32 %v829_v12, %v829_v12 }
 0x66f   : > { %v831_v15 = vsel %vm459_vm0, %v830_v13, 0.0 }
 0x670   : > { %832 = vadd.xlane.f32.xlu1 %v831_v15 }
 0x6e3   : > { %v833_v5 = vpop.xlane.xlu1 %832 }
 0x6e4   : > { %v834_v16 = vmul.f32 0.03125, %v833_v5 }
 0x6e6   : > { %v835_v17 = vadd.f32 1e-05, %v834_v16 }
 0x6e8   : > { %1158 = vrsqrt.f32 %v835_v17  ;;  %vm842_vm4 = vweird.f32 %v835_v17 }
 0x6ee   : > { %v1159_v18 = vpop.eup %1158 }
 0x6ef   : > { %v837_v19 = vmul.f32 %v1159_v18, %v835_v17  ;;  %vm843_vm3 = vweird.f32 %v1159_v18 }
 0x6f0   : > { %vm844_vm5 = vmor %vm842_vm4, %vm843_vm3 }
 0x6f1   : > { %v838_v20 = vmul.f32 %v1159_v18, %v837_v19 }
 0x6f3   : > { %v839_v14 = vmul.f32 0.5, %v838_v20 }
 0x6f5   : > { %v840_v21 = vsub.f32 1.5, %v839_v14 }
 0x6f7   : > { %v841_v22 = vmul.f32 %v1159_v18, %v840_v21 }
 0x6f9   : > { %v845_v24 = vsel %vm844_vm5, %v1159_v18, %v841_v22 }
 0x6fa   : > { %v846_v26 = vmul.f32 %v845_v24, %v829_v12 }
 0x6fc   : > { %v851_v28 = vmul.f32 %v1140_v23, %v846_v26 }
 0x6fe   : > { %v856_v29 = vadd.f32 %v1141_v25, %v851_v28 }
 0x700   : > { %857 = vst.msk [vmem:[%s430_s11] sm:$0xff] %vm459_vm0, %v856_v29 }
 0x701 PF: > { %p21_p3 = scmp.ge.s32.totalorder %s1547_s14, 4   ;;  %s1710_s27 = smov %s1408_s28 }
 0x702   : > { %s1711_s28 = smov %s1412_s29  ;;  %s1712_s29 = smov %s1558_s20 }
 0x703   : > { %s1713_s30 = smov %s1547_s14  ;;  %23 = sbr.rel (!%p21_p3) target bundleno = 6 (0x6), region = 119 }
 0x708   :  { %877 = vsyncpa [#allocation3], 1 }
 0x709   :  { %879 = vsyncpa [#allocation3 + $0x1], 1 }
 0x70a   :  { %880 = vsyncpa [#allocation5], 1 }
 0x70b   :  { %881 = vsyncpa [#allocation8], 1 }
 0x70c   :  { %882 = vsyncpa [#allocation11], 1 }

// kernel: causal_decoder.10
= control target key start
LH: loop header
LB: loop body
LE: loop exit
PB: predicated region body
PF: predicated region fallthrough
CT: control target
= control target key end

     0   :  { %s845_s24 = smov 0   ;;  %s972_s0 = inlined_call_operand.vmem [shape: f32[2,8,32], index: 0, kind: input, shape index: {}]   ;;  %s973_s1 = inlined_call_operand.vmem [shape: f32[32,96], index: 1, kind: input, shape index: {}]   ;;  %s974_s2 = inlined_call_operand.vmem [shape: f32[1,96], index: 2, kind: input, shape index: {}]   ;;  %s975_s3 = inlined_call_operand.vmem [shape: f32[32,32], index: 3, kind: input, shape index: {}]   ;;  %s976_s4 = inlined_call_operand.vmem [shape: f32[1,32], index: 4, kind: input, shape index: {}]   ;;  %s977_s5 = inlined_call_operand.vmem [shape: f32[1,32], index: 5, kind: input, shape index: {}]   ;;  %s978_s6 = inlined_call_operand.vmem [shape: f32[1,32], index: 6, kind: input, shape index: {}]   ;;  %s979_s7 = inlined_call_operand.vmem [shape: f32[2,8,32], index: 7, kind: output, shape index: {}]  }
   0x1 LB: > { %s721_s25 = sadd.s32 4294967295, %s791_s24   ;;  %p725_p0 = scmp.ge.s32.totalorder %s791_s24, 1  ;;  %s791_s24 = sphi %s845_s24, %s17_s24  }
   0x2   : > { %p236_p1 = scmp.lt.s32.totalorder %s791_s24, 3 }
   0x4   : > { %p237_p2 = pnand %p725_p0, %p236_p1 }
   0x5   : > { %p266_p3 = scmp.lt.s32.totalorder (!%p237_p2), %s721_s25, 1  ;;  %s793_s17 = smov (!%p237_p2), 88  }
   0x6   : > { %240 = sbr.rel (%p237_p2) target bundleno = 1750 (0x6d6), region = 48  ;;  %s794_s18 = smov (!%p237_p2), 96  }
   0x7   : > { %s795_s19 = smov (!%p237_p2), 120   ;;  %s796_s20 = smov (!%p237_p2), 80  }
   0x8   : > { %s797_s21 = smov (!%p237_p2), 72   ;;  %s798_s22 = smov (!%p237_p2), 112  }
   0x9   : > { %s800_s27 = smov (!%p237_p2), 56   ;;  %s801_s28 = smov (!%p237_p2), 40  }
   0xa   : > { %s802_s29 = smov (!%p237_p2), 64   ;;  %s803_s30 = smov (!%p237_p2), 104  }
   0xb   : > { %v278_v0 = vld [vmem:[%s973_s1 + $0x10] sm:$0xff]  ;;  %v279_v1 = vld [vmem:[%s973_s1 + $0x18] sm:$0xff]  ;;  %v276_v2 = vld [vmem:[%s973_s1] sm:$0xff]  ;;  %s981_s25 = smov (!%p266_p3, %s721_s25), 1  ;;  %vm287_vm0 = vcmask 261120   ;;  %vm324_vm1 = vcmask 64512   ;;  %v304_v28 = vlaneseq }
   0xc   : > { %v281_v3 = vpack.c.bf16 %v279_v1, %v278_v0  ;;  %v277_v4 = vld [vmem:[%s973_s1 + $0x8] sm:$0xff]  ;;  %s726_s11 = sshll.u32 %s981_s25, 3  ;;  %v763_v8 = vld [vmem:[%s974_s2] ss:$0 sm:$0xff]  ;;  %vm361_vm2 = vcmask 1043456   ;;  %s804_s10 = smov 48  }
   0xd   : > { %v280_v5 = vpack.c.bf16 %v277_v4, %v276_v2  ;;  %s269_s14 = scalar_lea.vmem %s972_s0, %s726_s11  ;;  %v310_v20 = vld [vmem:[%s975_s3] sm:$0xff]  ;;  %v305_v29 = vshrl.u32 %v304_v28, 7  ;;  %v307_v30 = vand.u32 127, %v304_v28  ;;  %v799_v31 = vmov -1e+09   ;;  %s273_s26 = scalar_lea.vmem %s979_s7, %s726_s11 }
   0xe   : > { %297 = vmatpush.bf16.msra.mxu0 %v281_v3  ;;  %v873_v6 = vld [vmem:[%s269_s14] sm:$0xff]  ;;  %v314_v21 = vpack.c.bf16 %v310_v20, %v310_v20 }
   0xf   : > { %v283_v7 = vpack.c.bf16 %v873_v6, %v873_v6  ;;  %vm308_vm3 = vcmp.le.s32.totalorder %v307_v30, %v305_v29 }
  0x10   : > { %v460_v24 = vsel %vm361_vm2, %v314_v21, 0  ;;  %v903_v32 = vsel %vm308_vm3, 0.0, %v799_v31 }
  0x12   : > { %298 = vmatpush.bf16.msra.mxu0 %v280_v5 }
  0x15   : > { %728 = vmatmul.msk.bf16.vlgmr.msra.gmra.mxu0 %vm287_vm0, %v283_v7  ;;  %v311_v7 = vld [vmem:[%s975_s3 + $0x8] sm:$0xff] }
  0x92   : > { %v300_v9 = vpop.f32.mrf.mxu0 }
  0x93   : > { %v301_v10 = vadd.f32 %v763_v8, %v300_v9  ;;  %v315_v8 = vpack.c.bf16 %v311_v7, %v311_v7 }
  0x95   : > { %v881_v11 = vpack.c.bf16 %v301_v10, %v301_v10  ;;  %v318_v12 = vmul.f32 0.35355338, %v301_v10  ;;  %v441_v9 = vsel %vm361_vm2, %v315_v8, 0 }
  0x96   : > { %450 = vmatpush.bf16.msrb.mxu0 %v441_v9 }
  0x97   : > { %382 = vrot.lane.b32.xlu2 %v881_v11, %s793_s17  ;;  %322 = vrot.lane.b32.xlu0 %v881_v11, %s794_s18  ;;  %v885_v14 = vpack.c.bf16 %v318_v12, %v318_v12 }
  0x9a   : > { %v302_v13 = vpop.f32.mrf.mxu0 }
  0x9f   : > { %380 = vrot.lane.b32.xlu2 %v885_v14, %s795_s19 }
  0xa7   : > { %477 = vrot.lane.b32.xlu2 %v881_v11, %s796_s20 }
  0xaf   : > { %554 = vrot.lane.b32.xlu2 %v881_v11, %s797_s21 }
  0xb7   : > { %475 = vrot.lane.b32.xlu2 %v885_v14, %s798_s22 }
  0xf1   : > { %v383_v15 = vpop.permute.xlu2 %382 }
  0xf2   : > { %v388_v16 = vsel %vm324_vm1, %v383_v15, 0 }
  0xf3   : > { %397 = vmatpush.bf16.xpose.msra.mxu3 %v388_v16 }
  0xf9   : > { %v381_v17 = vpop.permute.xlu2 %380 }
  0xfa   : > { %731 = vmatmul.msk.bf16.vlgmr.msra.gmra.mxu3 %vm324_vm1, %v381_v17 }
 0x101   : > { %v478_v18 = vpop.permute.xlu2 %477 }
 0x102   : > { %v483_v19 = vsel %vm324_vm1, %v478_v18, 0 }
 0x103   : > { %492 = vmatpush.bf16.xpose.msrb.mxu3 %v483_v19 }
 0x109   : > { %v323_v22 = vpop.permute.xlu0 %322  ;;  %v555_v23 = vpop.permute.xlu2 %554 }
 0x10a   : > { %v329_v25 = vsel %vm324_vm1, %v323_v22, 0  ;;  %v560_v27 = vsel %vm324_vm1, %v555_v23, 0 }
 0x10b   : > { %338 = vmatpush.bf16.xpose.msra.mxu1 %v329_v25 }
 0x111   : > { %v476_v26 = vpop.permute.xlu2 %475 }
 0x112   : > { %729 = vmatmul.msk.bf16.vlgmr.msra.gmra.mxu1 %vm324_vm1, %v885_v14  ;;  %735 = vmatmul.msk.bf16.vlgmr.msrb.gmra.mxu3 %vm324_vm1, %v476_v26 }
 0x113   : > { %469 = vmatpush.bf16.msrb.mxu1 %v460_v24 }
 0x117   : > { %569 = vmatpush.bf16.xpose.msra.mxu1 %v560_v27 }
 0x17d   : > { %v399_v33 = vpop.f32.mrf.mxu3 }
 0x17e   : > { %v400_v34 = vadd.f32 %v399_v33, %v903_v32 }
 0x180   : > { %v403_v35 = vsel %vm324_vm1, %v400_v34, -inf }
 0x181   : > { %404 = vmax.xlane.f32.xlu2 %v403_v35 }
 0x185   : > { %v401_v36 = vpop.f32.mrf.mxu3 }
 0x18f   : > { %v340_v37 = vpop.f32.mrf.mxu1 }
 0x190   : > { %v341_v38 = vadd.f32 %v340_v37, %v903_v32 }
 0x192   : > { %v344_v39 = vsel %vm324_vm1, %v341_v38, -inf }
 0x193   : > { %345 = vmax.xlane.f32.xlu0 %v344_v39 }
 0x195   : > { %v494_v40 = vpop.f32.mrf.mxu3 }
 0x196   : > { %v910_v41 = vadd.f32 %v494_v40, %v903_v32 }
 0x197   : > { %v342_v42 = vpop.f32.mrf.mxu1 }
 0x198   : > { %v498_v43 = vsel %vm324_vm1, %v910_v41, -inf }
 0x19b   : > { %499 = vmax.xlane.f32.xlu0 %v498_v43 }
 0x19d   : > { %v496_v44 = vpop.f32.mrf.mxu3 }
 0x1f4   : > { %v405_v45 = vpop.xlane.xlu2 %404 }
 0x1f5   : > { %v406_v46 = vsub.f32 %v400_v34, %v405_v45 }
 0x1f7   : > { %v407_v47 = vmul.f32 1.442695, %v406_v46 }
 0x1f9   : > { %767 = vpow2.f32 %v407_v47 }
 0x1ff   : > { %v768_v48 = vpop.eup %767 }
 0x200   : > { %v409_v49 = vsel %vm324_vm1, %v768_v48, 0.0 }
 0x201   : > { %410 = vadd.xlane.f32.xlu0 %v409_v49 }
 0x206   : > { %v346_v50 = vpop.xlane.xlu0 %345 }
 0x207   : > { %v347_v51 = vsub.f32 %v341_v38, %v346_v50  ;;  %v313_v38 = vld [vmem:[%s975_s3 + $0x18] sm:$0xff] }
 0x208   : > { %v317_v40 = vpack.c.bf16 %v313_v38, %v313_v38 }
 0x209   : > { %v348_v52 = vmul.f32 1.442695, %v347_v51 }
 0x20a   : > { %v613_v45 = vsel %vm361_vm2, %v317_v40, 0 }
 0x20b   : > { %769 = vpow2.f32 %v348_v52 }
 0x20e   : > { %v500_v55 = vpop.xlane.xlu0 %499 }
 0x20f   : > { %v501_v20 = vsub.f32 %v910_v41, %v500_v55 }
 0x211   : > { %v770_v53 = vpop.eup %769  ;;  %v502_v21 = vmul.f32 1.442695, %v501_v20  ;;  %v766_v20 = vld [vmem:[%s978_s6] ss:$0 sm:$0xff] }
 0x212   : > { %v350_v54 = vsel %vm324_vm1, %v770_v53, 0.0 }
 0x213   : > { %351 = vadd.xlane.f32.xlu1 %v350_v54 }
 0x215   : > { %415 = vrot.lane.b32.xlu0 %v881_v11, %s800_s27 }
 0x21d   : > { %587 = vrot.lane.b32.xlu0 %v881_v11, %s801_s28 }
 0x22c   : > { %356 = vrot.lane.b32.xlu1 %v881_v11, %s802_s29 }
 0x234   : > { %552 = vrot.lane.b32.xlu1 %v885_v14, %s803_s30 }
 0x274   : > { %v411_v56 = vpop.xlane.xlu0 %410 }
 0x286   : > { %v352_v60 = vpop.xlane.xlu1 %351 }
 0x287   : > { %v416_v57 = vpop.permute.xlu0 %415  ;;  %771 = vrcp.f32 %v352_v60 }
 0x288   : > { %v421_v1 = vsel %vm361_vm2, %v416_v57, 0  ;;  %773 = vrcp.f32 %v411_v56 }
 0x289   : > { %775 = vpow2.f32 %v502_v21 }
 0x28d   : > { %v772_v61 = vpop.eup %771 }
 0x28e   : > { %v354_v62 = vmul.f32 %v772_v61, %v770_v53  ;;  %v774_v3 = vpop.eup %773 }
 0x28f   : > { %v588_v58 = vpop.permute.xlu0 %587  ;;  %v413_v4 = vmul.f32 %v774_v3, %v768_v48  ;;  %v776_v27 = vpop.eup %775  ;;  %v312_v48 = vld [vmem:[%s975_s3 + $0x10] sm:$0xff] }
 0x290   : > { %v593_v59 = vsel %vm361_vm2, %v588_v58, 0  ;;  %v355_v2 = vpack.c.bf16 %v354_v62, %v354_v62  ;;  %v504_v30 = vsel %vm324_vm1, %v776_v27, 0.0  ;;  %v316_v49 = vpack.c.bf16 %v312_v48, %v312_v48 }
 0x291   : > { %602 = vmatpush.bf16.msra.mxu3 %v593_v59  ;;  %v414_v5 = vpack.c.bf16 %v413_v4, %v413_v4  ;;  %v764_v59 = vld [vmem:[%s976_s4] ss:$0 sm:$0xff] }
 0x292   : > { %v536_v50 = vsel %vm361_vm2, %v316_v49, 0 }
 0x293   : > { %545 = vmatpush.bf16.msra.mxu0 %v536_v50 }
 0x29e   : > { %v357_v63 = vpop.permute.xlu1 %356 }
 0x29f   : > { %v363_v0 = vsel %vm361_vm2, %v357_v63, 0 }
 0x2a0   : > { %372 = vmatpush.bf16.msra.mxu2 %v363_v0 }
 0x2a3   : > { %730 = vmatmul.msk.bf16.vlgmr.msra.gmra.mxu2 %vm324_vm1, %v355_v2 }
 0x2a4   : > { %430 = vmatpush.bf16.msrb.mxu2 %v421_v1 }
 0x2a6   : > { %v553_v16 = vpop.permute.xlu1 %552 }
 0x2b3   : > { %732 = vmatmul.msk.bf16.vlgmr.msrb.gmra.mxu2 %vm324_vm1, %v414_v5 }
 0x326   : > { %v374_v10 = vpop.f32.mrf.mxu2 }
 0x327   : > { %v378_v12 = vpack.c.bf16 %v374_v10, %v374_v10 }
 0x329   : > { %734 = vmatmul.msk.bf16.vlgmr.msrb.gmra.mxu1 %vm324_vm1, %v378_v12 }
 0x32e   : > { %v376_v13 = vpop.f32.mrf.mxu2 }
 0x336   : > { %v432_v14 = vpop.f32.mrf.mxu2 }
 0x337   : > { %v436_v15 = vpack.c.bf16 %v432_v14, %v432_v14 }
 0x339   : > { %733 = vmatmul.msk.bf16.vlgmr.msrb.gmra.mxu0 %vm324_vm1, %v436_v15  ;;  %738 = vmatmul.msk.bf16.vlgmr.msra.gmra.mxu1 %vm324_vm1, %v553_v16 }
 0x33e   : > { %v434_v17 = vpop.f32.mrf.mxu2 }
 0x3a6   : > { %v471_v18 = vpop.f32.mrf.mxu1 }
 0x3ae   : > { %v473_v19 = vpop.f32.mrf.mxu1 }
 0x3b6   : > { %v452_v22 = vpop.f32.mrf.mxu0  ;;  %v571_v23 = vpop.f32.mrf.mxu1 }
 0x3b7   : > { %v472_v24 = vadd.f32 %v471_v18, %v452_v22  ;;  %v572_v25 = vadd.f32 %v571_v23, %v903_v32  ;;  %v765_v18 = vld [vmem:[%s977_s5] ss:$0 sm:$0xff] }
 0x3b9   : > { %v575_v26 = vsel %vm324_vm1, %v572_v25, -inf }
 0x3ba   : > { %576 = vmax.xlane.f32.xlu1 %v575_v26 }
 0x3be   : > { %v454_v28 = vpop.f32.mrf.mxu0  ;;  %v573_v29 = vpop.f32.mrf.mxu1 }
 0x3c2   : > { %505 = vadd.xlane.f32.xlu1 %v504_v30 }
 0x42d   : > { %v577_v31 = vpop.xlane.xlu1 %576 }
 0x42e   : > { %v578_v33 = vsub.f32 %v572_v25, %v577_v31 }
 0x430   : > { %v579_v34 = vmul.f32 1.442695, %v578_v33 }
 0x432   : > { %777 = vpow2.f32 %v579_v34 }
 0x435   : > { %v506_v32 = vpop.xlane.xlu1 %505 }
 0x436   : > { %779 = vrcp.f32 %v506_v32 }
 0x438   : > { %v778_v35 = vpop.eup %777 }
 0x439   : > { %v581_v36 = vsel %vm324_vm1, %v778_v35, 0.0 }
 0x43a   : > { %582 = vadd.xlane.f32.xlu2 %v581_v36 }
 0x43c   : > { %v780_v39 = vpop.eup %779 }
 0x43d   : > { %v508_v42 = vmul.f32 %v780_v39, %v776_v27 }
 0x452   : > { %510 = vrot.lane.b32.xlu2 %v881_v11, %s804_s10  ;;  %v509_v11 = vpack.c.bf16 %v508_v42, %v508_v42 }
 0x4ad   : > { %v583_v37 = vpop.xlane.xlu2 %582 }
 0x4ae   : > { %781 = vrcp.f32 %v583_v37 }
 0x4b4   : > { %v782_v41 = vpop.eup %781 }
 0x4b5   : > { %v585_v43 = vmul.f32 %v782_v41, %v778_v35  ;;  %v511_v44 = vpop.permute.xlu2 %510 }
 0x4b6   : > { %v516_v46 = vsel %vm361_vm2, %v511_v44, 0 }
 0x4b7   : > { %v586_v47 = vpack.c.bf16 %v585_v43, %v585_v43  ;;  %525 = vmatpush.bf16.msra.mxu2 %v516_v46 }
 0x4b9   : > { %739 = vmatmul.msk.bf16.vlgmr.msra.gmra.mxu3 %vm324_vm1, %v586_v47 }
 0x4ba   : > { %736 = vmatmul.msk.bf16.vlgmr.msra.gmra.mxu2 %vm324_vm1, %v509_v11 }
 0x4bb   : > { %622 = vmatpush.bf16.msrb.mxu2 %v613_v45 }
 0x53c   : > { %v604_v51 = vpop.f32.mrf.mxu3 }
 0x53d   : > { %v608_v52 = vpack.c.bf16 %v604_v51, %v604_v51  ;;  %v527_v53 = vpop.f32.mrf.mxu2 }
 0x53e   : > { %v531_v54 = vpack.c.bf16 %v527_v53, %v527_v53 }
 0x53f   : > { %740 = vmatmul.msk.bf16.vlgmr.msrb.gmra.mxu2 %vm324_vm1, %v608_v52 }
 0x540   : > { %737 = vmatmul.msk.bf16.vlgmr.msra.gmra.mxu0 %vm324_vm1, %v531_v54 }
 0x544   : > { %v606_v55 = vpop.f32.mrf.mxu3 }
 0x545   : > { %v529_v56 = vpop.f32.mrf.mxu2 }
 0x5bd   : > { %v547_v57 = vpop.f32.mrf.mxu0 }
 0x5be   : > { %v551_v58 = vadd.f32 %v547_v57, %v472_v24 }
 0x5c2   : > { %v624_v60 = vpop.f32.mrf.mxu2 }
 0x5c3   : > { %v628_v61 = vadd.f32 %v624_v60, %v551_v58 }
 0x5c5   : > { %v633_v62 = vadd.f32 %v764_v59, %v628_v61  ;;  %v549_v63 = vpop.f32.mrf.mxu0 }
 0x5c7   : > { %v634_v0 = vadd.f32 %v633_v62, %v873_v6 }
 0x5c9   : > { %v635_v1 = vsel %vm287_vm0, %v634_v0, 0.0 }
 0x5ca   : > { %636 = vadd.xlane.f32.xlu1 %v635_v1  ;;  %v626_v2 = vpop.f32.mrf.mxu2 }
 0x63d   : > { %v637_v3 = vpop.xlane.xlu1 %636 }
 0x63e   : > { %v638_v4 = vmul.f32 0.03125, %v637_v3 }
 0x640   : > { %v639_v5 = vsub.f32 %v634_v0, %v638_v4 }
 0x642   : > { %v640_v7 = vmul.f32 %v639_v5, %v639_v5 }
 0x644   : > { %v641_v8 = vsel %vm287_vm0, %v640_v7, 0.0 }
 0x645   : > { %642 = vadd.xlane.f32.xlu0 %v641_v8 }
 0x6b8   : > { %v643_v9 = vpop.xlane.xlu0 %642 }
 0x6b9   : > { %v644_v10 = vmul.f32 0.03125, %v643_v9 }
 0x6bb   : > { %v645_v12 = vadd.f32 1e-05, %v644_v10 }
 0x6bd   : > { %783 = vrsqrt.f32 %v645_v12  ;;  %vm652_vm5 = vweird.f32 %v645_v12 }
 0x6c3   : > { %v784_v13 = vpop.eup %783 }
 0x6c4   : > { %v647_v14 = vmul.f32 %v784_v13, %v645_v12  ;;  %vm653_vm4 = vweird.f32 %v784_v13 }
 0x6c5   : > { %vm654_vm6 = vmor %vm652_vm5, %vm653_vm4 }
 0x6c6   : > { %v648_v15 = vmul.f32 %v784_v13, %v647_v14 }
 0x6c8   : > { %v649_v6 = vmul.f32 0.5, %v648_v15 }
 0x6ca   : > { %v650_v16 = vsub.f32 1.5, %v649_v6 }
 0x6cc   : > { %v651_v17 = vmul.f32 %v784_v13, %v650_v16 }
 0x6ce   : > { %v655_v19 = vsel %vm654_vm6, %v784_v13, %v651_v17 }
 0x6cf   : > { %v656_v21 = vmul.f32 %v655_v19, %v639_v5 }
 0x6d1   : > { %v661_v22 = vmul.f32 %v765_v18, %v656_v21 }
 0x6d3   : > { %v666_v23 = vadd.f32 %v766_v20, %v661_v22 }
 0x6d5   : > { %667 = vst.msk [vmem:[%s273_s26] sm:$0xff] %vm287_vm0, %v666_v23 }
 0x6d6 PF: > { %s17_s24 = sadd.s32 1, %s791_s24  }
 0x6d7   : > { %p14_p4 = scmp.ge.s32.totalorder %s17_s24, 4  }
 0x6d9   :  { %16 = sbr.rel (!%p14_p4) target bundleno = 1 (0x1), region = 78 }

// kernel: causal_decoder.13
= control target key start
LH: loop header
LB: loop body
LE: loop exit
PB: predicated region body
PF: predicated region fallthrough
CT: control target
= control target key end

     0   :  { %8 = vsyncpa [#allocation3], 0  ;;  %s507_s0 = inlined_call_operand.vmem [shape: f32[16,32], index: 0, kind: input, shape index: {}]   ;;  %s508_s1 = inlined_call_operand.vmem [shape: f32[1,32], index: 1, kind: input, shape index: {}]   ;;  %s509_s2 = inlined_call_operand.vmem [shape: f32[1,32], index: 2, kind: input, shape index: {}]   ;;  %s510_s3 = inlined_call_operand.hbm [shape: f32[16,32], index: 3, kind: output, shape index: {}]  }
   0x1   :  { %10 = vsyncpa [#allocation3 + $0x1], 0  ;;  %s413_s12 = smov 0   ;;  %s415_s13 = smov 0  }
   0x2   :  { %s417_s14 = smov 0   ;;  %s419_s15 = smov 0  }
   0x3 LB: > { %s434_s16 = sadd.s32 4294967295, %s391_s15   ;;  %s276_s17 = sadd.s32 4294967294, %s391_s15   ;;  %s391_s15 = sphi %s419_s15, %s516_s15   ;;  %s387_s14 = sphi %s417_s14, %s515_s14   ;;  %s383_s13 = sphi %s415_s13, %s514_s13   ;;  %s379_s12 = sphi %s413_s12, %s513_s12  }
   0x4   : > { %s438_s18 = sadd.s32 1, %s391_s15   ;;  %s91_s19 = sadd.s32 1, %s387_s14 }
   0x5   : > { %s88_s20 = ssub.s32 %s391_s15, %s438_s18  ;;  %p101_p0 = scmp.ne.s32.totalorder %s387_s14, %s383_s13 }
   0x6   : > { %p89_p1 = scmp.eq.s32.totalorder %s88_s20, 0  ;;  %p102_p2 = scmp.eq.s32.totalorder %s434_s16, 1 }
   0x7   : > { %p107_p3 = scmp.ne.s32.totalorder %s383_s13, %s379_s12  ;;  %p108_p4 = scmp.eq.s32.totalorder %s276_s17, 1 }
   0x8   : > { %s449_s21 = scalar_select %p89_p1, %s387_s14, %s91_s19  }
   0x9   : > { %p451_p5 = por %p102_p2, %p101_p0  ;;  %p455_p6 = por %p108_p4, %p107_p3 }
   0xa   : > { %p279_p7 = scmp.ge.s32.totalorder %s391_s15, 1  ;;  %p139_p8 = scmp.lt.s32.totalorder %s391_s15, 3 }
   0xc   : > { %p140_p9 = pnand %p279_p7, %p139_p8 }
   0xd   : > { %p162_p10 = scmp.lt.s32.totalorder (!%p140_p9), %s434_s16, 1  ;;  %s159_s29 = sand.u32 (!%p140_p9), 1, %s383_s13  }
   0xe   : > { %143 = sbr.rel (%p140_p9) target bundleno = 295 (0x127), region = 32  ;;  %s280_s30 = sshll.u32 (!%p140_p9), %s159_s29, 3 }
   0xf   : > { %s283_s4 = sshll.u32 (!%p140_p9), %s434_s16, 3  ;;  %s161_s17 = scalar_lea.vmem (!%p140_p9), [#allocation2], %s280_s30 }
  0x10   : > { %s212_s9 = scalar_lea.hbm (!%p140_p9), %s510_s3, %s283_s4  ;;  %s202_s20 = scalar_lea.sflag (!%p140_p9), [#allocation3], %s159_s29 }
  0x11   : > { %s216_s19 = sshll.u32 (!%p140_p9), %s212_s9, 4  ;;  %s217_s19 = int_to_ptr.hbm [resolvable:$true] %s216_s19 }
  0x13   : > { %s163_s24 = scalar_select %p162_p10, %s434_s16, 1  ;;  %vm167_vm0 = vcmask 261120   ;;  %v325_v16 = vld [vmem:[%s508_s1] ss:$0 sm:$0xff] }
  0x14   : > { %v326_v19 = vld [vmem:[%s509_s2] ss:$0 sm:$0xff]  ;;  %s214_s16 = sshll.u32 %s161_s17, 4  ;;  %s215_s16 = int_to_ptr.vmem [resolvable:$true] %s214_s16 }
  0x15   : > { %s281_s25 = sshll.u32 %s163_s24, 3  ;;  %s343_s24 = sshra.s32 %s217_s19, 4  ;;  %s344_s24 = int_to_ptr.hbm [resolvable:$true] %s343_s24 }
  0x16   : > { %s165_s28 = scalar_lea.vmem %s507_s0, %s281_s25  ;;  %s345_s25 = scalar_lea.hbm %s344_s24, 8 }
  0x17   : > { %v166_v0 = vld [vmem:[%s165_s28] sm:$0xff]  ;;  %p346_p11 = scmp.ne.s32.totalorder %s344_s24, %s345_s25  ;;  %s349_s28 = scalar_lea.hbm %s510_s3, 16 }
  0x18   : > { %v168_v1 = vsel %vm167_vm0, %v166_v0, 0.0  ;;  %p350_p0 = scmp.lt.s32.totalorder %s344_s24, %s510_s3  ;;  %p351_p1 = scmp.lt.s32.totalorder %s349_s28, %s345_s25 }
  0x19   : > { %169 = vadd.xlane.f32.xlu0 %v168_v1  ;;  %p347_p12 = pnand %p346_p11, %p451_p5 }
  0x1a   : > { %p352_p2 = por %p351_p1, %p350_p0 }
  0x1b   : > { %p348_p13 = pneg %p347_p12 }
  0x1d   : > { %p353_p3 = pnand %p352_p2, %p348_p13 }
  0x8c   : > { %v170_v2 = vpop.xlane.xlu0 %169 }
  0x8d   : > { %v171_v3 = vmul.f32 0.03125, %v170_v2 }
  0x8f   : > { %v172_v4 = vsub.f32 %v166_v0, %v171_v3 }
  0x91   : > { %v173_v5 = vmul.f32 %v172_v4, %v172_v4 }
  0x93   : > { %v174_v6 = vsel %vm167_vm0, %v173_v5, 0.0 }
  0x94   : > { %175 = vadd.xlane.f32.xlu0 %v174_v6 }
 0x107   : > { %v176_v7 = vpop.xlane.xlu0 %175 }
 0x108   : > { %v177_v8 = vmul.f32 0.03125, %v176_v7 }
 0x10a   : > { %v178_v9 = vadd.f32 1e-05, %v177_v8 }
 0x10c   : > { %327 = vrsqrt.f32 %v178_v9  ;;  %vm185_vm2 = vweird.f32 %v178_v9 }
 0x112   : > { %v328_v10 = vpop.eup %327 }
 0x113   : > { %v180_v11 = vmul.f32 %v328_v10, %v178_v9  ;;  %vm186_vm1 = vweird.f32 %v328_v10 }
 0x114   : > { %vm187_vm3 = vmor %vm185_vm2, %vm186_vm1 }
 0x115   : > { %v181_v12 = vmul.f32 %v328_v10, %v180_v11 }
 0x117   : > { %v182_v13 = vmul.f32 0.5, %v181_v12 }
 0x119   : > { %v183_v14 = vsub.f32 1.5, %v182_v13 }
 0x11b   : > { %v184_v15 = vmul.f32 %v328_v10, %v183_v14 }
 0x11d   : > { %v188_v17 = vsel %vm187_vm3, %v328_v10, %v184_v15 }
 0x11e   : > { %v189_v18 = vmul.f32 %v188_v17, %v172_v4 }
 0x120   : > { %v194_v20 = vmul.f32 %v325_v16, %v189_v18 }
 0x122   : > { %v199_v21 = vadd.f32 %v326_v19, %v194_v20 }
 0x124   : > { %200 = vst.msk [vmem:[%s161_s17] sm:$0xff] %vm167_vm0, %v199_v21 }
 0x125   : > { %356 = shalt.err (!%p353_p3)
}
 0x126   : > { %286 = dma.vmem_to_hbm [thread:$0]  (%p451_p5), %s215_s16, 128, %s217_s19, %s202_s20  }
 0x127 PF: > { %p292_p4 = scmp.ge.s32.totalorder %s391_s15, 2  ;;  %s228_s29 = sand.u32 1, %s379_s12  }
 0x128   : > { %s229_s5 = scalar_lea.sflag [#allocation3], %s228_s29 }
 0x129   : > { %p289_p7 = pnand %p292_p4, %p455_p6 }
 0x12b   : > { %p290_p8 = pneg %p289_p7 }
 0x12d   : > { %374 = dma.done.wait (%p290_p8), %s229_s5, 128  }
 0x12e   : > { %376 = vsyncadd (%p290_p8), %s229_s5, 4294967168  ;;  %p13_p9 = scmp.ge.s32.totalorder %s438_s18, 4   ;;  %s513_s12 = smov %s383_s13 }
 0x12f   : > { %s514_s13 = smov %s387_s14  ;;  %s515_s14 = smov %s449_s21 }
 0x130   : > { %s516_s15 = smov %s438_s18  ;;  %15 = sbr.rel (!%p13_p9) target bundleno = 3 (0x3), region = 67 }
 0x135   :  { %235 = vsyncpa [#allocation3], 1 }
 0x136   :  { %237 = vsyncpa [#allocation3 + $0x1], 1 }

// kernel: causal_decoder.11
= control target key start
LH: loop header
LB: loop body
LE: loop exit
PB: predicated region body
PF: predicated region fallthrough
CT: control target
= control target key end

     0   :  { %13 = vsyncpa [#allocation3], 0  ;;  %s1629_s0 = inlined_call_operand.vmem [shape: f32[2,8,32], index: 0, kind: input, shape index: {}]   ;;  %s1630_s1 = inlined_call_operand.hbm [shape: f32[2,8,32], index: 1, kind: input, shape index: {}]   ;;  %s1631_s2 = inlined_call_operand.hbm [shape: f32[32,96], index: 2, kind: input, shape index: {}]   ;;  %s1632_s3 = inlined_call_operand.vmem [shape: f32[1,96], index: 3, kind: input, shape index: {}]   ;;  %s1633_s4 = inlined_call_operand.hbm [shape: f32[32,32], index: 4, kind: input, shape index: {}]   ;;  %s1634_s5 = inlined_call_operand.hbm [shape: f32[1,32], index: 5, kind: input, shape index: {}]   ;;  %s1635_s6 = inlined_call_operand.hbm [shape: f32[1,32], index: 6, kind: input, shape index: {}]   ;;  %s1636_s7 = inlined_call_operand.hbm [shape: f32[1,32], index: 7, kind: input, shape index: {}]   ;;  %s1637_s8 = inlined_call_operand.vmem [shape: f32[2,8,32], index: 8, kind: output, shape index: {}]  }
   0x1   :  { %15 = vsyncpa [#allocation3 + $0x1], 0 }
   0x2   :  { %16 = vsyncpa [#allocation5], 0 }
   0x3   :  { %17 = vsyncpa [#allocation8], 0 }
   0x4   :  { %18 = vsyncpa [#allocation11], 0  ;;  %s1412_s27 = smov 0   ;;  %s1414_s28 = smov 0  }
   0x5   :  { %s1416_s29 = smov 0   ;;  %s1418_s30 = smov 0  }
   0x6 LB: > { %s244_s11 = sshll.u32 %s1631_s2, 4  ;;  %s1436_s12 = sadd.s32 4294967295, %s1351_s30   ;;  %s1351_s30 = sphi %s1418_s30, %s1645_s30   ;;  %s1347_s29 = sphi %s1416_s29, %s1644_s29   ;;  %s1343_s28 = sphi %s1414_s28, %s1643_s28   ;;  %s1339_s27 = sphi %s1412_s27, %s1642_s27   ;;  %s245_s11 = int_to_ptr.hbm [resolvable:$true] %s244_s11 }
   0x7   : > { %p970_p0 = scmp.ge.s32.totalorder %s1351_s30, 1  ;;  %p71_p1 = scmp.eq.s32.totalorder %s1436_s12, 0 }
   0x8   : > { %p233_p2 = scmp.lt.s32.totalorder %s1351_s30, 3  ;;  %s1353_s14 = smov [#allocation4]  }
   0x9   : > { %s246_s15 = sshll.u32 %s1353_s14, 4  ;;  %s276_s18 = sshll.u32 %s1634_s5, 4  ;;  %s247_s15 = int_to_ptr.vmem [resolvable:$true] %s246_s15  ;;  %s277_s18 = int_to_ptr.hbm [resolvable:$true] %s276_s18 }
   0xa   : > { %p1441_p3 = pnand %p970_p0, %p233_p2  ;;  %s261_s22 = sshll.u32 %s1633_s4, 4  ;;  %s262_s22 = int_to_ptr.hbm [resolvable:$true] %s261_s22 }
   0xb   : > { %s1354_s23 = smov [#allocation7]   ;;  %s1355_s25 = smov 128  }
   0xc   : > { %p1026_p4 = pneg %p1441_p3  ;;  %s278_s24 = sshll.u32 %s1354_s23, 4  ;;  %s279_s24 = int_to_ptr.vmem [resolvable:$true] %s278_s24 }
   0xd   : > { %s1356_s26 = smov 8   ;;  %s288_s14 = sshll.u32 %s1635_s6, 4  ;;  %s289_s14 = int_to_ptr.hbm [resolvable:$true] %s288_s14 }
   0xe   : > { %p1452_p5 = pnand %p1026_p4, %p71_p1  ;;  %s1357_s16 = smov [#allocation6]  }
   0xf   : > { %s263_s17 = sshll.u32 %s1357_s16, 4  ;;  %s300_s21 = sshll.u32 %s1636_s7, 4  ;;  %s264_s17 = int_to_ptr.vmem [resolvable:$true] %s263_s17  ;;  %s301_s21 = int_to_ptr.hbm [resolvable:$true] %s300_s21 }
  0x10   : > { %1029 = dma.hbm_to_vmem [thread:$0]  (!%p1452_p5), %s245_s11, 512, %s247_s15, [#allocation5], %s1355_s25, %s1355_s25, %s1356_s26  }
  0x11   : > { %1035 = dma.hbm_to_vmem [thread:$0]  (!%p1452_p5), %s277_s18, 16, %s279_s24, [#allocation8]  }
  0x12   : > { %1032 = dma.hbm_to_vmem [thread:$0]  (!%p1452_p5), %s262_s22, 512, %s264_s17, [#allocation5], %s1355_s25, %s1355_s25, %s1356_s26  }
  0x13   : > { %s1358_s11 = smov [#allocation9]   ;;  %s1359_s23 = smov [#allocation10]  }
  0x14   : > { %s290_s15 = sshll.u32 %s1358_s11, 4  ;;  %s302_s24 = sshll.u32 %s1359_s23, 4  ;;  %s291_s15 = int_to_ptr.vmem [resolvable:$true] %s290_s15  ;;  %s303_s24 = int_to_ptr.vmem [resolvable:$true] %s302_s24 }
  0x15   : > { %1038 = dma.hbm_to_vmem [thread:$0]  (!%p1452_p5), %s289_s14, 16, %s291_s15, [#allocation8]  }
  0x16   : > { %1041 = dma.hbm_to_vmem [thread:$0]  (!%p1452_p5), %s301_s21, 16, %s303_s24, [#allocation11]  }
  0x17   : > { %s1476_s22 = sadd.s32 1, %s1351_s30   ;;  %s57_s26 = sadd.s32 1, %s1347_s29 }
  0x18   : > { %s54_s25 = ssub.s32 %s1351_s30, %s1476_s22  ;;  %p64_p7 = scmp.ne.s32.totalorder %s1347_s29, %s1343_s28 }
  0x19   : > { %p55_p6 = scmp.eq.s32.totalorder %s54_s25, 0  ;;  %p65_p8 = scmp.eq.s32.totalorder %s1351_s30, 0 }
  0x1a   : > { %p70_p9 = scmp.ne.s32.totalorder %s1343_s28, %s1339_s27  ;;  %p1051_p12 = scmp.lt.s32.totalorder %s1351_s30, 2 }
  0x1b   : > { %s1487_s9 = scalar_select %p55_p6, %s1347_s29, %s57_s26  }
  0x1c   : > { %p66_p10 = por %p65_p8, %p64_p7  ;;  %p1491_p11 = por %p71_p1, %p70_p9 }
  0x1d   : > { %s320_s19 = sand.u32 1, %s1347_s29   ;;  %s978_s16 = sshll.u32 %s1351_s30, 3 }
  0x1e   : > { %s977_s14 = sshll.u32 %s320_s19, 3  ;;  %s328_s15 = scalar_lea.hbm %s1630_s1, %s978_s16 }
  0x1f   : > { %s324_s18 = scalar_lea.vmem [#allocation2], %s977_s14  ;;  %s330_s21 = sshll.u32 %s328_s15, 4  ;;  %s331_s21 = int_to_ptr.hbm [resolvable:$true] %s330_s21 }
  0x20   : > { %s332_s20 = sshll.u32 %s324_s18, 4  ;;  %p1501_p13 = pnand %p1051_p12, %p66_p10  ;;  %s333_s20 = int_to_ptr.vmem [resolvable:$true] %s332_s20 }
  0x21   : > { %s321_s23 = scalar_lea.sflag [#allocation3], %s320_s19  ;;  %s1275_s24 = sshra.s32 %s331_s21, 4  ;;  %s1276_s24 = int_to_ptr.hbm [resolvable:$true] %s1275_s24 }
  0x22   : > { %s1277_s25 = scalar_lea.hbm %s1276_s24, 8  ;;  %p1279_p2 = pneg %p1501_p13 }
  0x23   : > { %p1278_p0 = scmp.ne.s32.totalorder %s1276_s24, %s1277_s25  ;;  %s1282_s14 = scalar_lea.hbm %s1630_s1, 16 }
  0x24   : > { %p1283_p6 = scmp.lt.s32.totalorder %s1276_s24, %s1630_s1  ;;  %p1284_p7 = scmp.lt.s32.totalorder %s1282_s14, %s1277_s25 }
  0x25   : > { %p1280_p4 = pnand %p1279_p2, %p1278_p0 }
  0x26   : > { %p1285_p8 = por %p1284_p7, %p1283_p6 }
  0x27   : > { %p1281_p5 = pneg %p1280_p4 }
  0x29   : > { %p1286_p9 = pnand %p1285_p8, %p1281_p5 }
  0x2b   : > { %1289 = shalt.err (!%p1286_p9)
}
  0x2c   : > { %1045 = dma.hbm_to_vmem [thread:$0]  (!%p1501_p13), %s331_s21, 128, %s333_s20, %s321_s23  }
  0x2d   : > { %341 = sbr.rel (%p1441_p3) target bundleno = 1790 (0x6fe), region = 52  ;;  %s343_s19 = sand.u32 (!%p1441_p3), 1, %s1343_s28  }
  0x2e   : > { %s1518_s11 = sshll.u32 (!%p1441_p3), %s343_s19, 3  ;;  %s344_s15 = scalar_lea.sflag (!%p1441_p3), [#allocation3], %s343_s19 }
  0x2f   : > { %s347_s18 = scalar_lea.vmem (!%p1441_p3), [#allocation2], %s1518_s11 }
  0x32   : > { %1322 = dma.done.wait (%p1491_p11), %s344_s15, 128  }
  0x33   : > { %1324 = vsyncadd (%p1491_p11), %s344_s15, 4294967168 }
  0x34   : > { %1326 = dma.done.wait (%p71_p1), [#allocation5], 1024  }
  0x35   : > { %1328 = vsyncadd (%p71_p1), [#allocation5], 4294966272 }
  0x36   : > { %1330 = dma.done.wait (%p71_p1), [#allocation8], 32  }
  0x37   : > { %1332 = vsyncadd (%p71_p1), [#allocation8], 4294967264 }
  0x38   : > { %1334 = dma.done.wait (%p71_p1), [#allocation11], 16  }
  0x39   : > { %1336 = vsyncadd (%p71_p1), [#allocation11], 4294967280  ;;  %v421_v0 = vld [vmem:[#allocation4 + $0x10] sm:$0xff]  ;;  %v422_v1 = vld [vmem:[#allocation4 + $0x18] sm:$0xff]  ;;  %s1360_s13 = smov 96   ;;  %p409_p1 = scmp.lt.s32.totalorder %s1436_s12, 1 }
  0x3a   : > { %v419_v2 = vld [vmem:[#allocation4] sm:$0xff]  ;;  %v425_v3 = vpack.c.bf16 %v421_v0, %v421_v0  ;;  %v426_v4 = vpack.c.bf16 %v422_v1, %v422_v1  ;;  %v420_v5 = vld [vmem:[#allocation4 + $0x8] sm:$0xff]  ;;  %vm445_vm0 = vcmask 261120   ;;  %v1103_v16 = vld [vmem:[%s1632_s3] ss:$0 sm:$0xff]  ;;  %vm499_vm1 = vcmask 64512  }
  0x3b   : > { %v423_v6 = vpack.c.bf16 %v419_v2, %v419_v2  ;;  %v424_v7 = vpack.c.bf16 %v420_v5, %v420_v5  ;;  %s1647_s12 = smov (!%p409_p1, %s1436_s12), 1  ;;  %469 = vrot.lane.b32.xlu1 %v1103_v16, %s1360_s13  ;;  %v428_v18 = vld [vmem:[%s347_s18] sm:$0xff]  ;;  %s1361_s25 = smov 120   ;;  %v488_v32 = vld [vmem:[#allocation6] sm:$0xff]  ;;  %vm537_vm2 = vcmask 1043456  }
  0x3c   : > { %v439_v8 = vunpack.c.l.b16 %v425_v3  ;;  %v440_v9 = vunpack.c.l.b16 %v426_v4  ;;  %s986_s10 = sshll.u32 %s1647_s12, 3  ;;  %v462_v20 = vpack.c.bf16 %v428_v18, %v428_v18  ;;  %s1362_s30 = smov 104   ;;  %v492_v33 = vpack.c.bf16 %v488_v32, %v488_v32 }
  0x3d   : > { %v437_v11 = vunpack.c.l.b16 %v423_v6  ;;  %v438_v12 = vunpack.c.l.b16 %v424_v7  ;;  %s412_s27 = scalar_lea.vmem %s1629_s0, %s986_s10  ;;  %s1363_s26 = smov 112  }
  0x3e   : > { %v442_v10 = vpack.c.b16 %v440_v9, %v439_v8  ;;  %v1549_v14 = vld [vmem:[%s412_s27] sm:$0xff]  ;;  %v636_v34 = vsel %vm537_vm2, %v492_v33, 0  ;;  %s1364_s14 = smov 88   ;;  %s1365_s16 = smov 72   ;;  %v489_v33 = vld [vmem:[#allocation6 + $0x8] sm:$0xff] }
  0x3f   : > { %v441_v13 = vpack.c.b16 %v438_v12, %v437_v11  ;;  %v429_v15 = vpack.c.bf16 %v1549_v14, %v1549_v14  ;;  %s1366_s17 = smov 80   ;;  %s416_s15 = scalar_lea.vmem %s1637_s8, %s986_s10 }
  0x40   : > { %465 = vrot.lane.b32.xlu0 %v442_v10, %s1360_s13  ;;  %455 = vmatpush.bf16.msra.mxu0 %v442_v10 }
  0x44   : > { %456 = vmatpush.bf16.msra.mxu0 %v441_v13 }
  0x47   : > { %988 = vmatmul.msk.bf16.vlgmr.msra.gmra.mxu0 %vm445_vm0, %v429_v15 }
  0x48   : > { %463 = vrot.lane.b32.xlu0 %v441_v13, %s1360_s13 }
  0xad   : > { %v470_v23 = vpop.permute.xlu1 %469 }
  0xb2   : > { %v466_v17 = vpop.permute.xlu0 %465 }
  0xb3   : > { %481 = vmatpush.bf16.msra.mxu1 %v466_v17 }
  0xba   : > { %v464_v19 = vpop.permute.xlu0 %463 }
  0xbb   : > { %482 = vmatpush.bf16.msra.mxu1 %v464_v19 }
  0xbe   : > { %989 = vmatmul.msk.bf16.vlgmr.msra.gmra.mxu1 %vm445_vm0, %v462_v20 }
  0xc4   : > { %v458_v21 = vpop.f32.mrf.mxu0 }
  0xc5   : > { %v459_v25 = vadd.f32 %v1103_v16, %v458_v21 }
  0xc7   : > { %v496_v28 = vmul.f32 0.35355338, %v459_v25 }
  0xc9   : > { %v497_v31 = vpack.c.bf16 %v496_v28, %v496_v28 }
  0xcc   : > { %v460_v22 = vpop.f32.mrf.mxu0 }
 0x13b   : > { %v484_v24 = vpop.f32.mrf.mxu1 }
 0x13c   : > { %v485_v26 = vadd.f32 %v484_v24, %v470_v23 }
 0x13e   : > { %v1561_v27 = vpack.c.bf16 %v485_v26, %v485_v26 }
 0x140   : > { %558 = vrot.lane.b32.xlu0 %v1561_v27, %s1361_s25  ;;  %v504_v29 = vsel %vm499_vm1, %v1561_v27, 0 }
 0x141   : > { %513 = vmatpush.bf16.xpose.msra.mxu2 %v504_v29 }
 0x143   : > { %v486_v30 = vpop.f32.mrf.mxu1 }
 0x148   : > { %556 = vrot.lane.b32.xlu0 %v497_v31, %s1361_s25  ;;  %990 = vmatmul.msk.bf16.vlgmr.msra.gmra.mxu2 %vm499_vm1, %v497_v31 }
 0x149   : > { %645 = vmatpush.bf16.msrb.mxu2 %v636_v34  ;;  %v493_v34 = vpack.c.bf16 %v489_v33, %v489_v33 }
 0x150   : > { %730 = vrot.lane.b32.xlu0 %v1561_v27, %s1362_s30 }
 0x158   : > { %728 = vrot.lane.b32.xlu0 %v497_v31, %s1362_s30 }
 0x1b2   : > { %v559_v35 = vpop.permute.xlu0 %558 }
 0x1b3   : > { %v564_v52 = vsel %vm499_vm1, %v559_v35, 0  ;;  %v617_v35 = vsel %vm537_vm2, %v493_v34, 0 }
 0x1b4   : > { %626 = vmatpush.bf16.msrb.mxu1 %v617_v35 }
 0x1ba   : > { %v557_v36 = vpop.permute.xlu0 %556 }
 0x1c2   : > { %v731_v37 = vpop.permute.xlu0 %730 }
 0x1c3   : > { %v736_v38 = vsel %vm499_vm1, %v731_v37, 0 }
 0x1c4   : > { %745 = vmatpush.bf16.xpose.msra.mxu2 %v736_v38 }
 0x1ca   : > { %v729_v62 = vpop.permute.xlu0 %728 }
 0x1cb   : > { %v515_v39 = vpop.f32.mrf.mxu2 }
 0x1cc   : > { %v519_v40 = vsel %vm499_vm1, %v515_v39, -inf }
 0x1cd   : > { %520 = vmax.xlane.f32.xlu1 %v519_v40 }
 0x1d3   : > { %v517_v41 = vpop.f32.mrf.mxu2 }
 0x240   : > { %v521_v42 = vpop.xlane.xlu1 %520 }
 0x241   : > { %v522_v43 = vsub.f32 %v515_v39, %v521_v42 }
 0x243   : > { %v523_v44 = vmul.f32 1.442695, %v522_v43 }
 0x245   : > { %1107 = vpow2.f32 %v523_v44 }
 0x24b   : > { %v1108_v45 = vpop.eup %1107 }
 0x24c   : > { %v525_v46 = vsel %vm499_vm1, %v1108_v45, 0.0 }
 0x24d   : > { %526 = vadd.xlane.f32.xlu2 %v525_v46 }
 0x265   : > { %532 = vrot.lane.b32.xlu2 %v1561_v27, %s1360_s13 }
 0x26d   : > { %653 = vrot.lane.b32.xlu2 %v1561_v27, %s1363_s26 }
 0x275   : > { %651 = vrot.lane.b32.xlu2 %v497_v31, %s1363_s26 }
 0x2c0   : > { %v527_v47 = vpop.xlane.xlu2 %526 }
 0x2c1   : > { %1109 = vrcp.f32 %v527_v47 }
 0x2c7   : > { %v1110_v48 = vpop.eup %1109 }
 0x2c8   : > { %v533_v49 = vpop.permute.xlu2 %532  ;;  %v529_v50 = vmul.f32 %v1110_v48, %v1108_v45  ;;  %v490_v48 = vld [vmem:[#allocation6 + $0x10] sm:$0xff] }
 0x2c9   : > { %v539_v51 = vsel %vm537_vm2, %v533_v49, 0  ;;  %v494_v49 = vpack.c.bf16 %v490_v48, %v490_v48 }
 0x2ca   : > { %548 = vmatpush.bf16.msra.mxu3 %v539_v51  ;;  %v530_v53 = vpack.c.bf16 %v529_v50, %v529_v50  ;;  %v491_v51 = vld [vmem:[#allocation6 + $0x18] sm:$0xff] }
 0x2cb   : > { %v712_v50 = vsel %vm537_vm2, %v494_v49, 0 }
 0x2cc   : > { %721 = vmatpush.bf16.msra.mxu1 %v712_v50 }
 0x2cd   : > { %991 = vmatmul.msk.bf16.vlgmr.msra.gmra.mxu3 %vm499_vm1, %v530_v53 }
 0x2ce   : > { %573 = vmatpush.bf16.xpose.msrb.mxu3 %v564_v52  ;;  %v495_v52 = vpack.c.bf16 %v491_v51, %v491_v51 }
 0x2d0   : > { %v654_v54 = vpop.permute.xlu2 %653  ;;  %v789_v53 = vsel %vm537_vm2, %v495_v52, 0 }
 0x2d1   : > { %v659_v55 = vsel %vm499_vm1, %v654_v54, 0 }
 0x2d6   : > { %668 = vmatpush.bf16.xpose.msra.mxu3 %v659_v55 }
 0x2d8   : > { %v652_v56 = vpop.permute.xlu2 %651 }
 0x2dd   : > { %992 = vmatmul.msk.bf16.vlgmr.msrb.gmra.mxu3 %vm499_vm1, %v557_v36 }
 0x2ed   : > { %996 = vmatmul.msk.bf16.vlgmr.msra.gmra.mxu3 %vm499_vm1, %v652_v56 }
 0x350   : > { %v550_v57 = vpop.f32.mrf.mxu3 }
 0x351   : > { %v554_v58 = vpack.c.bf16 %v550_v57, %v550_v57 }
 0x353   : > { %995 = vmatmul.msk.bf16.vlgmr.msrb.gmra.mxu2 %vm499_vm1, %v554_v58 }
 0x358   : > { %v552_v59 = vpop.f32.mrf.mxu3 }
 0x360   : > { %v575_v60 = vpop.f32.mrf.mxu3 }
 0x361   : > { %v579_v61 = vsel %vm499_vm1, %v575_v60, -inf }
 0x362   : > { %580 = vmax.xlane.f32.xlu0 %v579_v61 }
 0x363   : > { %999 = vmatmul.msk.bf16.vlgmr.msra.gmra.mxu2 %vm499_vm1, %v729_v62 }
 0x368   : > { %v577_v63 = vpop.f32.mrf.mxu3 }
 0x370   : > { %v670_v0 = vpop.f32.mrf.mxu3 }
 0x371   : > { %v674_v1 = vsel %vm499_vm1, %v670_v0, -inf }
 0x372   : > { %675 = vmax.xlane.f32.xlu1 %v674_v1  ;;  %v1104_v1 = vld [vmem:[#allocation7] ss:$0 sm:$0xff] }
 0x378   : > { %v672_v2 = vpop.f32.mrf.mxu3 }
 0x3d5   : > { %v581_v3 = vpop.xlane.xlu0 %580 }
 0x3d6   : > { %v582_v4 = vsub.f32 %v575_v60, %v581_v3  ;;  %v1585_v5 = vpop.f32.mrf.mxu2 }
 0x3d8   : > { %v583_v6 = vmul.f32 1.442695, %v582_v4 }
 0x3da   : > { %1111 = vpow2.f32 %v583_v6 }
 0x3de   : > { %v649_v7 = vpop.f32.mrf.mxu2 }
 0x3e0   : > { %v1112_v8 = vpop.eup %1111 }
 0x3e1   : > { %v585_v9 = vsel %vm499_vm1, %v1112_v8, 0.0 }
 0x3e2   : > { %586 = vadd.xlane.f32.xlu1 %v585_v9 }
 0x3e5   : > { %v676_v10 = vpop.xlane.xlu1 %675 }
 0x3e6   : > { %v677_v11 = vsub.f32 %v670_v0, %v676_v10  ;;  %v747_v12 = vpop.f32.mrf.mxu2 }
 0x3e7   : > { %v751_v13 = vsel %vm499_vm1, %v747_v12, -inf }
 0x3e8   : > { %v678_v15 = vmul.f32 1.442695, %v677_v11  ;;  %752 = vmax.xlane.f32.xlu2 %v751_v13 }
 0x3ea   : > { %1113 = vpow2.f32 %v678_v15 }
 0x3ee   : > { %v749_v16 = vpop.f32.mrf.mxu2 }
 0x3f0   : > { %v1114_v17 = vpop.eup %1113 }
 0x3f1   : > { %v680_v18 = vsel %vm499_vm1, %v1114_v17, 0.0 }
 0x3f2   : > { %681 = vadd.xlane.f32.xlu0 %v680_v18 }
 0x3fb   : > { %591 = vrot.lane.b32.xlu1 %v1561_v27, %s1364_s14 }
 0x403   : > { %763 = vrot.lane.b32.xlu1 %v1561_v27, %s1365_s16 }
 0x455   : > { %v587_v22 = vpop.xlane.xlu1 %586 }
 0x45b   : > { %v753_v19 = vpop.xlane.xlu2 %752 }
 0x45c   : > { %v754_v20 = vsub.f32 %v747_v12, %v753_v19 }
 0x45e   : > { %v755_v21 = vmul.f32 1.442695, %v754_v20 }
 0x460   : > { %1115 = vpow2.f32 %v755_v21 }
 0x461   : > { %1117 = vrcp.f32 %v587_v22 }
 0x465   : > { %v682_v36 = vpop.xlane.xlu0 %681 }
 0x466   : > { %v1116_v23 = vpop.eup %1115  ;;  %1119 = vrcp.f32 %v682_v36 }
 0x467   : > { %v757_v24 = vsel %vm499_vm1, %v1116_v23, 0.0  ;;  %v1118_v25 = vpop.eup %1117 }
 0x468   : > { %758 = vadd.xlane.f32.xlu2 %v757_v24  ;;  %v589_v26 = vmul.f32 %v1118_v25, %v1112_v8  ;;  %v1106_v25 = vld [vmem:[#allocation10] ss:$0 sm:$0xff] }
 0x46a   : > { %v590_v30 = vpack.c.bf16 %v589_v26, %v589_v26 }
 0x46c   : > { %v1120_v38 = vpop.eup %1119 }
 0x46d   : > { %v592_v28 = vpop.permute.xlu1 %591  ;;  %v684_v40 = vmul.f32 %v1120_v38, %v1114_v17 }
 0x46e   : > { %v597_v29 = vsel %vm537_vm2, %v592_v28, 0 }
 0x46f   : > { %606 = vmatpush.bf16.msrb.mxu0 %v597_v29  ;;  %v685_v45 = vpack.c.bf16 %v684_v40, %v684_v40 }
 0x472   : > { %993 = vmatmul.msk.bf16.vlgmr.msrb.gmra.mxu0 %vm499_vm1, %v590_v30 }
 0x475   : > { %v764_v31 = vpop.permute.xlu1 %763 }
 0x476   : > { %v769_v32 = vsel %vm537_vm2, %v764_v31, 0 }
 0x477   : > { %778 = vmatpush.bf16.msrb.mxu3 %v769_v32 }
 0x480   : > { %686 = vrot.lane.b32.xlu2 %v1561_v27, %s1366_s17 }
 0x4db   : > { %v759_v37 = vpop.xlane.xlu2 %758 }
 0x4dc   : > { %1121 = vrcp.f32 %v759_v37 }
 0x4e2   : > { %v1122_v39 = vpop.eup %1121 }
 0x4e3   : > { %v761_v41 = vmul.f32 %v1122_v39, %v1116_v23  ;;  %v687_v42 = vpop.permute.xlu2 %686  ;;  %v1105_v23 = vld [vmem:[#allocation9] ss:$0 sm:$0xff] }
 0x4e4   : > { %v692_v43 = vsel %vm537_vm2, %v687_v42, 0 }
 0x4e5   : > { %v762_v44 = vpack.c.bf16 %v761_v41, %v761_v41  ;;  %701 = vmatpush.bf16.msra.mxu0 %v692_v43 }
 0x4e7   : > { %1000 = vmatmul.msk.bf16.vlgmr.msrb.gmra.mxu3 %vm499_vm1, %v762_v44 }
 0x4e8   : > { %997 = vmatmul.msk.bf16.vlgmr.msra.gmra.mxu0 %vm499_vm1, %v685_v45 }
 0x4e9   : > { %798 = vmatpush.bf16.msrb.mxu0 %v789_v53 }
 0x4ef   : > { %v608_v27 = vpop.f32.mrf.mxu0 }
 0x4f0   : > { %v612_v46 = vpack.c.bf16 %v608_v27, %v608_v27 }
 0x4f2   : > { %994 = vmatmul.msk.bf16.vlgmr.msrb.gmra.mxu1 %vm499_vm1, %v612_v46 }
 0x4f7   : > { %v610_v47 = vpop.f32.mrf.mxu0 }
 0x565   : > { %v703_v54 = vpop.f32.mrf.mxu0 }
 0x566   : > { %v707_v55 = vpack.c.bf16 %v703_v54, %v703_v54 }
 0x568   : > { %998 = vmatmul.msk.bf16.vlgmr.msra.gmra.mxu1 %vm499_vm1, %v707_v55 }
 0x56a   : > { %v780_v56 = vpop.f32.mrf.mxu3 }
 0x56b   : > { %v784_v57 = vpack.c.bf16 %v780_v56, %v780_v56 }
 0x56d   : > { %v705_v58 = vpop.f32.mrf.mxu0  ;;  %1001 = vmatmul.msk.bf16.vlgmr.msrb.gmra.mxu0 %vm499_vm1, %v784_v57 }
 0x56f   : > { %v628_v59 = vpop.f32.mrf.mxu1 }
 0x570   : > { %v648_v63 = vadd.f32 %v1585_v5, %v628_v59 }
 0x572   : > { %v782_v60 = vpop.f32.mrf.mxu3 }
 0x577   : > { %v630_v61 = vpop.f32.mrf.mxu1 }
 0x5e5   : > { %v723_v62 = vpop.f32.mrf.mxu1 }
 0x5e6   : > { %v727_v0 = vadd.f32 %v723_v62, %v648_v63 }
 0x5ea   : > { %v800_v2 = vpop.f32.mrf.mxu0 }
 0x5eb   : > { %v804_v3 = vadd.f32 %v800_v2, %v727_v0 }
 0x5ed   : > { %v809_v4 = vadd.f32 %v1104_v1, %v804_v3  ;;  %v725_v6 = vpop.f32.mrf.mxu1 }
 0x5ef   : > { %v810_v7 = vadd.f32 %v809_v4, %v1549_v14 }
 0x5f1   : > { %v811_v8 = vsel %vm445_vm0, %v810_v7, 0.0 }
 0x5f2   : > { %v802_v9 = vpop.f32.mrf.mxu0  ;;  %812 = vadd.xlane.f32.xlu0 %v811_v8 }
 0x665   : > { %v813_v10 = vpop.xlane.xlu0 %812 }
 0x666   : > { %v814_v11 = vmul.f32 0.03125, %v813_v10 }
 0x668   : > { %v815_v12 = vsub.f32 %v810_v7, %v814_v11 }
 0x66a   : > { %v816_v13 = vmul.f32 %v815_v12, %v815_v12 }
 0x66c   : > { %v817_v15 = vsel %vm445_vm0, %v816_v13, 0.0 }
 0x66d   : > { %818 = vadd.xlane.f32.xlu1 %v817_v15 }
 0x6e0   : > { %v819_v5 = vpop.xlane.xlu1 %818 }
 0x6e1   : > { %v820_v16 = vmul.f32 0.03125, %v819_v5 }
 0x6e3   : > { %v821_v17 = vadd.f32 1e-05, %v820_v16 }
 0x6e5   : > { %1123 = vrsqrt.f32 %v821_v17  ;;  %vm828_vm4 = vweird.f32 %v821_v17 }
 0x6eb   : > { %v1124_v18 = vpop.eup %1123 }
 0x6ec   : > { %v823_v19 = vmul.f32 %v1124_v18, %v821_v17  ;;  %vm829_vm3 = vweird.f32 %v1124_v18 }
 0x6ed   : > { %vm830_vm5 = vmor %vm828_vm4, %vm829_vm3 }
 0x6ee   : > { %v824_v20 = vmul.f32 %v1124_v18, %v823_v19 }
 0x6f0   : > { %v825_v14 = vmul.f32 0.5, %v824_v20 }
 0x6f2   : > { %v826_v21 = vsub.f32 1.5, %v825_v14 }
 0x6f4   : > { %v827_v22 = vmul.f32 %v1124_v18, %v826_v21 }
 0x6f6   : > { %v831_v24 = vsel %vm830_vm5, %v1124_v18, %v827_v22 }
 0x6f7   : > { %v832_v26 = vmul.f32 %v831_v24, %v815_v12 }
 0x6f9   : > { %v837_v28 = vmul.f32 %v1105_v23, %v832_v26 }
 0x6fb   : > { %v842_v29 = vadd.f32 %v1106_v25, %v837_v28 }
 0x6fd   : > { %843 = vst.msk [vmem:[%s416_s15] sm:$0xff] %vm445_vm0, %v842_v29 }
 0x6fe PF: > { %p21_p3 = scmp.ge.s32.totalorder %s1476_s22, 4   ;;  %s1642_s27 = smov %s1343_s28 }
 0x6ff   : > { %s1643_s28 = smov %s1347_s29  ;;  %s1644_s29 = smov %s1487_s9 }
 0x700   : > { %s1645_s30 = smov %s1476_s22  ;;  %23 = sbr.rel (!%p21_p3) target bundleno = 6 (0x6), region = 115 }
 0x705   :  { %863 = vsyncpa [#allocation3], 1 }
 0x706   :  { %865 = vsyncpa [#allocation3 + $0x1], 1 }
 0x707   :  { %866 = vsyncpa [#allocation5], 1 }
 0x708   :  { %867 = vsyncpa [#allocation8], 1 }
 0x709   :  { %868 = vsyncpa [#allocation11], 1 }

// kernel: causal_decoder.12
= control target key start
LH: loop header
LB: loop body
LE: loop exit
PB: predicated region body
PF: predicated region fallthrough
CT: control target
= control target key end

     0   :  { %s499_s24 = smov 0   ;;  %s575_s0 = inlined_call_operand.vmem [shape: f32[16,32], index: 0, kind: input, shape index: {}]   ;;  %s576_s1 = inlined_call_operand.vmem [shape: f32[32,64], index: 1, kind: input, shape index: {}]   ;;  %s577_s2 = inlined_call_operand.vmem [shape: f32[1,64], index: 2, kind: input, shape index: {}]   ;;  %s578_s3 = inlined_call_operand.vmem [shape: f32[64,32], index: 3, kind: input, shape index: {}]   ;;  %s579_s4 = inlined_call_operand.vmem [shape: f32[1,32], index: 4, kind: input, shape index: {}]   ;;  %s580_s5 = inlined_call_operand.vmem [shape: f32[1,32], index: 5, kind: input, shape index: {}]   ;;  %s581_s6 = inlined_call_operand.vmem [shape: f32[1,32], index: 6, kind: input, shape index: {}]   ;;  %s582_s7 = inlined_call_operand.vmem [shape: f32[16,32], index: 7, kind: output, shape index: {}]  }
   0x1 LB: > { %s426_s25 = sadd.s32 4294967295, %s457_s24   ;;  %p430_p0 = scmp.ge.s32.totalorder %s457_s24, 1  ;;  %s457_s24 = sphi %s499_s24, %s17_s24  }
   0x2   : > { %p236_p1 = scmp.lt.s32.totalorder %s457_s24, 3 }
   0x4   : > { %p237_p2 = pnand %p430_p0, %p236_p1 }
   0x5   : > { %p266_p3 = scmp.lt.s32.totalorder (!%p237_p2), %s426_s25, 1 }
   0x6   : > { %240 = sbr.rel (%p237_p2) target bundleno = 552 (0x228), region = 48 }
   0xb   : > { %v279_v0 = vld [vmem:[%s576_s1 + $0x10] sm:$0xff]  ;;  %v280_v1 = vld [vmem:[%s576_s1 + $0x18] sm:$0xff]  ;;  %v277_v2 = vld [vmem:[%s576_s1] sm:$0xff]  ;;  %s584_s25 = smov (!%p266_p3, %s426_s25), 1  ;;  %vm287_vm0 = vcmask 261120   ;;  %vm322_vm1 = vcmask 523264  }
   0xc   : > { %v282_v3 = vpack.c.bf16 %v280_v1, %v279_v0  ;;  %v278_v4 = vld [vmem:[%s576_s1 + $0x8] sm:$0xff]  ;;  %v312_v5 = vld [vmem:[%s578_s3 + $0x30] sm:$0xff]  ;;  %v313_v6 = vld [vmem:[%s578_s3 + $0x38] sm:$0xff]  ;;  %s431_s19 = sshll.u32 %s584_s25, 3 }
   0xd   : > { %v317_v7 = vpack.c.bf16 %v313_v6, %v312_v5  ;;  %v310_v8 = vld [vmem:[%s578_s3 + $0x20] sm:$0xff]  ;;  %v311_v9 = vld [vmem:[%s578_s3 + $0x28] sm:$0xff]  ;;  %v281_v10 = vpack.c.bf16 %v278_v4, %v277_v2  ;;  %s269_s22 = scalar_lea.vmem %s575_s0, %s431_s19  ;;  %v308_v14 = vld [vmem:[%s578_s3 + $0x10] sm:$0xff]  ;;  %s273_s21 = scalar_lea.vmem %s582_s7, %s431_s19 }
   0xe   : > { %297 = vmatpush.bf16.msra.mxu0 %v282_v3  ;;  %v316_v11 = vpack.c.bf16 %v311_v9, %v310_v8  ;;  %v275_v12 = vld [vmem:[%s269_s22] sm:$0xff]  ;;  %v309_v15 = vld [vmem:[%s578_s3 + $0x18] sm:$0xff]  ;;  %v307_v18 = vld [vmem:[%s578_s3 + $0x8] sm:$0xff] }
   0xf   : > { %330 = vmatpush.bf16.msra.mxu1 %v317_v7  ;;  %v276_v13 = vpack.c.bf16 %v275_v12, %v275_v12  ;;  %v315_v16 = vpack.c.bf16 %v309_v15, %v308_v14  ;;  %v306_v17 = vld [vmem:[%s578_s3] sm:$0xff] }
  0x10   : > { %v314_v19 = vpack.c.bf16 %v307_v18, %v306_v17  ;;  %v445_v20 = vld [vmem:[%s577_s2] ss:$0 sm:$0xff] }
  0x11   : > { %v446_v26 = vld [vmem:[%s579_s4] ss:$0 sm:$0xff] }
  0x12   : > { %298 = vmatpush.bf16.msra.mxu0 %v281_v10  ;;  %v447_v46 = vld [vmem:[%s580_s5] ss:$0 sm:$0xff] }
  0x13   : > { %331 = vmatpush.bf16.msra.mxu1 %v316_v11  ;;  %v448_v48 = vld [vmem:[%s581_s6] ss:$0 sm:$0xff] }
  0x15   : > { %433 = vmatmul.msk.bf16.vlgmr.msra.gmra.mxu0 %vm287_vm0, %v276_v13 }
  0x17   : > { %332 = vmatpush.bf16.msra.mxu1 %v315_v16 }
  0x1b   : > { %333 = vmatpush.bf16.msra.mxu1 %v314_v19 }
  0x92   : > { %v300_v21 = vpop.f32.mrf.mxu0 }
  0x93   : > { %v301_v22 = vadd.f32 %v445_v20, %v300_v21 }
  0x95   : > { %v304_v23 = vmax.f32 %v301_v22, 0.0 }
  0x97   : > { %v305_v24 = vpack.c.bf16 %v304_v23, %v304_v23 }
  0x99   : > { %434 = vmatmul.msk.bf16.vlgmr.msra.gmra.mxu1 %vm322_vm1, %v305_v24 }
  0x9a   : > { %v302_v25 = vpop.f32.mrf.mxu0 }
 0x116   : > { %v335_v27 = vpop.f32.mrf.mxu1 }
 0x117   : > { %v336_v28 = vadd.f32 %v446_v26, %v335_v27 }
 0x119   : > { %v339_v29 = vadd.f32 %v336_v28, %v275_v12 }
 0x11b   : > { %v340_v30 = vsel %vm287_vm0, %v339_v29, 0.0 }
 0x11c   : > { %341 = vadd.xlane.f32.xlu0 %v340_v30 }
 0x11e   : > { %v337_v31 = vpop.f32.mrf.mxu1 }
 0x18f   : > { %v342_v32 = vpop.xlane.xlu0 %341 }
 0x190   : > { %v343_v33 = vmul.f32 0.03125, %v342_v32 }
 0x192   : > { %v344_v34 = vsub.f32 %v339_v29, %v343_v33 }
 0x194   : > { %v345_v35 = vmul.f32 %v344_v34, %v344_v34 }
 0x196   : > { %v346_v36 = vsel %vm287_vm0, %v345_v35, 0.0 }
 0x197   : > { %347 = vadd.xlane.f32.xlu0 %v346_v36 }
 0x20a   : > { %v348_v37 = vpop.xlane.xlu0 %347 }
 0x20b   : > { %v349_v38 = vmul.f32 0.03125, %v348_v37 }
 0x20d   : > { %v350_v39 = vadd.f32 1e-05, %v349_v38 }
 0x20f   : > { %449 = vrsqrt.f32 %v350_v39  ;;  %vm357_vm3 = vweird.f32 %v350_v39 }
 0x215   : > { %v450_v40 = vpop.eup %449 }
 0x216   : > { %v352_v41 = vmul.f32 %v450_v40, %v350_v39  ;;  %vm358_vm2 = vweird.f32 %v450_v40 }
 0x217   : > { %vm359_vm4 = vmor %vm357_vm3, %vm358_vm2 }
 0x218   : > { %v353_v42 = vmul.f32 %v450_v40, %v352_v41 }
 0x21a   : > { %v354_v43 = vmul.f32 0.5, %v353_v42 }
 0x21c   : > { %v355_v44 = vsub.f32 1.5, %v354_v43 }
 0x21e   : > { %v356_v45 = vmul.f32 %v450_v40, %v355_v44 }
 0x220   : > { %v360_v47 = vsel %vm359_vm4, %v450_v40, %v356_v45 }
 0x221   : > { %v361_v49 = vmul.f32 %v360_v47, %v344_v34 }
 0x223   : > { %v366_v50 = vmul.f32 %v447_v46, %v361_v49 }
 0x225   : > { %v371_v51 = vadd.f32 %v448_v48, %v366_v50 }
 0x227   : > { %372 = vst.msk [vmem:[%s273_s21] sm:$0xff] %vm287_vm0, %v371_v51 }
 0x228 PF: > { %s17_s24 = sadd.s32 1, %s457_s24  }
 0x229   : > { %p14_p4 = scmp.ge.s32.totalorder %s17_s24, 4  }
 0x22b   :  { %16 = sbr.rel (!%p14_p4) target bundleno = 1 (0x1), region = 78 }

</bundles_post_ra>
